<compile_context>
chip_gen: v5e
topology: v5e:2x2
jax: 0.10.0
libtpu: 0.0.40
codegen_flags: <defaults>
</compile_context>

<pallas_src>
import functools
import math

import jax
import jax.numpy as jnp
from jax.experimental import pallas as pl
from jax.experimental.pallas import tpu as pltpu


# ---------------------------------------------------------------------------
# Small static helpers (Python ints only)
# ---------------------------------------------------------------------------
def _cdiv(a, b):
    return -(-a // b)


def _round_up(a, b):
    return _cdiv(a, b) * b


def _row_tiling(rb, target=512):
    """Row tile (multiple of 8), padded row count, number of grid tiles."""
    ntiles = max(2, _cdiv(rb, target))          # >=2 steps so megacore has work
    mt = max(8, _round_up(_cdiv(rb, ntiles), 8))
    return mt, mt * ntiles, ntiles


def _geom(B, H, W):
    wp, hp = W + 2, H + 2
    rb = B * hp * wp                            # rows of the padded slab
    halo = wp + 1                               # max row shift of a 3x3 tap
    mt, rb_pad, ntiles = _row_tiling(rb)
    return dict(B=B, H=H, W=W, Wp=wp, Hp=hp, Rb=rb, HALO=halo,
                Mt=mt, Rb_pad=rb_pad, ntiles=ntiles,
                RP=rb_pad + 2 * halo)


# ---------------------------------------------------------------------------
# Slab layout glue (cheap XLA ops; ~1x the activation size, no 9x im2col)
# Slab row index r = b*(H+2)*(W+2) + h_pad*(W+2) + w_pad, lanes = channels.
# ---------------------------------------------------------------------------
def _to_slab(x_nhwc, g):
    B, H, W, C = x_nhwc.shape
    xp = jnp.pad(x_nhwc, ((0, 0), (1, 1), (1, 1), (0, 0)))
    slab = xp.reshape(g["Rb"], C)
    return jnp.pad(slab, ((0, g["Rb_pad"] - g["Rb"]), (0, 0)))


def _from_slab(slab, g):
    C = slab.shape[-1]
    x = slab[:g["Rb"]].reshape(g["B"], g["Hp"], g["Wp"], C)
    return x[:, 1:g["H"] + 1, 1:g["W"] + 1, :]


def _slab_ext(slab, g):
    # Shift the slab down by HALO rows (with zeros) so in-kernel tap reads
    # base + ky*(W+2) + kx never go out of range.
    return jnp.pad(slab, ((g["HALO"], g["HALO"]), (0, 0)))


def _mask_ext(g):
    # 1.0 at interior (real-pixel) rows of the HALO-shifted slab, else 0.0.
    m = jnp.pad(jnp.ones((g["B"], g["H"], g["W"], 1), jnp.float32),
                ((0, 0), (1, 1), (1, 1), (0, 0))).reshape(g["Rb"], 1)
    return jnp.pad(m, ((g["HALO"], g["Rb_pad"] - g["Rb"] + g["HALO"]), (0, 0)))


# ---------------------------------------------------------------------------
# The fused conv kernel
# ---------------------------------------------------------------------------
def _conv_kernel(*refs, Mt, HALO, prologue, epilogue):
    """Fused (prologue -> 3x3 conv -> epilogue) over one row tile.

    prologue: "none" | "actnorm" ((x+loc)*scale) | "bn_relu" (relu(x*a+off))
    epilogue: "stats"  -> emit conv output + per-channel sum / sum-of-squares
              "couple" -> emit out_b = (actnorm(in_b)+t)*sigmoid(log_s) and
                          per-row log|s| contributions
    """
    it = iter(refs)
    p_ref = next(it)      # (RP, Cin)  HALO-shifted activation slab (resident)
    m_ref = next(it)      # (RP, 1)    interior mask (resident)
    w_ref = next(it)      # (9, Cin, Cout) taps, ky*3+kx major
    b_ref = next(it)      # (1, Cout)
    if prologue != "none":
        a_ref = next(it)  # (1, Cin)
        c_ref = next(it)  # (1, Cin)
    if epilogue == "couple":
        ib_ref = next(it)  # (Mt, cb)  raw in_b rows for this tile
        sb_ref = next(it)  # (1, cb)   actnorm scale for in_b channels
        lb_ref = next(it)  # (1, cb)   actnorm loc   for in_b channels
        ob_ref = next(it)  # (Mt, cb)  out
        ld_ref = next(it)  # (Mt, 1)   out
    else:
        o_ref = next(it)    # (Mt, Cout) out
        sum_ref = next(it)  # (8, Cout)  out (per-tile partial, broadcast rows)
        ssq_ref = next(it)  # (8, Cout)  out

    cout = w_ref.shape[2]
    wp = HALO - 1                                  # padded image width W+2
    base = pl.multiple_of(pl.program_id(0) * Mt, 8)

    if prologue != "none":
        a_v = a_ref[...]
        c_v = c_ref[...]

    acc = jnp.zeros((Mt, cout), jnp.float32)
    for ky in range(3):
        for kx in range(3):
            joff = ky * wp + kx
            xj = p_ref[pl.ds(base + joff, Mt), :]      # (Mt, Cin)
            mj = m_ref[pl.ds(base + joff, Mt), :]      # (Mt, 1)
            if prologue == "actnorm":
                yj = (xj + c_v) * a_v * mj
            elif prologue == "bn_relu":
                yj = jnp.maximum(xj * a_v + c_v, 0.0) * mj
            else:
                yj = xj * mj
            acc = acc + jnp.dot(yj, w_ref[ky * 3 + kx],
                                preferred_element_type=jnp.float32)
    acc = acc + b_ref[...]

    omask = m_ref[pl.ds(base + HALO, Mt), :]           # interior mask of outputs

    if epilogue == "couple":
        ca = cout // 2
        logs = acc[:, :ca]
        tt = acc[:, ca:]
        s = 1.0 / (1.0 + jnp.exp(-logs))               # sigmoid(log_s)
        ibn = (ib_ref[...] + lb_ref[...]) * sb_ref[...]  # ActNorm on in_b half
        ob_ref[...] = (ibn + tt) * s
        # log|s| = log(sigmoid(log_s)) = -softplus(-log_s), numerically safe.
        lsig = jnp.minimum(logs, 0.0) - jnp.log(1.0 + jnp.exp(-jnp.abs(logs)))
        ld_ref[...] = jnp.sum(lsig, axis=1, keepdims=True) * omask
    else:
        o_ref[...] = acc
        am = acc * omask
        sum_ref[...] = jnp.broadcast_to(
            jnp.sum(am, axis=0, keepdims=True), (8, cout))
        ssq_ref[...] = jnp.broadcast_to(
            jnp.sum(am * acc, axis=0, keepdims=True), (8, cout))


def fused_conv(g, p_ext, mask_ext, w9, bias, *, prologue="none", aff=None,
               epilogue="stats", couple=None):
    RP, Mt, ntiles = g["RP"], g["Mt"], g["ntiles"]
    Rb_pad, HALO = g["Rb_pad"], g["HALO"]
    Cin = p_ext.shape[-1]
    Cout = w9.shape[-1]

    inputs = [p_ext, mask_ext, w9, bias.reshape(1, Cout)]
    in_specs = [
        pl.BlockSpec((RP, Cin), lambda t: (0, 0)),
        pl.BlockSpec((RP, 1), lambda t: (0, 0)),
        pl.BlockSpec((9, Cin, Cout), lambda t: (0, 0, 0)),
        pl.BlockSpec((1, Cout), lambda t: (0, 0)),
    ]
    if prologue != "none":
        a_vec, c_vec = aff
        inputs += [a_vec.reshape(1, Cin), c_vec.reshape(1, Cin)]
        in_specs += [pl.BlockSpec((1, Cin), lambda t: (0, 0)),
                     pl.BlockSpec((1, Cin), lambda t: (0, 0))]
    if epilogue == "couple":
        ib_slab, sb, lb = couple
        cb = ib_slab.shape[-1]
        inputs += [ib_slab, sb.reshape(1, cb), lb.reshape(1, cb)]
        in_specs += [pl.BlockSpec((Mt, cb), lambda t: (t, 0)),
                     pl.BlockSpec((1, cb), lambda t: (0, 0)),
                     pl.BlockSpec((1, cb), lambda t: (0, 0))]
        out_shape = (jax.ShapeDtypeStruct((Rb_pad, cb), jnp.float32),
                     jax.ShapeDtypeStruct((Rb_pad, 1), jnp.float32))
        out_specs = (pl.BlockSpec((Mt, cb), lambda t: (t, 0)),
                     pl.BlockSpec((Mt, 1), lambda t: (t, 0)))
    else:
        out_shape = (jax.ShapeDtypeStruct((Rb_pad, Cout), jnp.float32),
                     jax.ShapeDtypeStruct((ntiles * 8, Cout), jnp.float32),
                     jax.ShapeDtypeStruct((ntiles * 8, Cout), jnp.float32))
        out_specs = (pl.BlockSpec((Mt, Cout), lambda t: (t, 0)),
                     pl.BlockSpec((8, Cout), lambda t: (t, 0)),
                     pl.BlockSpec((8, Cout), lambda t: (t, 0)))

    kern = functools.partial(_conv_kernel, Mt=Mt, HALO=HALO,
                             prologue=prologue, epilogue=epilogue)
    return pl.pallas_call(
        kern,
        out_shape=out_shape,
        grid=(ntiles,),
        in_specs=in_specs,
        out_specs=out_specs,
        compiler_params=pltpu.CompilerParams(
            dimension_semantics=("parallel",)),
    )(*inputs)


# ---------------------------------------------------------------------------
# Glow modules (glue in plain JAX, all heavy math in the fused kernel)
# ---------------------------------------------------------------------------
def coupling_forward_fused(x_nhwc, flow_params, g, act_scale, act_loc,
                           mask_swap):
    """ActNorm + AffineCoupling of one flow, fused into the conv kernels."""
    B, H, W, C = x_nhwc.shape
    assert C % 2 == 0
    ca = C // 2
    if mask_swap:
        x_a, x_b = x_nhwc[..., ca:], x_nhwc[..., :ca]
        s_a, l_a = act_scale[ca:], act_loc[ca:]
        s_b, l_b = act_scale[:ca], act_loc[:ca]
    else:
        x_a, x_b = x_nhwc[..., :ca], x_nhwc[..., ca:]
        s_a, l_a = act_scale[:ca], act_loc[:ca]
        s_b, l_b = act_scale[ca:], act_loc[ca:]

    mask_ext = _mask_ext(g)
    p_ext = _slab_ext(_to_slab(x_a, g), g)
    count = float(B * H * W)

    convs = flow_params["convs"]
    bns = flow_params["bn"]
    n = len(convs)

    prologue, aff = "actnorm", (s_a, l_a)
    for i in range(n - 1):
        w9, b = convs[i]
        h_slab, sums, ssqs = fused_conv(g, p_ext, mask_ext, w9, b,
                                        prologue=prologue, aff=aff,
                                        epilogue="stats")
        gamma, beta = bns[i]
        tot = jnp.sum(sums, axis=0) / 8.0      # 8 identical rows per tile
        tot2 = jnp.sum(ssqs, axis=0) / 8.0
        mean = tot / count
        var = jnp.maximum(tot2 / count - mean * mean, 0.0)   # biased, BN train
        a_bn = gamma / jnp.sqrt(var + 1e-5)
        off_bn = beta - mean * a_bn
        p_ext = _slab_ext(h_slab, g)           # halo pad only; ~1x traffic
        prologue, aff = "bn_relu", (a_bn, off_bn)

    w9, b = convs[-1]
    ib_slab = _to_slab(x_b, g)
    outb_slab, ld_rows = fused_conv(g, p_ext, mask_ext, w9, b,
                                    prologue=prologue, aff=aff,
                                    epilogue="couple",
                                    couple=(ib_slab, s_b, l_b))
    out_b = _from_slab(outb_slab, g)
    ld_coup = jnp.sum(ld_rows[:g["Rb"], 0].reshape(B, g["Hp"] * g["Wp"]),
                      axis=1)

    in_a_norm = (x_a + l_a) * s_a              # ActNorm'd pass-through half
    if mask_swap:
        out = jnp.concatenate([out_b, in_a_norm], axis=-1)
    else:
        out = jnp.concatenate([in_a_norm, out_b], axis=-1)
    return out, ld_coup


def flow_forward(x_nhwc, flow_params, g, mask_swap):
    _, H, W, _ = x_nhwc.shape
    # ActNorm data-dependent init (first-forward semantics), use_shift=False.
    mean = jnp.mean(x_nhwc, axis=(0, 1, 2))
    std = jnp.std(x_nhwc, axis=(0, 1, 2), ddof=1)     # torch.std is unbiased
    loc = -mean
    scale = 1.0 / (std + 1e-6)
    ld_act = H * W * jnp.sum(jnp.log(jnp.abs(scale)))
    # conv_lu == 2: no invertible 1x1 conv (det1 = 0).
    out, ld_coup = coupling_forward_fused(x_nhwc, flow_params, g, scale, loc,
                                          mask_swap)
    return out, ld_act + ld_coup


def squeeze_nhwc(x, fold):
    B, H, W, C = x.shape
    x = x.reshape(B, H // fold, fold, W // fold, fold, C)
    x = jnp.transpose(x, (0, 1, 3, 5, 2, 4))          # (b, h', w', c, fy, fx)
    return x.reshape(B, H // fold, W // fold, C * fold * fold)


def unsqueeze_nhwc(x, fold):
    B, H, W, C = x.shape
    c = C // (fold * fold)
    x = x.reshape(B, H, W, c, fold, fold)
    x = jnp.transpose(x, (0, 1, 4, 2, 5, 3))          # (b, h', fy, w', fx, c)
    return x.reshape(B, H * fold, W * fold, c)


def block_forward(x_nhwc, flows_params, fold):
    out = squeeze_nhwc(x_nhwc, fold)
    B, H, W, _ = out.shape
    g = _geom(B, H, W)
    logdet = 0.0
    for i, fp in enumerate(flows_params):
        out, det = flow_forward(out, fp, g, mask_swap=bool(i % 2))
        logdet = logdet + det
    return unsqueeze_nhwc(out, fold), logdet


def glow_forward(x_nchw, params, *, fold):
    out = jnp.transpose(x_nchw, (0, 2, 3, 1))         # NCHW -> NHWC once
    logdet = 0.0
    for flows_params in params:
        out, det = block_forward(out, flows_params, fold)
        logdet = logdet + det
    return jnp.transpose(out, (0, 3, 1, 2)), logdet   # back to NCHW once


# ---------------------------------------------------------------------------
# Deterministic parameter init (synthetic; shapes per AffineCoupling.__init__)
# Conv weights stored as (9, Cin, Cout) with tap index ky*3+kx.
# ---------------------------------------------------------------------------
def init_glow_params(key, in_channel, n_flow, n_block, fold, hidden_channels):
    c_sq = in_channel * fold * fold
    blocks = []
    for _ in range(n_block):
        flows = []
        for _ in range(n_flow):
            last_h = math.ceil(c_sq / 2)
            vh = tuple(hidden_channels) + (c_sq,)     # affine=True head sizes
            convs, bns = [], []
            for h in vh:
                key, kw, kb = jax.random.split(key, 3)
                bound = 1.0 / math.sqrt(last_h * 9)
                w = jax.random.uniform(kw, (9, last_h, h), jnp.float32,
                                       minval=-bound, maxval=bound)
                b = jax.random.uniform(kb, (h,), jnp.float32,
                                       minval=-bound, maxval=bound)
                convs.append((w, b))
                # BatchNorm2d defaults: weight=1, bias=0
                bns.append((jnp.ones((h,), jnp.float32),
                            jnp.zeros((h,), jnp.float32)))
                last_h = h
            flows.append({"convs": convs, "bn": bns})
        blocks.append(flows)
    return blocks


if __name__ == "__main__":
    in_channel, n_flow, n_block, fold = 3, 2, 2, 2
    hidden_channels = (16,)
    B, H, W = 2, 16, 16

    root = jax.random.PRNGKey(0)
    k_x, k_p = jax.random.split(root)
    x = jax.random.normal(k_x, (B, in_channel, H, W), dtype=jnp.float32)
    params = init_glow_params(k_p, in_channel, n_flow, n_block, fold,
                              hidden_channels)

    fwd = jax.jit(functools.partial(glow_forward, fold=fold))
    out, logdet = fwd(x, params)
    jax.block_until_ready((out, logdet))

    assert out.shape == (B, in_channel, H, W), out.shape
    assert logdet.shape == (B,), logdet.shape
    assert bool(jnp.all(jnp.isfinite(out))) and bool(jnp.all(jnp.isfinite(logdet)))
    print("KERNEL_OK")
</pallas_src>

<mosaic_0001>
module attributes {stable_mosaic.version = 11 : i64} {
  func.func @_conv_kernel(%arg0: i32, %arg1: memref<230x6xf32, #tpu.memory_space<vmem>>, %arg2: memref<230x1xf32, #tpu.memory_space<vmem>>, %arg3: memref<9x6x16xf32, #tpu.memory_space<vmem>>, %arg4: memref<1x16xf32, #tpu.memory_space<vmem>>, %arg5: memref<1x6xf32, #tpu.memory_space<vmem>>, %arg6: memref<1x6xf32, #tpu.memory_space<vmem>>, %arg7: memref<104x16xf32, #tpu.memory_space<vmem>>, %arg8: memref<8x16xf32, #tpu.memory_space<vmem>>, %arg9: memref<8x16xf32, #tpu.memory_space<vmem>>) attributes {dimension_semantics = [#tpu.dimension_semantics<parallel>], iteration_bounds = array<i64: 2>, scalar_prefetch = 0 : i64, scratch_operands = 0 : i64, tpu.core_type = #tpu.core_type<tc>, window_params = [{pipeline_mode = #tpu.pipeline_mode<synchronous>, transform_indices = @transform_0, window_bounds = array<i64: 230, 6>}, {pipeline_mode = #tpu.pipeline_mode<synchronous>, transform_indices = @transform_1, window_bounds = array<i64: 230, 1>}, {pipeline_mode = #tpu.pipeline_mode<synchronous>, transform_indices = @transform_2, window_bounds = array<i64: 9, 6, 16>}, {pipeline_mode = #tpu.pipeline_mode<synchronous>, transform_indices = @transform_3, window_bounds = array<i64: 1, 16>}, {pipeline_mode = #tpu.pipeline_mode<synchronous>, transform_indices = @transform_4, window_bounds = array<i64: 1, 6>}, {pipeline_mode = #tpu.pipeline_mode<synchronous>, transform_indices = @transform_5, window_bounds = array<i64: 1, 6>}, {transform_indices = @transform_6, window_bounds = array<i64: 104, 16>}, {transform_indices = @transform_7, window_bounds = array<i64: 8, 16>}, {transform_indices = @transform_8, window_bounds = array<i64: 8, 16>}]} {
    %c104_i32 = arith.constant 104 : i32
    %0 = arith.muli %arg0, %c104_i32 : i32
    %1 = tpu.assume_multiple %0, 8 : i32
    %c0 = arith.constant 0 : index
    %c0_0 = arith.constant 0 : index
    %2 = vector.load %arg5[%c0, %c0_0] : memref<1x6xf32, #tpu.memory_space<vmem>>, vector<1x6xf32>
    %c0_1 = arith.constant 0 : index
    %c0_2 = arith.constant 0 : index
    %3 = vector.load %arg6[%c0_1, %c0_2] : memref<1x6xf32, #tpu.memory_space<vmem>>, vector<1x6xf32>
    %cst = arith.constant 0.000000e+00 : f32
    %4 = vector.broadcast %cst : f32 to vector<104x16xf32>
    %c0_i32 = arith.constant 0 : i32
    %5 = arith.addi %1, %c0_i32 : i32
    %6 = arith.index_cast %5 : i32 to index
    %c0_3 = arith.constant 0 : index
    %7 = vector.load %arg1[%6, %c0_3] : memref<230x6xf32, #tpu.memory_space<vmem>>, vector<104x6xf32>
    %c0_i32_4 = arith.constant 0 : i32
    %8 = arith.addi %1, %c0_i32_4 : i32
    %9 = arith.index_cast %8 : i32 to index
    %c0_5 = arith.constant 0 : index
    %10 = vector.load %arg2[%9, %c0_5] : memref<230x1xf32, #tpu.memory_space<vmem>>, vector<104x1xf32>
    %11 = vector.broadcast %3 : vector<1x6xf32> to vector<104x6xf32>
    %12 = arith.addf %7, %11 : vector<104x6xf32>
    %13 = vector.broadcast %2 : vector<1x6xf32> to vector<104x6xf32>
    %14 = arith.mulf %12, %13 : vector<104x6xf32>
    %15 = vector.broadcast %10 : vector<104x1xf32> to vector<104x6xf32>
    %16 = arith.mulf %14, %15 : vector<104x6xf32>
    %c0_6 = arith.constant 0 : index
    %c0_7 = arith.constant 0 : index
    %c0_8 = arith.constant 0 : index
    %17 = vector.load %arg3[%c0_6, %c0_7, %c0_8] : memref<9x6x16xf32, #tpu.memory_space<vmem>>, vector<1x6x16xf32>
    %18 = vector.shape_cast %17 : vector<1x6x16xf32> to vector<6x16xf32>
    %cst_9 = arith.constant dense<0.000000e+00> : vector<104x16xf32>
    %19 = tpu.matmul %16, %18, %cst_9 {dimension_numbers = #tpu.dot_dimension_numbers<[1], [0], [0], [1], [0, 0, 1, 1], [], []>} : vector<104x6xf32>, vector<6x16xf32>, vector<104x16xf32> -> vector<104x16xf32>
    %20 = arith.addf %4, %19 : vector<104x16xf32>
    %c1_i32 = arith.constant 1 : i32
    %21 = arith.addi %1, %c1_i32 : i32
    %22 = arith.index_cast %21 : i32 to index
    %c0_10 = arith.constant 0 : index
    %23 = vector.load %arg1[%22, %c0_10] : memref<230x6xf32, #tpu.memory_space<vmem>>, vector<104x6xf32>
    %c1_i32_11 = arith.constant 1 : i32
    %24 = arith.addi %1, %c1_i32_11 : i32
    %25 = arith.index_cast %24 : i32 to index
    %c0_12 = arith.constant 0 : index
    %26 = vector.load %arg2[%25, %c0_12] : memref<230x1xf32, #tpu.memory_space<vmem>>, vector<104x1xf32>
    %27 = vector.broadcast %3 : vector<1x6xf32> to vector<104x6xf32>
    %28 = arith.addf %23, %27 : vector<104x6xf32>
    %29 = vector.broadcast %2 : vector<1x6xf32> to vector<104x6xf32>
    %30 = arith.mulf %28, %29 : vector<104x6xf32>
    %31 = vector.broadcast %26 : vector<104x1xf32> to vector<104x6xf32>
    %32 = arith.mulf %30, %31 : vector<104x6xf32>
    %c1 = arith.constant 1 : index
    %c0_13 = arith.constant 0 : index
    %c0_14 = arith.constant 0 : index
    %33 = vector.load %arg3[%c1, %c0_13, %c0_14] : memref<9x6x16xf32, #tpu.memory_space<vmem>>, vector<1x6x16xf32>
    %34 = vector.shape_cast %33 : vector<1x6x16xf32> to vector<6x16xf32>
    %cst_15 = arith.constant dense<0.000000e+00> : vector<104x16xf32>
    %35 = tpu.matmul %32, %34, %cst_15 {dimension_numbers = #tpu.dot_dimension_numbers<[1], [0], [0], [1], [0, 0, 1, 1], [], []>} : vector<104x6xf32>, vector<6x16xf32>, vector<104x16xf32> -> vector<104x16xf32>
    %36 = arith.addf %20, %35 : vector<104x16xf32>
    %c2_i32 = arith.constant 2 : i32
    %37 = arith.addi %1, %c2_i32 : i32
    %38 = arith.index_cast %37 : i32 to index
    %c0_16 = arith.constant 0 : index
    %39 = vector.load %arg1[%38, %c0_16] : memref<230x6xf32, #tpu.memory_space<vmem>>, vector<104x6xf32>
    %c2_i32_17 = arith.constant 2 : i32
    %40 = arith.addi %1, %c2_i32_17 : i32
    %41 = arith.index_cast %40 : i32 to index
    %c0_18 = arith.constant 0 : index
    %42 = vector.load %arg2[%41, %c0_18] : memref<230x1xf32, #tpu.memory_space<vmem>>, vector<104x1xf32>
    %43 = vector.broadcast %3 : vector<1x6xf32> to vector<104x6xf32>
    %44 = arith.addf %39, %43 : vector<104x6xf32>
    %45 = vector.broadcast %2 : vector<1x6xf32> to vector<104x6xf32>
    %46 = arith.mulf %44, %45 : vector<104x6xf32>
    %47 = vector.broadcast %42 : vector<104x1xf32> to vector<104x6xf32>
    %48 = arith.mulf %46, %47 : vector<104x6xf32>
    %c2 = arith.constant 2 : index
    %c0_19 = arith.constant 0 : index
    %c0_20 = arith.constant 0 : index
    %49 = vector.load %arg3[%c2, %c0_19, %c0_20] : memref<9x6x16xf32, #tpu.memory_space<vmem>>, vector<1x6x16xf32>
    %50 = vector.shape_cast %49 : vector<1x6x16xf32> to vector<6x16xf32>
    %cst_21 = arith.constant dense<0.000000e+00> : vector<104x16xf32>
    %51 = tpu.matmul %48, %50, %cst_21 {dimension_numbers = #tpu.dot_dimension_numbers<[1], [0], [0], [1], [0, 0, 1, 1], [], []>} : vector<104x6xf32>, vector<6x16xf32>, vector<104x16xf32> -> vector<104x16xf32>
    %52 = arith.addf %36, %51 : vector<104x16xf32>
    %c10_i32 = arith.constant 10 : i32
    %53 = arith.addi %1, %c10_i32 : i32
    %54 = arith.index_cast %53 : i32 to index
    %c0_22 = arith.constant 0 : index
    %55 = vector.load %arg1[%54, %c0_22] : memref<230x6xf32, #tpu.memory_space<vmem>>, vector<104x6xf32>
    %c10_i32_23 = arith.constant 10 : i32
    %56 = arith.addi %1, %c10_i32_23 : i32
    %57 = arith.index_cast %56 : i32 to index
    %c0_24 = arith.constant 0 : index
    %58 = vector.load %arg2[%57, %c0_24] : memref<230x1xf32, #tpu.memory_space<vmem>>, vector<104x1xf32>
    %59 = vector.broadcast %3 : vector<1x6xf32> to vector<104x6xf32>
    %60 = arith.addf %55, %59 : vector<104x6xf32>
    %61 = vector.broadcast %2 : vector<1x6xf32> to vector<104x6xf32>
    %62 = arith.mulf %60, %61 : vector<104x6xf32>
    %63 = vector.broadcast %58 : vector<104x1xf32> to vector<104x6xf32>
    %64 = arith.mulf %62, %63 : vector<104x6xf32>
    %c3 = arith.constant 3 : index
    %c0_25 = arith.constant 0 : index
    %c0_26 = arith.constant 0 : index
    %65 = vector.load %arg3[%c3, %c0_25, %c0_26] : memref<9x6x16xf32, #tpu.memory_space<vmem>>, vector<1x6x16xf32>
    %66 = vector.shape_cast %65 : vector<1x6x16xf32> to vector<6x16xf32>
    %cst_27 = arith.constant dense<0.000000e+00> : vector<104x16xf32>
    %67 = tpu.matmul %64, %66, %cst_27 {dimension_numbers = #tpu.dot_dimension_numbers<[1], [0], [0], [1], [0, 0, 1, 1], [], []>} : vector<104x6xf32>, vector<6x16xf32>, vector<104x16xf32> -> vector<104x16xf32>
    %68 = arith.addf %52, %67 : vector<104x16xf32>
    %c11_i32 = arith.constant 11 : i32
    %69 = arith.addi %1, %c11_i32 : i32
    %70 = arith.index_cast %69 : i32 to index
    %c0_28 = arith.constant 0 : index
    %71 = vector.load %arg1[%70, %c0_28] : memref<230x6xf32, #tpu.memory_space<vmem>>, vector<104x6xf32>
    %c11_i32_29 = arith.constant 11 : i32
    %72 = arith.addi %1, %c11_i32_29 : i32
    %73 = arith.index_cast %72 : i32 to index
    %c0_30 = arith.constant 0 : index
    %74 = vector.load %arg2[%73, %c0_30] : memref<230x1xf32, #tpu.memory_space<vmem>>, vector<104x1xf32>
    %75 = vector.broadcast %3 : vector<1x6xf32> to vector<104x6xf32>
    %76 = arith.addf %71, %75 : vector<104x6xf32>
    %77 = vector.broadcast %2 : vector<1x6xf32> to vector<104x6xf32>
    %78 = arith.mulf %76, %77 : vector<104x6xf32>
    %79 = vector.broadcast %74 : vector<104x1xf32> to vector<104x6xf32>
    %80 = arith.mulf %78, %79 : vector<104x6xf32>
    %c4 = arith.constant 4 : index
    %c0_31 = arith.constant 0 : index
    %c0_32 = arith.constant 0 : index
    %81 = vector.load %arg3[%c4, %c0_31, %c0_32] : memref<9x6x16xf32, #tpu.memory_space<vmem>>, vector<1x6x16xf32>
    %82 = vector.shape_cast %81 : vector<1x6x16xf32> to vector<6x16xf32>
    %cst_33 = arith.constant dense<0.000000e+00> : vector<104x16xf32>
    %83 = tpu.matmul %80, %82, %cst_33 {dimension_numbers = #tpu.dot_dimension_numbers<[1], [0], [0], [1], [0, 0, 1, 1], [], []>} : vector<104x6xf32>, vector<6x16xf32>, vector<104x16xf32> -> vector<104x16xf32>
    %84 = arith.addf %68, %83 : vector<104x16xf32>
    %c12_i32 = arith.constant 12 : i32
    %85 = arith.addi %1, %c12_i32 : i32
    %86 = arith.index_cast %85 : i32 to index
    %c0_34 = arith.constant 0 : index
    %87 = vector.load %arg1[%86, %c0_34] : memref<230x6xf32, #tpu.memory_space<vmem>>, vector<104x6xf32>
    %c12_i32_35 = arith.constant 12 : i32
    %88 = arith.addi %1, %c12_i32_35 : i32
    %89 = arith.index_cast %88 : i32 to index
    %c0_36 = arith.constant 0 : index
    %90 = vector.load %arg2[%89, %c0_36] : memref<230x1xf32, #tpu.memory_space<vmem>>, vector<104x1xf32>
    %91 = vector.broadcast %3 : vector<1x6xf32> to vector<104x6xf32>
    %92 = arith.addf %87, %91 : vector<104x6xf32>
    %93 = vector.broadcast %2 : vector<1x6xf32> to vector<104x6xf32>
    %94 = arith.mulf %92, %93 : vector<104x6xf32>
    %95 = vector.broadcast %90 : vector<104x1xf32> to vector<104x6xf32>
    %96 = arith.mulf %94, %95 : vector<104x6xf32>
    %c5 = arith.constant 5 : index
    %c0_37 = arith.constant 0 : index
    %c0_38 = arith.constant 0 : index
    %97 = vector.load %arg3[%c5, %c0_37, %c0_38] : memref<9x6x16xf32, #tpu.memory_space<vmem>>, vector<1x6x16xf32>
    %98 = vector.shape_cast %97 : vector<1x6x16xf32> to vector<6x16xf32>
    %cst_39 = arith.constant dense<0.000000e+00> : vector<104x16xf32>
    %99 = tpu.matmul %96, %98, %cst_39 {dimension_numbers = #tpu.dot_dimension_numbers<[1], [0], [0], [1], [0, 0, 1, 1], [], []>} : vector<104x6xf32>, vector<6x16xf32>, vector<104x16xf32> -> vector<104x16xf32>
    %100 = arith.addf %84, %99 : vector<104x16xf32>
    %c20_i32 = arith.constant 20 : i32
    %101 = arith.addi %1, %c20_i32 : i32
    %102 = arith.index_cast %101 : i32 to index
    %c0_40 = arith.constant 0 : index
    %103 = vector.load %arg1[%102, %c0_40] : memref<230x6xf32, #tpu.memory_space<vmem>>, vector<104x6xf32>
    %c20_i32_41 = arith.constant 20 : i32
    %104 = arith.addi %1, %c20_i32_41 : i32
    %105 = arith.index_cast %104 : i32 to index
    %c0_42 = arith.constant 0 : index
    %106 = vector.load %arg2[%105, %c0_42] : memref<230x1xf32, #tpu.memory_space<vmem>>, vector<104x1xf32>
    %107 = vector.broadcast %3 : vector<1x6xf32> to vector<104x6xf32>
    %108 = arith.addf %103, %107 : vector<104x6xf32>
    %109 = vector.broadcast %2 : vector<1x6xf32> to vector<104x6xf32>
    %110 = arith.mulf %108, %109 : vector<104x6xf32>
    %111 = vector.broadcast %106 : vector<104x1xf32> to vector<104x6xf32>
    %112 = arith.mulf %110, %111 : vector<104x6xf32>
    %c6 = arith.constant 6 : index
    %c0_43 = arith.constant 0 : index
    %c0_44 = arith.constant 0 : index
    %113 = vector.load %arg3[%c6, %c0_43, %c0_44] : memref<9x6x16xf32, #tpu.memory_space<vmem>>, vector<1x6x16xf32>
    %114 = vector.shape_cast %113 : vector<1x6x16xf32> to vector<6x16xf32>
    %cst_45 = arith.constant dense<0.000000e+00> : vector<104x16xf32>
    %115 = tpu.matmul %112, %114, %cst_45 {dimension_numbers = #tpu.dot_dimension_numbers<[1], [0], [0], [1], [0, 0, 1, 1], [], []>} : vector<104x6xf32>, vector<6x16xf32>, vector<104x16xf32> -> vector<104x16xf32>
    %116 = arith.addf %100, %115 : vector<104x16xf32>
    %c21_i32 = arith.constant 21 : i32
    %117 = arith.addi %1, %c21_i32 : i32
    %118 = arith.index_cast %117 : i32 to index
    %c0_46 = arith.constant 0 : index
    %119 = vector.load %arg1[%118, %c0_46] : memref<230x6xf32, #tpu.memory_space<vmem>>, vector<104x6xf32>
    %c21_i32_47 = arith.constant 21 : i32
    %120 = arith.addi %1, %c21_i32_47 : i32
    %121 = arith.index_cast %120 : i32 to index
    %c0_48 = arith.constant 0 : index
    %122 = vector.load %arg2[%121, %c0_48] : memref<230x1xf32, #tpu.memory_space<vmem>>, vector<104x1xf32>
    %123 = vector.broadcast %3 : vector<1x6xf32> to vector<104x6xf32>
    %124 = arith.addf %119, %123 : vector<104x6xf32>
    %125 = vector.broadcast %2 : vector<1x6xf32> to vector<104x6xf32>
    %126 = arith.mulf %124, %125 : vector<104x6xf32>
    %127 = vector.broadcast %122 : vector<104x1xf32> to vector<104x6xf32>
    %128 = arith.mulf %126, %127 : vector<104x6xf32>
    %c7 = arith.constant 7 : index
    %c0_49 = arith.constant 0 : index
    %c0_50 = arith.constant 0 : index
    %129 = vector.load %arg3[%c7, %c0_49, %c0_50] : memref<9x6x16xf32, #tpu.memory_space<vmem>>, vector<1x6x16xf32>
    %130 = vector.shape_cast %129 : vector<1x6x16xf32> to vector<6x16xf32>
    %cst_51 = arith.constant dense<0.000000e+00> : vector<104x16xf32>
    %131 = tpu.matmul %128, %130, %cst_51 {dimension_numbers = #tpu.dot_dimension_numbers<[1], [0], [0], [1], [0, 0, 1, 1], [], []>} : vector<104x6xf32>, vector<6x16xf32>, vector<104x16xf32> -> vector<104x16xf32>
    %132 = arith.addf %116, %131 : vector<104x16xf32>
    %c22_i32 = arith.constant 22 : i32
    %133 = arith.addi %1, %c22_i32 : i32
    %134 = arith.index_cast %133 : i32 to index
    %c0_52 = arith.constant 0 : index
    %135 = vector.load %arg1[%134, %c0_52] : memref<230x6xf32, #tpu.memory_space<vmem>>, vector<104x6xf32>
    %c22_i32_53 = arith.constant 22 : i32
    %136 = arith.addi %1, %c22_i32_53 : i32
    %137 = arith.index_cast %136 : i32 to index
    %c0_54 = arith.constant 0 : index
    %138 = vector.load %arg2[%137, %c0_54] : memref<230x1xf32, #tpu.memory_space<vmem>>, vector<104x1xf32>
    %139 = vector.broadcast %3 : vector<1x6xf32> to vector<104x6xf32>
    %140 = arith.addf %135, %139 : vector<104x6xf32>
    %141 = vector.broadcast %2 : vector<1x6xf32> to vector<104x6xf32>
    %142 = arith.mulf %140, %141 : vector<104x6xf32>
    %143 = vector.broadcast %138 : vector<104x1xf32> to vector<104x6xf32>
    %144 = arith.mulf %142, %143 : vector<104x6xf32>
    %c8 = arith.constant 8 : index
    %c0_55 = arith.constant 0 : index
    %c0_56 = arith.constant 0 : index
    %145 = vector.load %arg3[%c8, %c0_55, %c0_56] : memref<9x6x16xf32, #tpu.memory_space<vmem>>, vector<1x6x16xf32>
    %146 = vector.shape_cast %145 : vector<1x6x16xf32> to vector<6x16xf32>
    %cst_57 = arith.constant dense<0.000000e+00> : vector<104x16xf32>
    %147 = tpu.matmul %144, %146, %cst_57 {dimension_numbers = #tpu.dot_dimension_numbers<[1], [0], [0], [1], [0, 0, 1, 1], [], []>} : vector<104x6xf32>, vector<6x16xf32>, vector<104x16xf32> -> vector<104x16xf32>
    %148 = arith.addf %132, %147 : vector<104x16xf32>
    %c0_58 = arith.constant 0 : index
    %c0_59 = arith.constant 0 : index
    %149 = vector.load %arg4[%c0_58, %c0_59] : memref<1x16xf32, #tpu.memory_space<vmem>>, vector<1x16xf32>
    %150 = vector.broadcast %149 : vector<1x16xf32> to vector<104x16xf32>
    %151 = arith.addf %148, %150 : vector<104x16xf32>
    %c11_i32_60 = arith.constant 11 : i32
    %152 = arith.addi %1, %c11_i32_60 : i32
    %153 = arith.index_cast %152 : i32 to index
    %c0_61 = arith.constant 0 : index
    %154 = vector.load %arg2[%153, %c0_61] : memref<230x1xf32, #tpu.memory_space<vmem>>, vector<104x1xf32>
    %c0_62 = arith.constant 0 : index
    %c0_63 = arith.constant 0 : index
    %155 = vector.load %arg7[%c0_62, %c0_63] : memref<104x16xf32, #tpu.memory_space<vmem>>, vector<104x16xf32>
    tpu.vector_store %arg7[%c0_62, %c0_63], %151 {strides = array<i32>} : memref<104x16xf32, #tpu.memory_space<vmem>>, vector<104x16xf32>,
    %156 = vector.broadcast %154 : vector<104x1xf32> to vector<104x16xf32>
    %157 = arith.mulf %151, %156 : vector<104x16xf32>
    %cst_64 = arith.constant dense<0.000000e+00> : vector<16xf32>
    %158 = vector.multi_reduction <add>, %157, %cst_64 [0] : vector<104x16xf32> to vector<16xf32>
    %159 = vector.shape_cast %158 : vector<16xf32> to vector<1x16xf32>
    %160 = vector.shape_cast %159 : vector<1x16xf32> to vector<1x16xf32>
    %161 = vector.broadcast %160 : vector<1x16xf32> to vector<8x16xf32>
    %c0_65 = arith.constant 0 : index
    %c0_66 = arith.constant 0 : index
    %162 = vector.load %arg8[%c0_65, %c0_66] : memref<8x16xf32, #tpu.memory_space<vmem>>, vector<8x16xf32>
    tpu.vector_store %arg8[%c0_65, %c0_66], %161 {strides = array<i32>} : memref<8x16xf32, #tpu.memory_space<vmem>>, vector<8x16xf32>,
    %163 = arith.mulf %157, %151 : vector<104x16xf32>
    %cst_67 = arith.constant dense<0.000000e+00> : vector<16xf32>
    %164 = vector.multi_reduction <add>, %163, %cst_67 [0] : vector<104x16xf32> to vector<16xf32>
    %165 = vector.shape_cast %164 : vector<16xf32> to vector<1x16xf32>
    %166 = vector.shape_cast %165 : vector<1x16xf32> to vector<1x16xf32>
    %167 = vector.broadcast %166 : vector<1x16xf32> to vector<8x16xf32>
    %c0_68 = arith.constant 0 : index
    %c0_69 = arith.constant 0 : index
    %168 = vector.load %arg9[%c0_68, %c0_69] : memref<8x16xf32, #tpu.memory_space<vmem>>, vector<8x16xf32>
    tpu.vector_store %arg9[%c0_68, %c0_69], %167 {strides = array<i32>} : memref<8x16xf32, #tpu.memory_space<vmem>>, vector<8x16xf32>,
    return
  }
  func.func @transform_0(%arg0: i32) -> (i32, i32) {
    %c0_i32 = arith.constant 0 : i32
    %c0_i32_0 = arith.constant 0 : i32
    %c0_i32_1 = arith.constant 0 : i32
    return %c0_i32, %c0_i32_0 : i32, i32
  }
  func.func @transform_1(%arg0: i32) -> (i32, i32) {
    %c0_i32 = arith.constant 0 : i32
    %c0_i32_0 = arith.constant 0 : i32
    %c0_i32_1 = arith.constant 0 : i32
    return %c0_i32, %c0_i32_0 : i32, i32
  }
  func.func @transform_2(%arg0: i32) -> (i32, i32, i32) {
    %c0_i32 = arith.constant 0 : i32
    %c0_i32_0 = arith.constant 0 : i32
    %c0_i32_1 = arith.constant 0 : i32
    %c0_i32_2 = arith.constant 0 : i32
    return %c0_i32, %c0_i32_0, %c0_i32_1 : i32, i32, i32
  }
  func.func @transform_3(%arg0: i32) -> (i32, i32) {
    %c0_i32 = arith.constant 0 : i32
    %c0_i32_0 = arith.constant 0 : i32
    %c0_i32_1 = arith.constant 0 : i32
    return %c0_i32, %c0_i32_0 : i32, i32
  }
  func.func @transform_4(%arg0: i32) -> (i32, i32) {
    %c0_i32 = arith.constant 0 : i32
    %c0_i32_0 = arith.constant 0 : i32
    %c0_i32_1 = arith.constant 0 : i32
    return %c0_i32, %c0_i32_0 : i32, i32
  }
  func.func @transform_5(%arg0: i32) -> (i32, i32) {
    %c0_i32 = arith.constant 0 : i32
    %c0_i32_0 = arith.constant 0 : i32
    %c0_i32_1 = arith.constant 0 : i32
    return %c0_i32, %c0_i32_0 : i32, i32
  }
  func.func @transform_6(%arg0: i32) -> (i32, i32) {
    %c0_i32 = arith.constant 0 : i32
    %c0_i32_0 = arith.constant 0 : i32
    return %arg0, %c0_i32 : i32, i32
  }
  func.func @transform_7(%arg0: i32) -> (i32, i32) {
    %c0_i32 = arith.constant 0 : i32
    %c0_i32_0 = arith.constant 0 : i32
    return %arg0, %c0_i32 : i32, i32
  }
  func.func @transform_8(%arg0: i32) -> (i32, i32) {
    %c0_i32 = arith.constant 0 : i32
    %c0_i32_0 = arith.constant 0 : i32
    return %arg0, %c0_i32 : i32, i32
  }
}

module attributes {stable_mosaic.version = 11 : i64} {
  func.func @_conv_kernel(%arg0: i32, %arg1: memref<230x16xf32, #tpu.memory_space<vmem>>, %arg2: memref<230x1xf32, #tpu.memory_space<vmem>>, %arg3: memref<9x16x12xf32, #tpu.memory_space<vmem>>, %arg4: memref<1x12xf32, #tpu.memory_space<vmem>>, %arg5: memref<1x16xf32, #tpu.memory_space<vmem>>, %arg6: memref<1x16xf32, #tpu.memory_space<vmem>>, %arg7: memref<104x6xf32, #tpu.memory_space<vmem>>, %arg8: memref<1x6xf32, #tpu.memory_space<vmem>>, %arg9: memref<1x6xf32, #tpu.memory_space<vmem>>, %arg10: memref<104x6xf32, #tpu.memory_space<vmem>>, %arg11: memref<104x1xf32, #tpu.memory_space<vmem>>) attributes {dimension_semantics = [#tpu.dimension_semantics<parallel>], iteration_bounds = array<i64: 2>, scalar_prefetch = 0 : i64, scratch_operands = 0 : i64, tpu.core_type = #tpu.core_type<tc>, window_params = [{pipeline_mode = #tpu.pipeline_mode<synchronous>, transform_indices = @transform_0, window_bounds = array<i64: 230, 16>}, {pipeline_mode = #tpu.pipeline_mode<synchronous>, transform_indices = @transform_1, window_bounds = array<i64: 230, 1>}, {pipeline_mode = #tpu.pipeline_mode<synchronous>, transform_indices = @transform_2, window_bounds = array<i64: 9, 16, 12>}, {pipeline_mode = #tpu.pipeline_mode<synchronous>, transform_indices = @transform_3, window_bounds = array<i64: 1, 12>}, {pipeline_mode = #tpu.pipeline_mode<synchronous>, transform_indices = @transform_4, window_bounds = array<i64: 1, 16>}, {pipeline_mode = #tpu.pipeline_mode<synchronous>, transform_indices = @transform_5, window_bounds = array<i64: 1, 16>}, {transform_indices = @transform_6, window_bounds = array<i64: 104, 6>}, {pipeline_mode = #tpu.pipeline_mode<synchronous>, transform_indices = @transform_7, window_bounds = array<i64: 1, 6>}, {pipeline_mode = #tpu.pipeline_mode<synchronous>, transform_indices = @transform_8, window_bounds = array<i64: 1, 6>}, {transform_indices = @transform_9, window_bounds = array<i64: 104, 6>}, {transform_indices = @transform_10, window_bounds = array<i64: 104, 1>}]} {
    %c104_i32 = arith.constant 104 : i32
    %0 = arith.muli %arg0, %c104_i32 : i32
    %1 = tpu.assume_multiple %0, 8 : i32
    %c0 = arith.constant 0 : index
    %c0_0 = arith.constant 0 : index
    %2 = vector.load %arg5[%c0, %c0_0] : memref<1x16xf32, #tpu.memory_space<vmem>>, vector<1x16xf32>
    %c0_1 = arith.constant 0 : index
    %c0_2 = arith.constant 0 : index
    %3 = vector.load %arg6[%c0_1, %c0_2] : memref<1x16xf32, #tpu.memory_space<vmem>>, vector<1x16xf32>
    %cst = arith.constant 0.000000e+00 : f32
    %4 = vector.broadcast %cst : f32 to vector<104x12xf32>
    %c0_i32 = arith.constant 0 : i32
    %5 = arith.addi %1, %c0_i32 : i32
    %6 = arith.index_cast %5 : i32 to index
    %c0_3 = arith.constant 0 : index
    %7 = vector.load %arg1[%6, %c0_3] : memref<230x16xf32, #tpu.memory_space<vmem>>, vector<104x16xf32>
    %c0_i32_4 = arith.constant 0 : i32
    %8 = arith.addi %1, %c0_i32_4 : i32
    %9 = arith.index_cast %8 : i32 to index
    %c0_5 = arith.constant 0 : index
    %10 = vector.load %arg2[%9, %c0_5] : memref<230x1xf32, #tpu.memory_space<vmem>>, vector<104x1xf32>
    %11 = vector.broadcast %2 : vector<1x16xf32> to vector<104x16xf32>
    %12 = arith.mulf %7, %11 : vector<104x16xf32>
    %13 = vector.broadcast %3 : vector<1x16xf32> to vector<104x16xf32>
    %14 = arith.addf %12, %13 : vector<104x16xf32>
    %cst_6 = arith.constant 0.000000e+00 : f32
    %15 = vector.broadcast %cst_6 : f32 to vector<104x16xf32>
    %16 = arith.maximumf %14, %15 : vector<104x16xf32>
    %17 = vector.broadcast %10 : vector<104x1xf32> to vector<104x16xf32>
    %18 = arith.mulf %16, %17 : vector<104x16xf32>
    %c0_7 = arith.constant 0 : index
    %c0_8 = arith.constant 0 : index
    %c0_9 = arith.constant 0 : index
    %19 = vector.load %arg3[%c0_7, %c0_8, %c0_9] : memref<9x16x12xf32, #tpu.memory_space<vmem>>, vector<1x16x12xf32>
    %20 = vector.shape_cast %19 : vector<1x16x12xf32> to vector<16x12xf32>
    %cst_10 = arith.constant dense<0.000000e+00> : vector<104x12xf32>
    %21 = tpu.matmul %18, %20, %cst_10 {dimension_numbers = #tpu.dot_dimension_numbers<[1], [0], [0], [1], [0, 0, 1, 1], [], []>} : vector<104x16xf32>, vector<16x12xf32>, vector<104x12xf32> -> vector<104x12xf32>
    %22 = arith.addf %4, %21 : vector<104x12xf32>
    %c1_i32 = arith.constant 1 : i32
    %23 = arith.addi %1, %c1_i32 : i32
    %24 = arith.index_cast %23 : i32 to index
    %c0_11 = arith.constant 0 : index
    %25 = vector.load %arg1[%24, %c0_11] : memref<230x16xf32, #tpu.memory_space<vmem>>, vector<104x16xf32>
    %c1_i32_12 = arith.constant 1 : i32
    %26 = arith.addi %1, %c1_i32_12 : i32
    %27 = arith.index_cast %26 : i32 to index
    %c0_13 = arith.constant 0 : index
    %28 = vector.load %arg2[%27, %c0_13] : memref<230x1xf32, #tpu.memory_space<vmem>>, vector<104x1xf32>
    %29 = vector.broadcast %2 : vector<1x16xf32> to vector<104x16xf32>
    %30 = arith.mulf %25, %29 : vector<104x16xf32>
    %31 = vector.broadcast %3 : vector<1x16xf32> to vector<104x16xf32>
    %32 = arith.addf %30, %31 : vector<104x16xf32>
    %cst_14 = arith.constant 0.000000e+00 : f32
    %33 = vector.broadcast %cst_14 : f32 to vector<104x16xf32>
    %34 = arith.maximumf %32, %33 : vector<104x16xf32>
    %35 = vector.broadcast %28 : vector<104x1xf32> to vector<104x16xf32>
    %36 = arith.mulf %34, %35 : vector<104x16xf32>
    %c1 = arith.constant 1 : index
    %c0_15 = arith.constant 0 : index
    %c0_16 = arith.constant 0 : index
    %37 = vector.load %arg3[%c1, %c0_15, %c0_16] : memref<9x16x12xf32, #tpu.memory_space<vmem>>, vector<1x16x12xf32>
    %38 = vector.shape_cast %37 : vector<1x16x12xf32> to vector<16x12xf32>
    %cst_17 = arith.constant dense<0.000000e+00> : vector<104x12xf32>
    %39 = tpu.matmul %36, %38, %cst_17 {dimension_numbers = #tpu.dot_dimension_numbers<[1], [0], [0], [1], [0, 0, 1, 1], [], []>} : vector<104x16xf32>, vector<16x12xf32>, vector<104x12xf32> -> vector<104x12xf32>
    %40 = arith.addf %22, %39 : vector<104x12xf32>
    %c2_i32 = arith.constant 2 : i32
    %41 = arith.addi %1, %c2_i32 : i32
    %42 = arith.index_cast %41 : i32 to index
    %c0_18 = arith.constant 0 : index
    %43 = vector.load %arg1[%42, %c0_18] : memref<230x16xf32, #tpu.memory_space<vmem>>, vector<104x16xf32>
    %c2_i32_19 = arith.constant 2 : i32
    %44 = arith.addi %1, %c2_i32_19 : i32
    %45 = arith.index_cast %44 : i32 to index
    %c0_20 = arith.constant 0 : index
    %46 = vector.load %arg2[%45, %c0_20] : memref<230x1xf32, #tpu.memory_space<vmem>>, vector<104x1xf32>
    %47 = vector.broadcast %2 : vector<1x16xf32> to vector<104x16xf32>
    %48 = arith.mulf %43, %47 : vector<104x16xf32>
    %49 = vector.broadcast %3 : vector<1x16xf32> to vector<104x16xf32>
    %50 = arith.addf %48, %49 : vector<104x16xf32>
    %cst_21 = arith.constant 0.000000e+00 : f32
    %51 = vector.broadcast %cst_21 : f32 to vector<104x16xf32>
    %52 = arith.maximumf %50, %51 : vector<104x16xf32>
    %53 = vector.broadcast %46 : vector<104x1xf32> to vector<104x16xf32>
    %54 = arith.mulf %52, %53 : vector<104x16xf32>
    %c2 = arith.constant 2 : index
    %c0_22 = arith.constant 0 : index
    %c0_23 = arith.constant 0 : index
    %55 = vector.load %arg3[%c2, %c0_22, %c0_23] : memref<9x16x12xf32, #tpu.memory_space<vmem>>, vector<1x16x12xf32>
    %56 = vector.shape_cast %55 : vector<1x16x12xf32> to vector<16x12xf32>
    %cst_24 = arith.constant dense<0.000000e+00> : vector<104x12xf32>
    %57 = tpu.matmul %54, %56, %cst_24 {dimension_numbers = #tpu.dot_dimension_numbers<[1], [0], [0], [1], [0, 0, 1, 1], [], []>} : vector<104x16xf32>, vector<16x12xf32>, vector<104x12xf32> -> vector<104x12xf32>
    %58 = arith.addf %40, %57 : vector<104x12xf32>
    %c10_i32 = arith.constant 10 : i32
    %59 = arith.addi %1, %c10_i32 : i32
    %60 = arith.index_cast %59 : i32 to index
    %c0_25 = arith.constant 0 : index
    %61 = vector.load %arg1[%60, %c0_25] : memref<230x16xf32, #tpu.memory_space<vmem>>, vector<104x16xf32>
    %c10_i32_26 = arith.constant 10 : i32
    %62 = arith.addi %1, %c10_i32_26 : i32
    %63 = arith.index_cast %62 : i32 to index
    %c0_27 = arith.constant 0 : index
    %64 = vector.load %arg2[%63, %c0_27] : memref<230x1xf32, #tpu.memory_space<vmem>>, vector<104x1xf32>
    %65 = vector.broadcast %2 : vector<1x16xf32> to vector<104x16xf32>
    %66 = arith.mulf %61, %65 : vector<104x16xf32>
    %67 = vector.broadcast %3 : vector<1x16xf32> to vector<104x16xf32>
    %68 = arith.addf %66, %67 : vector<104x16xf32>
    %cst_28 = arith.constant 0.000000e+00 : f32
    %69 = vector.broadcast %cst_28 : f32 to vector<104x16xf32>
    %70 = arith.maximumf %68, %69 : vector<104x16xf32>
    %71 = vector.broadcast %64 : vector<104x1xf32> to vector<104x16xf32>
    %72 = arith.mulf %70, %71 : vector<104x16xf32>
    %c3 = arith.constant 3 : index
    %c0_29 = arith.constant 0 : index
    %c0_30 = arith.constant 0 : index
    %73 = vector.load %arg3[%c3, %c0_29, %c0_30] : memref<9x16x12xf32, #tpu.memory_space<vmem>>, vector<1x16x12xf32>
    %74 = vector.shape_cast %73 : vector<1x16x12xf32> to vector<16x12xf32>
    %cst_31 = arith.constant dense<0.000000e+00> : vector<104x12xf32>
    %75 = tpu.matmul %72, %74, %cst_31 {dimension_numbers = #tpu.dot_dimension_numbers<[1], [0], [0], [1], [0, 0, 1, 1], [], []>} : vector<104x16xf32>, vector<16x12xf32>, vector<104x12xf32> -> vector<104x12xf32>
    %76 = arith.addf %58, %75 : vector<104x12xf32>
    %c11_i32 = arith.constant 11 : i32
    %77 = arith.addi %1, %c11_i32 : i32
    %78 = arith.index_cast %77 : i32 to index
    %c0_32 = arith.constant 0 : index
    %79 = vector.load %arg1[%78, %c0_32] : memref<230x16xf32, #tpu.memory_space<vmem>>, vector<104x16xf32>
    %c11_i32_33 = arith.constant 11 : i32
    %80 = arith.addi %1, %c11_i32_33 : i32
    %81 = arith.index_cast %80 : i32 to index
    %c0_34 = arith.constant 0 : index
    %82 = vector.load %arg2[%81, %c0_34] : memref<230x1xf32, #tpu.memory_space<vmem>>, vector<104x1xf32>
    %83 = vector.broadcast %2 : vector<1x16xf32> to vector<104x16xf32>
    %84 = arith.mulf %79, %83 : vector<104x16xf32>
    %85 = vector.broadcast %3 : vector<1x16xf32> to vector<104x16xf32>
    %86 = arith.addf %84, %85 : vector<104x16xf32>
    %cst_35 = arith.constant 0.000000e+00 : f32
    %87 = vector.broadcast %cst_35 : f32 to vector<104x16xf32>
    %88 = arith.maximumf %86, %87 : vector<104x16xf32>
    %89 = vector.broadcast %82 : vector<104x1xf32> to vector<104x16xf32>
    %90 = arith.mulf %88, %89 : vector<104x16xf32>
    %c4 = arith.constant 4 : index
    %c0_36 = arith.constant 0 : index
    %c0_37 = arith.constant 0 : index
    %91 = vector.load %arg3[%c4, %c0_36, %c0_37] : memref<9x16x12xf32, #tpu.memory_space<vmem>>, vector<1x16x12xf32>
    %92 = vector.shape_cast %91 : vector<1x16x12xf32> to vector<16x12xf32>
    %cst_38 = arith.constant dense<0.000000e+00> : vector<104x12xf32>
    %93 = tpu.matmul %90, %92, %cst_38 {dimension_numbers = #tpu.dot_dimension_numbers<[1], [0], [0], [1], [0, 0, 1, 1], [], []>} : vector<104x16xf32>, vector<16x12xf32>, vector<104x12xf32> -> vector<104x12xf32>
    %94 = arith.addf %76, %93 : vector<104x12xf32>
    %c12_i32 = arith.constant 12 : i32
    %95 = arith.addi %1, %c12_i32 : i32
    %96 = arith.index_cast %95 : i32 to index
    %c0_39 = arith.constant 0 : index
    %97 = vector.load %arg1[%96, %c0_39] : memref<230x16xf32, #tpu.memory_space<vmem>>, vector<104x16xf32>
    %c12_i32_40 = arith.constant 12 : i32
    %98 = arith.addi %1, %c12_i32_40 : i32
    %99 = arith.index_cast %98 : i32 to index
    %c0_41 = arith.constant 0 : index
    %100 = vector.load %arg2[%99, %c0_41] : memref<230x1xf32, #tpu.memory_space<vmem>>, vector<104x1xf32>
    %101 = vector.broadcast %2 : vector<1x16xf32> to vector<104x16xf32>
    %102 = arith.mulf %97, %101 : vector<104x16xf32>
    %103 = vector.broadcast %3 : vector<1x16xf32> to vector<104x16xf32>
    %104 = arith.addf %102, %103 : vector<104x16xf32>
    %cst_42 = arith.constant 0.000000e+00 : f32
    %105 = vector.broadcast %cst_42 : f32 to vector<104x16xf32>
    %106 = arith.maximumf %104, %105 : vector<104x16xf32>
    %107 = vector.broadcast %100 : vector<104x1xf32> to vector<104x16xf32>
    %108 = arith.mulf %106, %107 : vector<104x16xf32>
    %c5 = arith.constant 5 : index
    %c0_43 = arith.constant 0 : index
    %c0_44 = arith.constant 0 : index
    %109 = vector.load %arg3[%c5, %c0_43, %c0_44] : memref<9x16x12xf32, #tpu.memory_space<vmem>>, vector<1x16x12xf32>
    %110 = vector.shape_cast %109 : vector<1x16x12xf32> to vector<16x12xf32>
    %cst_45 = arith.constant dense<0.000000e+00> : vector<104x12xf32>
    %111 = tpu.matmul %108, %110, %cst_45 {dimension_numbers = #tpu.dot_dimension_numbers<[1], [0], [0], [1], [0, 0, 1, 1], [], []>} : vector<104x16xf32>, vector<16x12xf32>, vector<104x12xf32> -> vector<104x12xf32>
    %112 = arith.addf %94, %111 : vector<104x12xf32>
    %c20_i32 = arith.constant 20 : i32
    %113 = arith.addi %1, %c20_i32 : i32
    %114 = arith.index_cast %113 : i32 to index
    %c0_46 = arith.constant 0 : index
    %115 = vector.load %arg1[%114, %c0_46] : memref<230x16xf32, #tpu.memory_space<vmem>>, vector<104x16xf32>
    %c20_i32_47 = arith.constant 20 : i32
    %116 = arith.addi %1, %c20_i32_47 : i32
    %117 = arith.index_cast %116 : i32 to index
    %c0_48 = arith.constant 0 : index
    %118 = vector.load %arg2[%117, %c0_48] : memref<230x1xf32, #tpu.memory_space<vmem>>, vector<104x1xf32>
    %119 = vector.broadcast %2 : vector<1x16xf32> to vector<104x16xf32>
    %120 = arith.mulf %115, %119 : vector<104x16xf32>
    %121 = vector.broadcast %3 : vector<1x16xf32> to vector<104x16xf32>
    %122 = arith.addf %120, %121 : vector<104x16xf32>
    %cst_49 = arith.constant 0.000000e+00 : f32
    %123 = vector.broadcast %cst_49 : f32 to vector<104x16xf32>
    %124 = arith.maximumf %122, %123 : vector<104x16xf32>
    %125 = vector.broadcast %118 : vector<104x1xf32> to vector<104x16xf32>
    %126 = arith.mulf %124, %125 : vector<104x16xf32>
    %c6 = arith.constant 6 : index
    %c0_50 = arith.constant 0 : index
    %c0_51 = arith.constant 0 : index
    %127 = vector.load %arg3[%c6, %c0_50, %c0_51] : memref<9x16x12xf32, #tpu.memory_space<vmem>>, vector<1x16x12xf32>
    %128 = vector.shape_cast %127 : vector<1x16x12xf32> to vector<16x12xf32>
    %cst_52 = arith.constant dense<0.000000e+00> : vector<104x12xf32>
    %129 = tpu.matmul %126, %128, %cst_52 {dimension_numbers = #tpu.dot_dimension_numbers<[1], [0], [0], [1], [0, 0, 1, 1], [], []>} : vector<104x16xf32>, vector<16x12xf32>, vector<104x12xf32> -> vector<104x12xf32>
    %130 = arith.addf %112, %129 : vector<104x12xf32>
    %c21_i32 = arith.constant 21 : i32
    %131 = arith.addi %1, %c21_i32 : i32
    %132 = arith.index_cast %131 : i32 to index
    %c0_53 = arith.constant 0 : index
    %133 = vector.load %arg1[%132, %c0_53] : memref<230x16xf32, #tpu.memory_space<vmem>>, vector<104x16xf32>
    %c21_i32_54 = arith.constant 21 : i32
    %134 = arith.addi %1, %c21_i32_54 : i32
    %135 = arith.index_cast %134 : i32 to index
    %c0_55 = arith.constant 0 : index
    %136 = vector.load %arg2[%135, %c0_55] : memref<230x1xf32, #tpu.memory_space<vmem>>, vector<104x1xf32>
    %137 = vector.broadcast %2 : vector<1x16xf32> to vector<104x16xf32>
    %138 = arith.mulf %133, %137 : vector<104x16xf32>
    %139 = vector.broadcast %3 : vector<1x16xf32> to vector<104x16xf32>
    %140 = arith.addf %138, %139 : vector<104x16xf32>
    %cst_56 = arith.constant 0.000000e+00 : f32
    %141 = vector.broadcast %cst_56 : f32 to vector<104x16xf32>
    %142 = arith.maximumf %140, %141 : vector<104x16xf32>
    %143 = vector.broadcast %136 : vector<104x1xf32> to vector<104x16xf32>
    %144 = arith.mulf %142, %143 : vector<104x16xf32>
    %c7 = arith.constant 7 : index
    %c0_57 = arith.constant 0 : index
    %c0_58 = arith.constant 0 : index
    %145 = vector.load %arg3[%c7, %c0_57, %c0_58] : memref<9x16x12xf32, #tpu.memory_space<vmem>>, vector<1x16x12xf32>
    %146 = vector.shape_cast %145 : vector<1x16x12xf32> to vector<16x12xf32>
    %cst_59 = arith.constant dense<0.000000e+00> : vector<104x12xf32>
    %147 = tpu.matmul %144, %146, %cst_59 {dimension_numbers = #tpu.dot_dimension_numbers<[1], [0], [0], [1], [0, 0, 1, 1], [], []>} : vector<104x16xf32>, vector<16x12xf32>, vector<104x12xf32> -> vector<104x12xf32>
    %148 = arith.addf %130, %147 : vector<104x12xf32>
    %c22_i32 = arith.constant 22 : i32
    %149 = arith.addi %1, %c22_i32 : i32
    %150 = arith.index_cast %149 : i32 to index
    %c0_60 = arith.constant 0 : index
    %151 = vector.load %arg1[%150, %c0_60] : memref<230x16xf32, #tpu.memory_space<vmem>>, vector<104x16xf32>
    %c22_i32_61 = arith.constant 22 : i32
    %152 = arith.addi %1, %c22_i32_61 : i32
    %153 = arith.index_cast %152 : i32 to index
    %c0_62 = arith.constant 0 : index
    %154 = vector.load %arg2[%153, %c0_62] : memref<230x1xf32, #tpu.memory_space<vmem>>, vector<104x1xf32>
    %155 = vector.broadcast %2 : vector<1x16xf32> to vector<104x16xf32>
    %156 = arith.mulf %151, %155 : vector<104x16xf32>
    %157 = vector.broadcast %3 : vector<1x16xf32> to vector<104x16xf32>
    %158 = arith.addf %156, %157 : vector<104x16xf32>
    %cst_63 = arith.constant 0.000000e+00 : f32
    %159 = vector.broadcast %cst_63 : f32 to vector<104x16xf32>
    %160 = arith.maximumf %158, %159 : vector<104x16xf32>
    %161 = vector.broadcast %154 : vector<104x1xf32> to vector<104x16xf32>
    %162 = arith.mulf %160, %161 : vector<104x16xf32>
    %c8 = arith.constant 8 : index
    %c0_64 = arith.constant 0 : index
    %c0_65 = arith.constant 0 : index
    %163 = vector.load %arg3[%c8, %c0_64, %c0_65] : memref<9x16x12xf32, #tpu.memory_space<vmem>>, vector<1x16x12xf32>
    %164 = vector.shape_cast %163 : vector<1x16x12xf32> to vector<16x12xf32>
    %cst_66 = arith.constant dense<0.000000e+00> : vector<104x12xf32>
    %165 = tpu.matmul %162, %164, %cst_66 {dimension_numbers = #tpu.dot_dimension_numbers<[1], [0], [0], [1], [0, 0, 1, 1], [], []>} : vector<104x16xf32>, vector<16x12xf32>, vector<104x12xf32> -> vector<104x12xf32>
    %166 = arith.addf %148, %165 : vector<104x12xf32>
    %c0_67 = arith.constant 0 : index
    %c0_68 = arith.constant 0 : index
    %167 = vector.load %arg4[%c0_67, %c0_68] : memref<1x12xf32, #tpu.memory_space<vmem>>, vector<1x12xf32>
    %168 = vector.broadcast %167 : vector<1x12xf32> to vector<104x12xf32>
    %169 = arith.addf %166, %168 : vector<104x12xf32>
    %c11_i32_69 = arith.constant 11 : i32
    %170 = arith.addi %1, %c11_i32_69 : i32
    %171 = arith.index_cast %170 : i32 to index
    %c0_70 = arith.constant 0 : index
    %172 = vector.load %arg2[%171, %c0_70] : memref<230x1xf32, #tpu.memory_space<vmem>>, vector<104x1xf32>
    %173 = vector.extract_strided_slice %169 {offsets = [0, 0], sizes = [104, 6], strides = [1, 1]} : vector<104x12xf32> to vector<104x6xf32>
    %174 = vector.extract_strided_slice %169 {offsets = [0, 6], sizes = [104, 6], strides = [1, 1]} : vector<104x12xf32> to vector<104x6xf32>
    %cst_71 = arith.constant 0.000000e+00 : f32
    %175 = vector.broadcast %cst_71 : f32 to vector<104x6xf32>
    %176 = arith.subf %175, %173 : vector<104x6xf32>
    %177 = math.exp %176 : vector<104x6xf32>
    %cst_72 = arith.constant 1.000000e+00 : f32
    %178 = vector.broadcast %cst_72 : f32 to vector<104x6xf32>
    %179 = arith.addf %178, %177 : vector<104x6xf32>
    %cst_73 = arith.constant 1.000000e+00 : f32
    %180 = vector.broadcast %cst_73 : f32 to vector<104x6xf32>
    %181 = arith.divf %180, %179 : vector<104x6xf32>
    %c0_74 = arith.constant 0 : index
    %c0_75 = arith.constant 0 : index
    %182 = vector.load %arg7[%c0_74, %c0_75] : memref<104x6xf32, #tpu.memory_space<vmem>>, vector<104x6xf32>
    %c0_76 = arith.constant 0 : index
    %c0_77 = arith.constant 0 : index
    %183 = vector.load %arg9[%c0_76, %c0_77] : memref<1x6xf32, #tpu.memory_space<vmem>>, vector<1x6xf32>
    %184 = vector.broadcast %183 : vector<1x6xf32> to vector<104x6xf32>
    %185 = arith.addf %182, %184 : vector<104x6xf32>
    %c0_78 = arith.constant 0 : index
    %c0_79 = arith.constant 0 : index
    %186 = vector.load %arg8[%c0_78, %c0_79] : memref<1x6xf32, #tpu.memory_space<vmem>>, vector<1x6xf32>
    %187 = vector.broadcast %186 : vector<1x6xf32> to vector<104x6xf32>
    %188 = arith.mulf %185, %187 : vector<104x6xf32>
    %189 = arith.addf %188, %174 : vector<104x6xf32>
    %190 = arith.mulf %189, %181 : vector<104x6xf32>
    %c0_80 = arith.constant 0 : index
    %c0_81 = arith.constant 0 : index
    %191 = vector.load %arg10[%c0_80, %c0_81] : memref<104x6xf32, #tpu.memory_space<vmem>>, vector<104x6xf32>
    tpu.vector_store %arg10[%c0_80, %c0_81], %190 {strides = array<i32>} : memref<104x6xf32, #tpu.memory_space<vmem>>, vector<104x6xf32>,
    %cst_82 = arith.constant 0.000000e+00 : f32
    %192 = vector.broadcast %cst_82 : f32 to vector<104x6xf32>
    %193 = arith.minimumf %173, %192 : vector<104x6xf32>
    %194 = math.absf %173 : vector<104x6xf32>
    %cst_83 = arith.constant 0.000000e+00 : f32
    %195 = vector.broadcast %cst_83 : f32 to vector<104x6xf32>
    %196 = arith.subf %195, %194 : vector<104x6xf32>
    %197 = math.exp %196 : vector<104x6xf32>
    %cst_84 = arith.constant 1.000000e+00 : f32
    %198 = vector.broadcast %cst_84 : f32 to vector<104x6xf32>
    %199 = arith.addf %198, %197 : vector<104x6xf32>
    %200 = math.log %199 : vector<104x6xf32>
    %201 = arith.subf %193, %200 : vector<104x6xf32>
    %cst_85 = arith.constant dense<0.000000e+00> : vector<104xf32>
    %202 = vector.multi_reduction <add>, %201, %cst_85 [1] : vector<104x6xf32> to vector<104xf32>
    %203 = vector.shape_cast %202 : vector<104xf32> to vector<104x1xf32>
    %204 = arith.mulf %203, %172 : vector<104x1xf32>
    %c0_86 = arith.constant 0 : index
    %c0_87 = arith.constant 0 : index
    %205 = vector.load %arg11[%c0_86, %c0_87] : memref<104x1xf32, #tpu.memory_space<vmem>>, vector<104x1xf32>
    tpu.vector_store %arg11[%c0_86, %c0_87], %204 {strides = array<i32>} : memref<104x1xf32, #tpu.memory_space<vmem>>, vector<104x1xf32>,
    return
  }
  func.func @transform_0(%arg0: i32) -> (i32, i32) {
    %c0_i32 = arith.constant 0 : i32
    %c0_i32_0 = arith.constant 0 : i32
    %c0_i32_1 = arith.constant 0 : i32
    return %c0_i32, %c0_i32_0 : i32, i32
  }
  func.func @transform_1(%arg0: i32) -> (i32, i32) {
    %c0_i32 = arith.constant 0 : i32
    %c0_i32_0 = arith.constant 0 : i32
    %c0_i32_1 = arith.constant 0 : i32
    return %c0_i32, %c0_i32_0 : i32, i32
  }
  func.func @transform_2(%arg0: i32) -> (i32, i32, i32) {
    %c0_i32 = arith.constant 0 : i32
    %c0_i32_0 = arith.constant 0 : i32
    %c0_i32_1 = arith.constant 0 : i32
    %c0_i32_2 = arith.constant 0 : i32
    return %c0_i32, %c0_i32_0, %c0_i32_1 : i32, i32, i32
  }
  func.func @transform_3(%arg0: i32) -> (i32, i32) {
    %c0_i32 = arith.constant 0 : i32
    %c0_i32_0 = arith.constant 0 : i32
    %c0_i32_1 = arith.constant 0 : i32
    return %c0_i32, %c0_i32_0 : i32, i32
  }
  func.func @transform_4(%arg0: i32) -> (i32, i32) {
    %c0_i32 = arith.constant 0 : i32
    %c0_i32_0 = arith.constant 0 : i32
    %c0_i32_1 = arith.constant 0 : i32
    return %c0_i32, %c0_i32_0 : i32, i32
  }
  func.func @transform_5(%arg0: i32) -> (i32, i32) {
    %c0_i32 = arith.constant 0 : i32
    %c0_i32_0 = arith.constant 0 : i32
    %c0_i32_1 = arith.constant 0 : i32
    return %c0_i32, %c0_i32_0 : i32, i32
  }
  func.func @transform_6(%arg0: i32) -> (i32, i32) {
    %c0_i32 = arith.constant 0 : i32
    %c0_i32_0 = arith.constant 0 : i32
    return %arg0, %c0_i32 : i32, i32
  }
  func.func @transform_7(%arg0: i32) -> (i32, i32) {
    %c0_i32 = arith.constant 0 : i32
    %c0_i32_0 = arith.constant 0 : i32
    %c0_i32_1 = arith.constant 0 : i32
    return %c0_i32, %c0_i32_0 : i32, i32
  }
  func.func @transform_8(%arg0: i32) -> (i32, i32) {
    %c0_i32 = arith.constant 0 : i32
    %c0_i32_0 = arith.constant 0 : i32
    %c0_i32_1 = arith.constant 0 : i32
    return %c0_i32, %c0_i32_0 : i32, i32
  }
  func.func @transform_9(%arg0: i32) -> (i32, i32) {
    %c0_i32 = arith.constant 0 : i32
    %c0_i32_0 = arith.constant 0 : i32
    return %arg0, %c0_i32 : i32, i32
  }
  func.func @transform_10(%arg0: i32) -> (i32, i32) {
    %c0_i32 = arith.constant 0 : i32
    %c0_i32_0 = arith.constant 0 : i32
    return %arg0, %c0_i32 : i32, i32
  }
}

</mosaic_0001>

<bundles_post_ra>
// kernel: squeeze.4
= control target key start
LH: loop header
LB: loop body
LE: loop exit
PB: predicated region body
PF: predicated region fallthrough
CT: control target
= control target key end

     0   :  { %vm7_vm0 = vcmask 818176   ;;  %vm16_vm1 = vcmask 228352   ;;  %vm19_vm2 = vcmask 818400   ;;  %s46_s0 = inlined_call_operand.vmem [shape: f32[200], index: 0, kind: input, shape index: {}]   ;;  %s47_s1 = inlined_call_operand.vmem [shape: f32[2,100], index: 1, kind: output, shape index: {}]  }
   0x1   :  { %v4_v0 = vld [vmem:[%s46_s0] sm:$0x3]  ;;  %s29_s0 = smov 28  }
   0x2   :  { %5 = vst [vmem:[#allocation1] sm:$0x3] %v4_v0 }
   0x9   :  { %v6_v1 = vld [vmem:[#allocation1] sm:$0x1]   ;;  %v11_v3 = vld [vmem:[#allocation1 + $0x1] sm:$0x1]  }
   0xa   :  { %v9_v2 = vld [vmem:[#allocation1] sm:$0x1]   ;;  %8 = vst.msk [vmem:[#allocation0] sm:$0x1] %vm7_vm0, %v6_v1  }
   0xb   :  { %v13_v4 = vsel %vm7_vm0, %v11_v3, %v9_v2 }
   0xc   :  { %14 = vrot.lane.b32.xlu0 %v13_v4, %s29_s0 }
  0x7e   :  { %v15_v5 = vpop.permute.xlu0 %14  }
  0x7f   :  { %18 = vst.msk [vmem:[#allocation0 + $0x1] sm:$0x1] %vm16_vm1, %v15_v5  }
  0x80   :  { %21 = vst.msk [vmem:[#allocation0 + $0x1] sm:$0x1] %vm19_vm2, %v15_v5  }
  0x87   :  { %v24_v6 = vld [vmem:[#allocation0] sm:$0x3] }
  0x88   :  { %27 = vst [vmem:[%s47_s1] sm:$0x3] %v24_v6 }

// kernel: glow_forward.8
= control target key start
LH: loop header
LB: loop body
LE: loop exit
PB: predicated region body
PF: predicated region fallthrough
CT: control target
= control target key end

     0   :  { %s3209_s27 = smov 0   ;;  %s4306_s0 = inlined_call_operand.vmem [shape: f32[230,6], index: 0, kind: input, shape index: {}]   ;;  %s4307_s1 = inlined_call_operand.vmem [shape: f32[230,1], index: 1, kind: input, shape index: {}]   ;;  %s4308_s2 = inlined_call_operand.vmem [shape: f32[9,6,16], index: 2, kind: input, shape index: {}]   ;;  %s4309_s3 = inlined_call_operand.vmem [shape: f32[1,16], index: 3, kind: input, shape index: {}]   ;;  %s4310_s4 = inlined_call_operand.vmem [shape: f32[1,6], index: 4, kind: input, shape index: {}]   ;;  %s4311_s5 = inlined_call_operand.vmem [shape: f32[1,6], index: 5, kind: input, shape index: {}]   ;;  %s4312_s6 = inlined_call_operand.vmem [shape: f32[208,16], index: 6, kind: output, shape index: {0}]   ;;  %s4313_s7 = inlined_call_operand.vmem [shape: f32[16,16], index: 7, kind: output, shape index: {1}]   ;;  %s4314_s8 = inlined_call_operand.vmem [shape: f32[16,16], index: 8, kind: output, shape index: {2}]  }
   0x1 LB: > { %s3215_s28 = sadd.s32 4294967295, %s3161_s27   ;;  %p2787_p0 = scmp.ge.s32.totalorder %s3161_s27, 1  ;;  %s3161_s27 = sphi %s3209_s27, %s19_s27  }
   0x2   : > { %p257_p1 = scmp.lt.s32.totalorder %s3161_s27, 3 }
   0x4   : > { %p258_p2 = pnand %p2787_p0, %p257_p1 }
   0x5   : > { %s308_s29 = smul.u32 (!%p258_p2), 104, %s3215_s28  ;;  %p300_p4 = scmp.lt.s32.totalorder (!%p258_p2), %s3215_s28, 1 }
   0x6   : > { %261 = sbr.rel (%p258_p2) target bundleno = 618 (0x26a), region = 44 }
   0x7   : > { %s3225_s10 = scalar_lea.vmem (!%p258_p2), %s4307_s1, %s308_s29  ;;  %s3290_s15 = scalar_lea.vmem (!%p258_p2), %s4306_s0, %s308_s29 }
   0xb   : > { %v3163_v0 = vmov 0   ;;  %v330_v1 = vld [vmem:[%s3225_s10 + $0x20] sm:$0xff]  ;;  %v328_v2 = vld [vmem:[%s3225_s10 + $0x10] sm:$0xff]  ;;  %v331_v4 = vld [vmem:[%s3225_s10 + $0x28] sm:$0xff]  ;;  %vm625_vm0 = vcmask 1045504   ;;  %vm585_vm1 = vcmask 48128  }
   0xc   : > { %3149 = vset.pattern.permute.xlu2 %v3163_v0  ;;  %3148 = vset.pattern.permute.xlu1 %v3163_v0  ;;  %v326_v3 = vld [vmem:[%s3225_s10] sm:$0xff]  ;;  %v329_v5 = vld [vmem:[%s3225_s10 + $0x18] sm:$0xff]  ;;  %v327_v6 = vld [vmem:[%s3225_s10 + $0x8] sm:$0xff]  ;;  %vm2522_vm2 = vcmask 130048  }
   0xd   : > { %3147 = vset.pattern.permute.xlu0 %v3163_v0  ;;  %393 = vperm.xlu2 %3149, %v330_v1   ;;  %v334_v7 = vld [vmem:[%s3225_s10 + $0x40] sm:$0xff]  ;;  %v333_v8 = vld [vmem:[%s3225_s10 + $0x38] sm:$0xff]  ;;  %v332_v9 = vld [vmem:[%s3225_s10 + $0x30] sm:$0xff] }
   0xe   : > { %383 = vperm.xlu1 %3148, %v328_v2   ;;  %373 = vperm.xlu0 %3147, %v326_v3   ;;  %v337_v10 = vld [vmem:[%s3225_s10 + $0x58] sm:$0xff]  ;;  %v336_v11 = vld [vmem:[%s3225_s10 + $0x50] sm:$0xff]  ;;  %v335_v12 = vld [vmem:[%s3225_s10 + $0x48] sm:$0xff] }
   0xf   : > { %v2805_v13 = vld [vmem:[%s3225_s10 + $0x9] sm:$0xff]  ;;  %v2804_v14 = vld [vmem:[%s3225_s10 + $0x1] sm:$0xff]  ;;  %v2807_v17 = vld [vmem:[%s3225_s10 + $0x19] sm:$0xff] }
  0x10   : > { %v338_v15 = vld [vmem:[%s3225_s10 + $0x60] sm:$0xff]  ;;  %v2806_v18 = vld [vmem:[%s3225_s10 + $0x11] sm:$0xff]  ;;  %v2809_v21 = vld [vmem:[%s3225_s10 + $0x29] sm:$0xff] }
  0x11   : > { %v2808_v16 = vld [vmem:[%s3225_s10 + $0x21] sm:$0xff]  ;;  %v2811_v19 = vld [vmem:[%s3225_s10 + $0x39] sm:$0xff]  ;;  %v2810_v20 = vld [vmem:[%s3225_s10 + $0x31] sm:$0xff] }
  0x12   : > { %v2814_v22 = vld [vmem:[%s3225_s10 + $0x51] sm:$0xff]  ;;  %v2813_v23 = vld [vmem:[%s3225_s10 + $0x49] sm:$0xff]  ;;  %v2812_v24 = vld [vmem:[%s3225_s10 + $0x41] sm:$0xff] }
  0x13   : > { %v2859_v25 = vld [vmem:[%s3225_s10 + $0x2] sm:$0xff]  ;;  %v2815_v27 = vld [vmem:[%s3225_s10 + $0x59] sm:$0xff]  ;;  %v2860_v30 = vld [vmem:[%s3225_s10 + $0xa] sm:$0xff] }
  0x14   : > { %v2816_v26 = vld [vmem:[%s3225_s10 + $0x61] sm:$0xff]  ;;  %v2861_v29 = vld [vmem:[%s3225_s10 + $0x12] sm:$0xff]  ;;  %v2864_v32 = vld [vmem:[%s3225_s10 + $0x2a] sm:$0xff] }
  0x15   : > { %398 = vperm.xlu2 %3149, %v331_v4   ;;  %v2862_v28 = vld [vmem:[%s3225_s10 + $0x1a] sm:$0xff]  ;;  %v2865_v31 = vld [vmem:[%s3225_s10 + $0x32] sm:$0xff]  ;;  %v2863_v33 = vld [vmem:[%s3225_s10 + $0x22] sm:$0xff] }
  0x16   : > { %388 = vperm.xlu1 %3148, %v329_v5   ;;  %378 = vperm.xlu0 %3147, %v327_v6   ;;  %v2868_v34 = vld [vmem:[%s3225_s10 + $0x4a] sm:$0xff]  ;;  %v2867_v35 = vld [vmem:[%s3225_s10 + $0x42] sm:$0xff]  ;;  %v2866_v36 = vld [vmem:[%s3225_s10 + $0x3a] sm:$0xff] }
  0x17   : > { %v2871_v38 = vld [vmem:[%s3225_s10 + $0x62] sm:$0xff]  ;;  %v2870_v39 = vld [vmem:[%s3225_s10 + $0x5a] sm:$0xff]  ;;  %v2869_v40 = vld [vmem:[%s3225_s10 + $0x52] sm:$0xff] }
  0x18   : > { %v2817_v42 = vld [vmem:[%s4308_s2 + $0x8] sm:$0x3f]  ;;  %v3296_v48 = vld [vmem:[%s4311_s5] ss:$0 sm:$0xff]  ;;  %v2942_v59 = vld [vmem:[%s3225_s10 + $0x13] sm:$0xff] }
  0x19   : > { %3135 = vmatpush.msk.msra.mxu1 %vm625_vm0, %v2817_v42  ;;  %2818 = vmatpush.msk.msra.mxu0 %vm625_vm0, %v2817_v42  ;;  %v2795_v47 = vld [vmem:[%s3290_s15 + $0x21] sm:$0xff]  ;;  %v3306_v53 = vld [vmem:[%s4310_s4] ss:$0 sm:$0xff]  ;;  %v2941_v60 = vld [vmem:[%s3225_s10 + $0xb] sm:$0xff] }
  0x1a   : > { %3136 = vmatpush.msk.msra.mxu2 %vm625_vm0, %v2817_v42  ;;  %3137 = vmatpush.msk.msra.mxu3 %vm625_vm0, %v2817_v42  ;;  %v483_v52 = vadd.f32 %v3296_v48, %v2795_v47  ;;  %v2912_v61 = vld [vmem:[%s3225_s10 + $0x6a] sm:$0xff]  ;;  %v2791_v62 = vld [vmem:[%s3290_s15 + $0x1] sm:$0xff] }
  0x1b   : > { %v479_v2 = vadd.f32 %v3296_v48, %v2791_v62  ;;  %v2945_v3 = vld [vmem:[%s3225_s10 + $0x2b] sm:$0xff]  ;;  %v2944_v4 = vld [vmem:[%s3225_s10 + $0x23] sm:$0xff]  ;;  %v2943_v5 = vld [vmem:[%s3225_s10 + $0x1b] sm:$0xff] }
  0x1c   : > { %v496_v54 = vmul.f32 %v3306_v53, %v483_v52  ;;  %v2801_v62 = vld [vmem:[%s3290_s15 + $0x51] sm:$0xff] }
  0x1d   : > { %413 = vperm.xlu2 %3149, %v334_v7   ;;  %v492_v6 = vmul.f32 %v3306_v53, %v479_v2  ;;  %v2792_v7 = vld [vmem:[%s3290_s15 + $0x9] sm:$0xff] }
  0x1e   : > { %408 = vperm.xlu1 %3148, %v333_v8   ;;  %403 = vperm.xlu0 %3147, %v332_v9  }
  0x25   : > { %428 = vperm.xlu2 %3149, %v337_v10   ;;  %v480_v10 = vadd.f32 %v3296_v48, %v2792_v7 }
  0x26   : > { %423 = vperm.xlu1 %3148, %v336_v11   ;;  %418 = vperm.xlu0 %3147, %v335_v12  }
  0x2d   : > { %512 = vperm.xlu2 %3149, %v2805_v13   ;;  %v2872_v13 = vld [vmem:[%s4308_s2 + $0x10] sm:$0x3f] }
  0x2e   : > { %507 = vperm.xlu1 %3148, %v2804_v14   ;;  %433 = vperm.xlu0 %3147, %v338_v15   ;;  %v2948_v14 = vld [vmem:[%s3225_s10 + $0x43] sm:$0xff]  ;;  %v2947_v15 = vld [vmem:[%s3225_s10 + $0x3b] sm:$0xff] }
  0x2f   : > { %2873 = vmatpush.msk.msrb.mxu2 %vm625_vm0, %v2872_v13 }
  0x35   : > { %527 = vperm.xlu2 %3149, %v2808_v16   ;;  %v2946_v16 = vld [vmem:[%s3225_s10 + $0x33] sm:$0xff] }
  0x36   : > { %522 = vperm.xlu1 %3148, %v2807_v17   ;;  %517 = vperm.xlu0 %3147, %v2806_v18   ;;  %v493_v17 = vmul.f32 %v3306_v53, %v480_v10  ;;  %v2793_v18 = vld [vmem:[%s3290_s15 + $0x11] sm:$0xff] }
  0x3d   : > { %542 = vperm.xlu2 %3149, %v2811_v19   ;;  %v2796_v19 = vld [vmem:[%s3290_s15 + $0x29] sm:$0xff] }
  0x3e   : > { %537 = vperm.xlu1 %3148, %v2810_v20   ;;  %532 = vperm.xlu0 %3147, %v2809_v21  }
  0x45   : > { %557 = vperm.xlu2 %3149, %v2814_v22  }
  0x46   : > { %552 = vperm.xlu1 %3148, %v2813_v23   ;;  %547 = vperm.xlu0 %3147, %v2812_v24   ;;  %v481_v24 = vadd.f32 %v3296_v48, %v2793_v18  ;;  %v3023_v18 = vld [vmem:[%s3225_s10 + $0x14] sm:$0xff] }
  0x4d   : > { %840 = vperm.xlu2 %3149, %v2859_v25   ;;  %v484_v25 = vadd.f32 %v3296_v48, %v2796_v19  ;;  %v2984_v19 = vld [vmem:[%s3225_s10 + $0x1c] sm:$0xff] }
  0x4e   : > { %567 = vperm.xlu1 %3148, %v2816_v26   ;;  %562 = vperm.xlu0 %3147, %v2815_v27   ;;  %v449_v26 = vld [vmem:[%s4308_s2] sm:$0x3f] }
  0x4f   : > { %v2951_v27 = vld [vmem:[%s3225_s10 + $0x5b] sm:$0xff]  ;;  %2832 = vmatpush.msk.msrb.mxu1 %vm625_vm0, %v449_v26  ;;  %v2847_v26 = vld [vmem:[%s3290_s15 + $0xa] sm:$0xff] }
  0x55   : > { %855 = vperm.xlu2 %3149, %v2862_v28  }
  0x56   : > { %850 = vperm.xlu1 %3148, %v2861_v29   ;;  %845 = vperm.xlu0 %3147, %v2860_v30  }
  0x5d   : > { %870 = vperm.xlu2 %3149, %v2865_v31  }
  0x5e   : > { %865 = vperm.xlu1 %3148, %v2864_v32   ;;  %860 = vperm.xlu0 %3147, %v2863_v33  }
  0x65   : > { %885 = vperm.xlu2 %3149, %v2868_v34  }
  0x66   : > { %880 = vperm.xlu1 %3148, %v2867_v35   ;;  %875 = vperm.xlu0 %3147, %v2866_v36  }
  0x67   : > { %v3263_v37 = vpop.permute.xlu2 %393 }
  0x6d   : > { %900 = vperm.xlu2 %3149, %v2871_v38  }
  0x6e   : > { %895 = vperm.xlu1 %3148, %v2870_v39   ;;  %890 = vperm.xlu0 %3147, %v2869_v40  }
  0x6f   : > { %v3268_v41 = vpop.permute.xlu2 %398 }
  0x75   : > { %1096 = vperm.xlu2 %3149, %v2862_v28   ;;  %v2950_v28 = vld [vmem:[%s3225_s10 + $0x53] sm:$0xff] }
  0x76   : > { %1091 = vperm.xlu1 %3148, %v2861_v29   ;;  %1086 = vperm.xlu0 %3147, %v2860_v30   ;;  %v2949_v29 = vld [vmem:[%s3225_s10 + $0x4b] sm:$0xff]  ;;  %v494_v30 = vmul.f32 %v3306_v53, %v481_v24  ;;  %v2802_v24 = vld [vmem:[%s3290_s15 + $0x59] sm:$0xff] }
  0x77   : > { %v3277_v43 = vpop.permute.xlu2 %413 }
  0x7d   : > { %1111 = vperm.xlu2 %3149, %v2865_v31   ;;  %v2794_v31 = vld [vmem:[%s3290_s15 + $0x19] sm:$0xff] }
  0x7e   : > { %1106 = vperm.xlu1 %3148, %v2864_v32   ;;  %1101 = vperm.xlu0 %3147, %v2863_v33   ;;  %v497_v32 = vmul.f32 %v3306_v53, %v484_v25  ;;  %v2800_v33 = vld [vmem:[%s3290_s15 + $0x49] sm:$0xff]  ;;  %v312_v25 = vld [vmem:[%s3290_s15] sm:$0xff] }
  0x7f   : > { %v3279_v44 = vpop.permute.xlu2 %428  ;;  %v488_v47 = vadd.f32 %v3296_v48, %v2800_v33 }
  0x80   : > { %v3281_v45 = vpop.permute.xlu1 %383  ;;  %v3283_v46 = vpop.permute.xlu0 %373 }
  0x85   : > { %1126 = vperm.xlu2 %3149, %v2868_v34   ;;  %v2797_v34 = vld [vmem:[%s3290_s15 + $0x31] sm:$0xff] }
  0x86   : > { %1121 = vperm.xlu1 %3148, %v2867_v35   ;;  %1116 = vperm.xlu0 %3147, %v2866_v36   ;;  %v2799_v35 = vld [vmem:[%s3290_s15 + $0x41] sm:$0xff] }
  0x87   : > { %v513_v49 = vpop.permute.xlu2 %512 }
  0x88   : > { %v3298_v50 = vpop.permute.xlu1 %388  ;;  %v3300_v51 = vpop.permute.xlu0 %378  ;;  %v571_v22 = vmul.f32 %v513_v49, %v493_v17  ;;  %v485_v49 = vadd.f32 %v3296_v48, %v2797_v34 }
  0x8a   : > { %v498_v2 = vmul.f32 %v3306_v53, %v485_v49  ;;  %v2848_v49 = vld [vmem:[%s3290_s15 + $0x12] sm:$0xff] }
  0x8d   : > { %1141 = vperm.xlu2 %3149, %v2871_v38  }
  0x8e   : > { %1136 = vperm.xlu1 %3148, %v2870_v39   ;;  %1131 = vperm.xlu0 %3147, %v2869_v40   ;;  %v482_v39 = vadd.f32 %v3296_v48, %v2794_v31  ;;  %v490_v31 = vadd.f32 %v3296_v48, %v2802_v24  ;;  %v3026_v24 = vld [vmem:[%s3225_s10 + $0x2c] sm:$0xff] }
  0x8f   : > { %v528_v55 = vpop.permute.xlu2 %527 }
  0x90   : > { %v3309_v56 = vpop.permute.xlu1 %408  ;;  %v574_v57 = vmul.f32 %v528_v55, %v496_v54  ;;  %v3311_v58 = vpop.permute.xlu0 %403  ;;  %v487_v54 = vadd.f32 %v3296_v48, %v2799_v35  ;;  %v2982_v55 = vld [vmem:[%s3225_s10 + $0xc] sm:$0xff]  ;;  %v813_v35 = vadd.f32 %v3296_v48, %v2847_v26 }
  0x92   : > { %2823 = vmatmul.msk.f32.vlgmr.msra.gmra.mxu1 %vm585_vm1, %v574_v57  ;;  %v2953_v57 = vld [vmem:[%s3225_s10 + $0x6b] sm:$0xff] }
  0x95   : > { %1337 = vperm.xlu2 %3149, %v2942_v59   ;;  %v2952_v59 = vld [vmem:[%s3225_s10 + $0x63] sm:$0xff] }
  0x96   : > { %1332 = vperm.xlu1 %3148, %v2941_v60   ;;  %1146 = vperm.xlu0 %3147, %v2912_v61   ;;  %v495_v60 = vmul.f32 %v3306_v53, %v482_v39  ;;  %v501_v61 = vmul.f32 %v3306_v53, %v488_v47  ;;  %v2913_v39 = vld [vmem:[%s4308_s2 + $0x18] sm:$0x3f]  ;;  %v313_v47 = vld [vmem:[%s3290_s15 + $0x8] sm:$0xff] }
  0x97   : > { %v3318_v63 = vpop.permute.xlu2 %542  ;;  %2914 = vmatpush.msk.msrb.mxu3 %vm625_vm0, %v2913_v39  ;;  %v3107_v39 = vld [vmem:[%s3225_s10 + $0x26] sm:$0xff] }
  0x98   : > { %v3320_v0 = vpop.permute.xlu1 %423  ;;  %v3322_v1 = vpop.permute.xlu0 %418 }
  0x9d   : > { %1352 = vperm.xlu2 %3149, %v2945_v3   ;;  %v500_v3 = vmul.f32 %v3306_v53, %v487_v54 }
  0x9e   : > { %1347 = vperm.xlu1 %3148, %v2944_v4   ;;  %1342 = vperm.xlu0 %3147, %v2943_v5   ;;  %v2798_v4 = vld [vmem:[%s3290_s15 + $0x39] sm:$0xff]  ;;  %v2846_v5 = vld [vmem:[%s3290_s15 + $0x2] sm:$0xff] }
  0x9f   : > { %v3330_v8 = vpop.permute.xlu2 %557 }
  0xa0   : > { %v508_v9 = vpop.permute.xlu1 %507  ;;  %v3333_v12 = vpop.permute.xlu0 %433 }
  0xa1   : > { %v570_v11 = vmul.f32 %v508_v9, %v492_v6  ;;  %v489_v9 = vadd.f32 %v3296_v48, %v2801_v62  ;;  %v814_v62 = vadd.f32 %v3296_v48, %v2848_v49 }
  0xa3   : > { %2819 = vmatmul.msk.f32.vlgmr.msra.gmra.mxu0 %vm585_vm1, %v570_v11 }
  0xa5   : > { %1367 = vperm.xlu2 %3149, %v2948_v14   ;;  %v486_v14 = vadd.f32 %v3296_v48, %v2798_v4  ;;  %v3025_v4 = vld [vmem:[%s3225_s10 + $0x24] sm:$0xff] }
  0xa6   : > { %1362 = vperm.xlu1 %3148, %v2947_v15   ;;  %1357 = vperm.xlu0 %3147, %v2946_v16   ;;  %v812_v15 = vadd.f32 %v3296_v48, %v2846_v5  ;;  %v3105_v5 = vld [vmem:[%s3225_s10 + $0x16] sm:$0xff] }
  0xa7   : > { %v3346_v20 = vpop.permute.xlu2 %840 }
  0xa8   : > { %v523_v21 = vpop.permute.xlu1 %522  ;;  %v518_v23 = vpop.permute.xlu0 %517 }
  0xa9   : > { %v572_v40 = vmul.f32 %v518_v23, %v494_v30  ;;  %v573_v10 = vmul.f32 %v523_v21, %v495_v60  ;;  %v502_v21 = vmul.f32 %v3306_v53, %v489_v9  ;;  %v825_v23 = vmul.f32 %v3306_v53, %v812_v15 }
  0xab   : > { %2820 = vmatmul.msk.f32.gmra.mxu0 %vm585_vm1, %v571_v22  ;;  %v499_v22 = vmul.f32 %v3306_v53, %v486_v14  ;;  %v903_v34 = vmul.f32 %v3346_v20, %v825_v23  ;;  %v3067_v23 = vld [vmem:[%s3225_s10 + $0x2d] sm:$0xff] }
  0xad   : > { %1382 = vperm.xlu2 %3149, %v2951_v27   ;;  %v577_v33 = vmul.f32 %v3318_v63, %v499_v22  ;;  %v503_v63 = vmul.f32 %v3306_v53, %v490_v31 }
  0xae   : > { %1377 = vperm.xlu1 %3148, %v2950_v28   ;;  %1372 = vperm.xlu0 %3147, %v2949_v29   ;;  %v580_v29 = vmul.f32 %v3330_v8, %v502_v21  ;;  %v3064_v8 = vld [vmem:[%s3225_s10 + $0x15] sm:$0xff] }
  0xaf   : > { %v3364_v36 = vpop.permute.xlu2 %855 }
  0xb0   : > { %v538_v38 = vpop.permute.xlu1 %537  ;;  %v533_v42 = vpop.permute.xlu0 %532 }
  0xb1   : > { %v575_v52 = vmul.f32 %v533_v42, %v497_v32  ;;  %v576_v16 = vmul.f32 %v538_v38, %v498_v2  ;;  %v342_v32 = vadd.f32 %v3296_v48, %v312_v25  ;;  %v3065_v38 = vld [vmem:[%s3225_s10 + $0x1d] sm:$0xff]  ;;  %v3420_v42 = vmul.f32 %v3306_v53, %v813_v35 }
  0xb2   : > { %v3106_v25 = vld [vmem:[%s3225_s10 + $0x1e] sm:$0xff] }
  0xb3   : > { %2821 = vmatmul.msk.f32.gmra.mxu0 %vm585_vm1, %v572_v40  ;;  %2824 = vmatmul.msk.f32.gmra.mxu1 %vm585_vm1, %v575_v52  ;;  %v358_v20 = vmul.f32 %v3306_v53, %v342_v32  ;;  %v2803_v40 = vld [vmem:[%s3290_s15 + $0x61] sm:$0xff] }
  0xb5   : > { %1578 = vperm.xlu2 %3149, %v2982_v55   ;;  %v491_v55 = vadd.f32 %v3296_v48, %v2803_v40  ;;  %v436_v60 = vmul.f32 %v3283_v46, %v358_v20  ;;  %v2954_v46 = vld [vmem:[%s4308_s2 + $0x20] sm:$0x3f] }
  0xb6   : > { %1392 = vperm.xlu1 %3148, %v2953_v57   ;;  %1387 = vperm.xlu0 %3147, %v2952_v59  }
  0xb7   : > { %v3382_v6 = vpop.permute.xlu2 %870  ;;  %2955 = vmatpush.msk.msrb.mxu0 %vm625_vm0, %v2954_v46 }
  0xb8   : > { %v553_v7 = vpop.permute.xlu1 %552  ;;  %v548_v13 = vpop.permute.xlu0 %547 }
  0xb9   : > { %v579_v11 = vmul.f32 %v553_v7, %v501_v61  ;;  %v578_v17 = vmul.f32 %v548_v13, %v500_v3  ;;  %v343_v61 = vadd.f32 %v3296_v48, %v313_v47  ;;  %v3066_v3 = vld [vmem:[%s3225_s10 + $0x25] sm:$0xff]  ;;  %v504_v7 = vmul.f32 %v3306_v53, %v491_v55  ;;  %v2849_v13 = vld [vmem:[%s3290_s15 + $0x1a] sm:$0xff] }
  0xba   : > { %v815_v21 = vadd.f32 %v3296_v48, %v2849_v13 }
  0xbb   : > { %2822 = vmatmul.msk.f32.gmra.mxu0 %vm585_vm1, %v573_v10  ;;  %2828 = vmatmul.msk.f32.vlgmr.msra.gmra.mxu3 %vm585_vm1, %v579_v11  ;;  %v359_v9 = vmul.f32 %v3306_v53, %v343_v61  ;;  %v3443_v10 = vmul.f32 %v3306_v53, %v814_v62  ;;  %v314_v11 = vld [vmem:[%s3290_s15 + $0x10] sm:$0xff] }
  0xbc   : > { %2825 = vmatmul.msk.f32.gmra.mxu1 %vm585_vm1, %v576_v16  ;;  %2827 = vmatmul.msk.f32.vlgmr.msra.gmra.mxu2 %vm585_vm1, %v578_v17  ;;  %v3108_v61 = vld [vmem:[%s3225_s10 + $0x2e] sm:$0xff] }
  0xbd   : > { %1824 = vperm.xlu2 %3149, %v3023_v18   ;;  %v3068_v62 = vld [vmem:[%s3225_s10 + $0x35] sm:$0xff] }
  0xbe   : > { %1588 = vperm.xlu1 %3148, %v2984_v19   ;;  %1583 = vperm.xlu0 %3147, %v3023_v18   ;;  %v344_v18 = vadd.f32 %v3296_v48, %v314_v11 }
  0xbf   : > { %v3399_v27 = vpop.permute.xlu2 %885 }
  0xc0   : > { %v568_v28 = vpop.permute.xlu1 %567  ;;  %v563_v30 = vpop.permute.xlu0 %562  ;;  %v360_v26 = vmul.f32 %v3306_v53, %v344_v18 }
  0xc1   : > { %v581_v57 = vmul.f32 %v563_v30, %v503_v63  ;;  %v582_v16 = vmul.f32 %v568_v28, %v504_v7  ;;  %v3464_v28 = vmul.f32 %v3306_v53, %v815_v21  ;;  %v2852_v7 = vld [vmem:[%s3290_s15 + $0x32] sm:$0xff] }
  0xc2   : > { %v3109_v21 = vld [vmem:[%s3225_s10 + $0x36] sm:$0xff] }
  0xc3   : > { %2829 = vmatmul.msk.f32.gmra.mxu3 %vm585_vm1, %v580_v29  ;;  %v2850_v29 = vld [vmem:[%s3290_s15 + $0x22] sm:$0xff]  ;;  %v906_v35 = vmul.f32 %v3364_v36, %v3464_v28  ;;  %v2851_v36 = vld [vmem:[%s3290_s15 + $0x2a] sm:$0xff] }
  0xc4   : > { %2826 = vmatmul.msk.f32.gmra.mxu1 %vm585_vm1, %v577_v33  ;;  %2874 = vmatmul.msk.f32.vlgmr.msrb.gmra.mxu2 %vm585_vm1, %v903_v34  ;;  %v438_v33 = vmul.f32 %v3281_v45, %v360_v26  ;;  %v316_v45 = vld [vmem:[%s3290_s15 + $0x20] sm:$0xff] }
  0xc5   : > { %2075 = vperm.xlu2 %3149, %v3065_v38   ;;  %v816_v38 = vadd.f32 %v3296_v48, %v2850_v29 }
  0xc6   : > { %1829 = vperm.xlu1 %3148, %v2984_v19   ;;  %2070 = vperm.xlu0 %3147, %v3064_v8   ;;  %v437_v19 = vmul.f32 %v3300_v51, %v359_v9  ;;  %v315_v51 = vld [vmem:[%s3290_s15 + $0x18] sm:$0xff] }
  0xc7   : > { %v3424_v52 = vpop.permute.xlu2 %900  ;;  %v345_v34 = vadd.f32 %v3296_v48, %v315_v51  ;;  %v3480_v8 = vld [vmem:[%s3225_s10 + $0x34] sm:$0xff]  ;;  %v3487_v20 = vmul.f32 %v3306_v53, %v816_v38 }
  0xc8   : > { %v851_v54 = vpop.permute.xlu1 %850  ;;  %v846_v59 = vpop.permute.xlu0 %845 }
  0xc9   : > { %v904_v2 = vmul.f32 %v846_v59, %v3420_v42  ;;  %v905_v22 = vmul.f32 %v851_v54, %v3443_v10  ;;  %v361_v63 = vmul.f32 %v3306_v53, %v345_v34  ;;  %v346_v54 = vadd.f32 %v3296_v48, %v316_v45  ;;  %v3029_v45 = vld [vmem:[%s3225_s10 + $0x44] sm:$0xff] }
  0xcb   : > { %2830 = vmatmul.msk.f32.gmra.mxu3 %vm585_vm1, %v581_v57  ;;  %v439_v55 = vmul.f32 %v3298_v50, %v361_v63  ;;  %v817_v57 = vadd.f32 %v3296_v48, %v2851_v36  ;;  %v3077_v50 = vld [vmem:[%s4308_s2 + $0x38] sm:$0x3f]  ;;  %v3070_v63 = vld [vmem:[%s3225_s10 + $0x45] sm:$0xff] }
  0xcc   : > { %2833 = vmatmul.msk.f32.vlgmr.msrb.gmra.mxu1 %vm585_vm1, %v436_v60  ;;  %2875 = vmatmul.msk.f32.gmra.mxu2 %vm585_vm1, %v904_v2  ;;  %v3036_v60 = vld [vmem:[%s4308_s2 + $0x30] sm:$0x3f]  ;;  %v2995_v2 = vld [vmem:[%s4308_s2 + $0x28] sm:$0x3f] }
  0xcd   : > { %2080 = vperm.xlu2 %3149, %v3066_v3   ;;  %3037 = vmatpush.msk.msra.mxu2 %vm625_vm0, %v3036_v60  ;;  %v362_v3 = vmul.f32 %v3306_v53, %v346_v54  ;;  %v2854_v54 = vld [vmem:[%s3290_s15 + $0x42] sm:$0xff] }
  0xce   : > { %1834 = vperm.xlu1 %3148, %v3025_v4   ;;  %2316 = vperm.xlu0 %3147, %v3105_v5   ;;  %v3519_v5 = vmul.f32 %v3306_v53, %v817_v57 }
  0xcf   : > { %v3448_v14 = vpop.permute.xlu2 %1096  ;;  %3078 = vmatpush.msk.msra.mxu3 %vm625_vm0, %v3077_v50  ;;  %2996 = vmatpush.msk.msra.mxu1 %vm625_vm0, %v2995_v2  ;;  %v3584_v50 = vld [vmem:[%s3225_s10 + $0x4c] sm:$0xff]  ;;  %v3110_v2 = vld [vmem:[%s3225_s10 + $0x3e] sm:$0xff] }
  0xd0   : > { %v3450_v15 = vpop.permute.xlu1 %865  ;;  %v861_v17 = vpop.permute.xlu0 %860 }
  0xd1   : > { %v907_v59 = vmul.f32 %v861_v17, %v3487_v20  ;;  %v818_v17 = vadd.f32 %v3296_v48, %v2852_v7  ;;  %v908_v18 = vmul.f32 %v3450_v15, %v3519_v5 }
  0xd3   : > { %2831 = vmatmul.msk.f32.gmra.mxu3 %vm585_vm1, %v582_v16  ;;  %v440_v16 = vmul.f32 %v3263_v37, %v362_v3  ;;  %v3118_v37 = vld [vmem:[%s4308_s2 + $0x40] sm:$0x3f]  ;;  %v3543_v15 = vmul.f32 %v3306_v53, %v818_v17 }
  0xd4   : > { %2834 = vmatmul.msk.f32.gmra.mxu1 %vm585_vm1, %v437_v19  ;;  %2876 = vmatmul.msk.f32.gmra.mxu2 %vm585_vm1, %v905_v22  ;;  %v3069_v22 = vld [vmem:[%s3225_s10 + $0x3d] sm:$0xff] }
  0xd5   : > { %2085 = vperm.xlu2 %3149, %v3067_v23   ;;  %v3028_v23 = vld [vmem:[%s3225_s10 + $0x3c] sm:$0xff]  ;;  %3119 = vmatpush.msk.msra.mxu0 %vm625_vm0, %v3118_v37 }
  0xd6   : > { %1839 = vperm.xlu1 %3148, %v3026_v24   ;;  %2321 = vperm.xlu0 %3147, %v3106_v25   ;;  %v2853_v25 = vld [vmem:[%s3290_s15 + $0x3a] sm:$0xff] }
  0xd7   : > { %v3468_v30 = vpop.permute.xlu2 %1111  ;;  %v819_v38 = vadd.f32 %v3296_v48, %v2853_v25 }
  0xd8   : > { %v3470_v31 = vpop.permute.xlu1 %880  ;;  %v3472_v32 = vpop.permute.xlu0 %875 }
  0xd9   : > { %v3565_v36 = vmul.f32 %v3306_v53, %v819_v38 }
  0xdc   : > { %2835 = vmatmul.msk.f32.gmra.mxu1 %vm585_vm1, %v438_v33  ;;  %2877 = vmatmul.msk.f32.gmra.mxu2 %vm585_vm1, %v906_v35  ;;  %v909_v35 = vmul.f32 %v3382_v6, %v3543_v15  ;;  %v319_v6 = vld [vmem:[%s3290_s15 + $0x38] sm:$0xff] }
  0xdd   : > { %1844 = vperm.xlu2 %3149, %v3480_v8  }
  0xde   : > { %1593 = vperm.xlu1 %3148, %v3025_v4   ;;  %2326 = vperm.xlu0 %3147, %v3107_v39   ;;  %v317_v4 = vld [vmem:[%s3290_s15 + $0x28] sm:$0xff] }
  0xdf   : > { %v3492_v40 = vpop.permute.xlu2 %1126  ;;  %v347_v11 = vadd.f32 %v3296_v48, %v317_v4 }
  0xe0   : > { %v3494_v47 = vpop.permute.xlu1 %895  ;;  %v3496_v49 = vpop.permute.xlu0 %890 }
  0xe4   : > { %2836 = vmatmul.msk.f32.gmra.mxu1 %vm585_vm1, %v439_v55  ;;  %2878 = vmatmul.msk.f32.gmra.mxu2 %vm585_vm1, %v907_v59  ;;  %v349_v59 = vadd.f32 %v3296_v48, %v319_v6  ;;  %v3072_v6 = vld [vmem:[%s3225_s10 + $0x55] sm:$0xff] }
  0xe5   : > { %1598 = vperm.xlu2 %3149, %v3026_v24   ;;  %v363_v24 = vmul.f32 %v3306_v53, %v347_v11 }
  0xe6   : > { %2331 = vperm.xlu1 %3148, %v3108_v61   ;;  %2090 = vperm.xlu0 %3147, %v3068_v62   ;;  %v820_v61 = vadd.f32 %v3296_v48, %v2854_v54  ;;  %v910_v62 = vmul.f32 %v3472_v32, %v3565_v36  ;;  %v365_v3 = vmul.f32 %v3306_v53, %v349_v59  ;;  %v2928_v32 = vld [vmem:[%s3290_s15 + $0xb] sm:$0xff] }
  0xe7   : > { %v3523_v46 = vpop.permute.xlu2 %1141  ;;  %v441_v33 = vmul.f32 %v3268_v41, %v363_v24  ;;  %v1304_v11 = vadd.f32 %v3296_v48, %v2928_v32  ;;  %v2929_v24 = vld [vmem:[%s3290_s15 + $0x13] sm:$0xff] }
  0xe8   : > { %v1092_v9 = vpop.permute.xlu1 %1091  ;;  %v1087_v13 = vpop.permute.xlu0 %1086 }
  0xe9   : > { %v1149_v19 = vmul.f32 %v1087_v13, %v3420_v42  ;;  %v318_v42 = vld [vmem:[%s3290_s15 + $0x30] sm:$0xff]  ;;  %v1150_v39 = vmul.f32 %v1092_v9, %v3443_v10 }
  0xea   : > { %v348_v34 = vadd.f32 %v3296_v48, %v318_v42 }
  0xeb   : > { %2915 = vmatmul.msk.f32.vlgmr.msrb.gmra.mxu3 %vm585_vm1, %v1149_v19 }
  0xec   : > { %2837 = vmatmul.msk.f32.gmra.mxu1 %vm585_vm1, %v440_v16  ;;  %2879 = vmatmul.msk.f32.gmra.mxu2 %vm585_vm1, %v908_v18  ;;  %v364_v41 = vmul.f32 %v3306_v53, %v348_v34  ;;  %v443_v16 = vmul.f32 %v3309_v56, %v365_v3 }
  0xed   : > { %2336 = vperm.xlu2 %3149, %v3109_v21   ;;  %v3111_v21 = vld [vmem:[%s3225_s10 + $0x46] sm:$0xff] }
  0xee   : > { %2095 = vperm.xlu1 %3148, %v3069_v22   ;;  %1849 = vperm.xlu0 %3147, %v3028_v23   ;;  %v442_v60 = vmul.f32 %v3311_v58, %v364_v41  ;;  %v3592_v58 = vmul.f32 %v3306_v53, %v820_v61  ;;  %v3071_v22 = vld [vmem:[%s3225_s10 + $0x4d] sm:$0xff] }
  0xef   : > { %v3548_v26 = vpop.permute.xlu2 %1337  ;;  %v3112_v41 = vld [vmem:[%s3225_s10 + $0x4e] sm:$0xff] }
  0xf0   : > { %v3550_v51 = vpop.permute.xlu1 %1106  ;;  %v1102_v29 = vpop.permute.xlu0 %1101  ;;  %v911_v18 = vmul.f32 %v3470_v31, %v3592_v58  ;;  %v321_v31 = vld [vmem:[%s3290_s15 + $0x48] sm:$0xff] }
  0xf1   : > { %v1152_v19 = vmul.f32 %v1102_v29, %v3487_v20  ;;  %v2856_v20 = vld [vmem:[%s3290_s15 + $0x52] sm:$0xff]  ;;  %v1305_v29 = vadd.f32 %v3296_v48, %v2929_v24  ;;  %v351_v38 = vadd.f32 %v3296_v48, %v321_v31 }
  0xf3   : > { %2916 = vmatmul.msk.f32.gmra.mxu3 %vm585_vm1, %v1150_v39  ;;  %v1318_v54 = vmul.f32 %v3306_v53, %v1305_v29 }
  0xf4   : > { %2838 = vmatmul.msk.f32.gmra.mxu1 %vm585_vm1, %v441_v33  ;;  %2880 = vmatmul.msk.f32.gmra.mxu2 %vm585_vm1, %v909_v35 }
  0xf5   : > { %2100 = vperm.xlu2 %3149, %v3070_v63   ;;  %v822_v63 = vadd.f32 %v3296_v48, %v2856_v20 }
  0xf6   : > { %1854 = vperm.xlu1 %3148, %v3029_v45   ;;  %1603 = vperm.xlu0 %3147, %v3480_v8   ;;  %v1151_v8 = vmul.f32 %v3448_v14, %v3464_v28  ;;  %v320_v14 = vld [vmem:[%s3290_s15 + $0x40] sm:$0xff]  ;;  %v2855_v28 = vld [vmem:[%s3290_s15 + $0x4a] sm:$0xff] }
  0xf7   : > { %v3570_v10 = vpop.permute.xlu2 %1352  ;;  %v350_v13 = vadd.f32 %v3296_v48, %v320_v14  ;;  %v821_v17 = vadd.f32 %v3296_v48, %v2855_v28  ;;  %v3649_v59 = vmul.f32 %v3306_v53, %v822_v63  ;;  %v2932_v63 = vld [vmem:[%s3290_s15 + $0x2b] sm:$0xff] }
  0xf8   : > { %v3572_v55 = vpop.permute.xlu1 %1121  ;;  %v3574_v57 = vpop.permute.xlu0 %1116 }
  0xf9   : > { %v366_v56 = vmul.f32 %v3306_v53, %v350_v13  ;;  %v3619_v37 = vmul.f32 %v3306_v53, %v821_v17  ;;  %v1154_v13 = vmul.f32 %v3468_v30, %v3543_v15  ;;  %v3032_v17 = vld [vmem:[%s3225_s10 + $0x5c] sm:$0xff] }
  0xfa   : > { %v323_v30 = vld [vmem:[%s3290_s15 + $0x58] sm:$0xff]  ;;  %v2858_v15 = vld [vmem:[%s3290_s15 + $0x62] sm:$0xff] }
  0xfb   : > { %2917 = vmatmul.msk.f32.gmra.mxu3 %vm585_vm1, %v1151_v8  ;;  %v444_v35 = vmul.f32 %v3277_v43, %v366_v56  ;;  %v912_v39 = vmul.f32 %v3399_v27, %v3619_v37  ;;  %v3031_v43 = vld [vmem:[%s3225_s10 + $0x54] sm:$0xff]  ;;  %v367_v27 = vmul.f32 %v3306_v53, %v351_v38  ;;  %v1396_v8 = vmul.f32 %v3548_v26, %v1318_v54 }
  0xfc   : > { %2839 = vmatmul.msk.f32.gmra.mxu1 %vm585_vm1, %v442_v60  ;;  %2881 = vmatmul.msk.f32.gmra.mxu2 %vm585_vm1, %v910_v62  ;;  %v2857_v60 = vld [vmem:[%s3290_s15 + $0x5a] sm:$0xff]  ;;  %v353_v31 = vadd.f32 %v3296_v48, %v323_v30  ;;  %v824_v29 = vadd.f32 %v3296_v48, %v2858_v15  ;;  %v1157_v15 = vmul.f32 %v3492_v40, %v3619_v37 }
  0xfd   : > { %1859 = vperm.xlu2 %3149, %v3584_v50   ;;  %v445_v14 = vmul.f32 %v3322_v1, %v367_v27  ;;  %v823_v28 = vadd.f32 %v3296_v48, %v2857_v60  ;;  %v3113_v38 = vld [vmem:[%s3225_s10 + $0x56] sm:$0xff] }
  0xfe   : > { %1608 = vperm.xlu1 %3148, %v3028_v23   ;;  %2341 = vperm.xlu0 %3147, %v3110_v2   ;;  %v1317_v23 = vmul.f32 %v3306_v53, %v1304_v11  ;;  %v913_v11 = vmul.f32 %v3496_v49, %v3649_v59  ;;  %v2931_v49 = vld [vmem:[%s3290_s15 + $0x23] sm:$0xff] }
  0xff   : > { %v3598_v4 = vpop.permute.xlu2 %1367  ;;  %v2971_v37 = vld [vmem:[%s3290_s15 + $0x1c] sm:$0xff] }
 0x100   : > { %v3600_v7 = vpop.permute.xlu1 %1136  ;;  %v3602_v9 = vpop.permute.xlu0 %1131 }
 0x103   : > { %2918 = vmatmul.msk.f32.gmra.mxu3 %vm585_vm1, %v1152_v19  ;;  %v3678_v19 = vmul.f32 %v3306_v53, %v823_v28  ;;  %v2933_v28 = vld [vmem:[%s3290_s15 + $0x33] sm:$0xff] }
 0x104   : > { %2840 = vmatmul.msk.f32.gmra.mxu1 %vm585_vm1, %v443_v16  ;;  %2882 = vmatmul.msk.f32.gmra.mxu2 %vm585_vm1, %v911_v18  ;;  %v3073_v16 = vld [vmem:[%s3225_s10 + $0x5d] sm:$0xff] }
 0x105   : > { %1613 = vperm.xlu2 %3149, %v3029_v45   ;;  %v1153_v45 = vmul.f32 %v3550_v51, %v3519_v5  ;;  %v2930_v5 = vld [vmem:[%s3290_s15 + $0x1b] sm:$0xff]  ;;  %v322_v51 = vld [vmem:[%s3290_s15 + $0x50] sm:$0xff] }
 0x106   : > { %2346 = vperm.xlu1 %3148, %v3111_v21   ;;  %2105 = vperm.xlu0 %3147, %v3071_v22   ;;  %v1306_v3 = vadd.f32 %v3296_v48, %v2930_v5  ;;  %v352_v32 = vadd.f32 %v3296_v48, %v322_v51 }
 0x107   : > { %v3624_v42 = vpop.permute.xlu2 %1382 }
 0x108   : > { %v3626_v25 = vpop.permute.xlu1 %1332  ;;  %v3630_v34 = vpop.permute.xlu0 %1146  ;;  %v1319_v1 = vmul.f32 %v3306_v53, %v1306_v3  ;;  %v368_v18 = vmul.f32 %v3306_v53, %v352_v32  ;;  %v3114_v3 = vld [vmem:[%s3225_s10 + $0x5e] sm:$0xff] }
 0x109   : > { %v1395_v33 = vmul.f32 %v3626_v25, %v1317_v23  ;;  %v1307_v23 = vadd.f32 %v3296_v48, %v2931_v49  ;;  %v3074_v32 = vld [vmem:[%s3225_s10 + $0x65] sm:$0xff] }
 0x10a   : > { %v446_v20 = vmul.f32 %v3320_v0, %v368_v18 }
 0x10b   : > { %2956 = vmatmul.msk.f32.vlgmr.msrb.gmra.mxu0 %vm585_vm1, %v1395_v33  ;;  %2919 = vmatmul.msk.f32.gmra.mxu3 %vm585_vm1, %v1153_v45  ;;  %v1155_v33 = vmul.f32 %v3574_v57, %v3565_v36  ;;  %v1320_v0 = vmul.f32 %v3306_v53, %v1307_v23  ;;  %v324_v36 = vld [vmem:[%s3290_s15 + $0x60] sm:$0xff]  ;;  %v3010_v57 = vld [vmem:[%s3290_s15 + $0x14] sm:$0xff] }
 0x10c   : > { %2841 = vmatmul.msk.f32.gmra.mxu1 %vm585_vm1, %v444_v35  ;;  %2883 = vmatmul.msk.f32.gmra.mxu2 %vm585_vm1, %v912_v39  ;;  %v3699_v35 = vld [vmem:[%s3225_s10 + $0x64] sm:$0xff]  ;;  %v369_v39 = vmul.f32 %v3306_v53, %v353_v31  ;;  %v354_v51 = vadd.f32 %v3296_v48, %v324_v36  ;;  %v1796_v60 = vadd.f32 %v3296_v48, %v3010_v57  ;;  %v3034_v31 = vld [vmem:[%s3225_s10 + $0x6c] sm:$0xff]  ;;  %v3076_v57 = vld [vmem:[%s3225_s10 + $0x75] sm:$0xff] }
 0x10d   : > { %2351 = vperm.xlu2 %3149, %v3112_v41   ;;  %v3115_v23 = vld [vmem:[%s3225_s10 + $0x66] sm:$0xff]  ;;  %v1552_v36 = vadd.f32 %v3296_v48, %v2971_v37 }
 0x10e   : > { %2110 = vperm.xlu1 %3148, %v3072_v6   ;;  %1864 = vperm.xlu0 %3147, %v3031_v43   ;;  %v1308_v6 = vadd.f32 %v3296_v48, %v2932_v63  ;;  %v447_v5 = vmul.f32 %v3279_v44, %v369_v39  ;;  %v1158_v63 = vmul.f32 %v3602_v9, %v3649_v59 }
 0x10f   : > { %v3654_v61 = vpop.permute.xlu2 %1578  ;;  %v3750_v49 = vpop.f32.mrf.mxu1 }
 0x110   : > { %v3656_v62 = vpop.permute.xlu1 %1347  ;;  %v3659_v2 = vpop.permute.xlu0 %1342  ;;  %v1321_v44 = vmul.f32 %v3306_v53, %v1308_v6  ;;  %v3035_v6 = vld [vmem:[%s3225_s10 + $0x74] sm:$0xff] }
 0x111   : > { %v1397_v56 = vmul.f32 %v3659_v2, %v1319_v1  ;;  %v1398_v54 = vmul.f32 %v3656_v62, %v1320_v0 }
 0x113   : > { %2957 = vmatmul.msk.f32.gmra.mxu0 %vm585_vm1, %v1396_v8  ;;  %2920 = vmatmul.msk.f32.gmra.mxu3 %vm585_vm1, %v1154_v13  ;;  %v1156_v8 = vmul.f32 %v3572_v55, %v3592_v58  ;;  %v2969_v55 = vld [vmem:[%s3290_s15 + $0xc] sm:$0xff]  ;;  %v1399_v13 = vmul.f32 %v3570_v10, %v1321_v44 }
 0x114   : > { %2842 = vmatmul.msk.f32.gmra.mxu1 %vm585_vm1, %v445_v14  ;;  %2884 = vmatmul.msk.f32.gmra.mxu2 %vm585_vm1, %v913_v11  ;;  %v370_v14 = vmul.f32 %v3306_v53, %v354_v51  ;;  %v1565_v51 = vmul.f32 %v3306_v53, %v1552_v36 }
 0x115   : > { %2115 = vperm.xlu2 %3149, %v3073_v16   ;;  %v1309_v16 = vadd.f32 %v3296_v48, %v2933_v28 }
 0x116   : > { %1869 = vperm.xlu1 %3148, %v3032_v17   ;;  %1618 = vperm.xlu0 %3147, %v3584_v50   ;;  %v914_v50 = vmul.f32 %v3494_v47, %v3678_v19  ;;  %v3708_v47 = vmul.f32 %v3306_v53, %v824_v29  ;;  %v448_v18 = vmul.f32 %v3333_v12, %v370_v14 }
 0x117   : > { %v1825_v21 = vpop.permute.xlu2 %1824  ;;  %v1322_v12 = vmul.f32 %v3306_v53, %v1309_v16  ;;  %v1159_v14 = vmul.f32 %v3600_v7, %v3678_v19  ;;  %v2936_v16 = vld [vmem:[%s3290_s15 + $0x4b] sm:$0xff] }
 0x118   : > { %v3684_v22 = vpop.permute.xlu1 %1362  ;;  %v3688_v24 = vpop.permute.xlu0 %1357  ;;  %v2899_v19 = vld [vmem:[%s3290_s15 + $0x6a] sm:$0xff] }
 0x11b   : > { %2958 = vmatmul.msk.f32.gmra.mxu0 %vm585_vm1, %v1397_v56  ;;  %2921 = vmatmul.msk.f32.gmra.mxu3 %vm585_vm1, %v1155_v33  ;;  %v3075_v56 = vld [vmem:[%s3225_s10 + $0x6d] sm:$0xff] }
 0x11c   : > { %2843 = vmatmul.msk.f32.gmra.mxu1 %vm585_vm1, %v446_v20  ;;  %2885 = vmatmul.msk.f32.gmra.mxu2 %vm585_vm1, %v914_v50  ;;  %v1400_v50 = vmul.f32 %v3688_v24, %v1322_v12 }
 0x11d   : > { %1874 = vperm.xlu2 %3149, %v3699_v35  }
 0x11e   : > { %1623 = vperm.xlu1 %3148, %v3031_v43   ;;  %2356 = vperm.xlu0 %3147, %v3113_v38   ;;  %v915_v43 = vmul.f32 %v3424_v52, %v3708_v47  ;;  %v1809_v52 = vmul.f32 %v3306_v53, %v1796_v60 }
 0x11f   : > { %v3714_v45 = vpop.permute.xlu2 %2075 }
 0x120   : > { %v3716_v41 = vpop.permute.xlu1 %1377  ;;  %v3720_v27 = vpop.permute.xlu0 %1372  ;;  %v1887_v30 = vmul.f32 %v1825_v21, %v1809_v52  ;;  %v2934_v21 = vld [vmem:[%s3290_s15 + $0x3b] sm:$0xff] }
 0x121   : > { %v1310_v29 = vadd.f32 %v3296_v48, %v2934_v21  ;;  %v1070_v21 = vadd.f32 %v3296_v48, %v2899_v19 }
 0x123   : > { %2959 = vmatmul.msk.f32.gmra.mxu0 %vm585_vm1, %v1398_v54  ;;  %2922 = vmatmul.msk.f32.gmra.mxu3 %vm585_vm1, %v1156_v8  ;;  %v1323_v54 = vmul.f32 %v3306_v53, %v1310_v29  ;;  %v3821_v29 = vpop.f32.mrf.mxu0 }
 0x124   : > { %2844 = vmatmul.msk.f32.gmra.mxu1 %vm585_vm1, %v447_v5  ;;  %2886 = vmatmul.msk.f32.gmra.mxu2 %vm585_vm1, %v915_v43  ;;  %v3012_v5 = vld [vmem:[%s3290_s15 + $0x24] sm:$0xff] }
 0x125   : > { %1628 = vperm.xlu2 %3149, %v3032_v17   ;;  %v1550_v17 = vadd.f32 %v3296_v48, %v2969_v55  ;;  %v1401_v43 = vmul.f32 %v3684_v22, %v1323_v54  ;;  %v3116_v55 = vld [vmem:[%s3225_s10 + $0x6e] sm:$0xff] }
 0x126   : > { %2361 = vperm.xlu1 %3148, %v3114_v3   ;;  %2120 = vperm.xlu0 %3147, %v3074_v32   ;;  %v1798_v3 = vadd.f32 %v3296_v48, %v3012_v5 }
 0x127   : > { %v3740_v58 = vpop.permute.xlu2 %2080  ;;  %v1563_v20 = vmul.f32 %v3306_v53, %v1550_v17 }
 0x128   : > { %v3742_v11 = vpop.permute.xlu1 %1392  ;;  %v3746_v1 = vpop.permute.xlu0 %1387 }
 0x129   : > { %v1641_v38 = vmul.f32 %v3654_v61, %v1563_v20  ;;  %v2935_v61 = vld [vmem:[%s3290_s15 + $0x43] sm:$0xff] }
 0x12a   : > { %v1311_v59 = vadd.f32 %v3296_v48, %v2935_v61 }
 0x12b   : > { %2960 = vmatmul.msk.f32.gmra.mxu0 %vm585_vm1, %v1399_v13  ;;  %2923 = vmatmul.msk.f32.gmra.mxu3 %vm585_vm1, %v1157_v15  ;;  %v1312_v15 = vadd.f32 %v3296_v48, %v2936_v16 }
 0x12c   : > { %2845 = vmatmul.msk.f32.gmra.mxu1 %vm585_vm1, %v448_v18  ;;  %3038 = vmatmul.msk.f32.vlgmr.msra.gmra.mxu2 %vm585_vm1, %v1887_v30  ;;  %v1324_v13 = vmul.f32 %v3306_v53, %v1311_v59  ;;  %v2973_v18 = vld [vmem:[%s3290_s15 + $0x2c] sm:$0xff] }
 0x12d   : > { %2366 = vperm.xlu2 %3149, %v3115_v23   ;;  %v1554_v37 = vadd.f32 %v3296_v48, %v2973_v18 }
 0x12e   : > { %2125 = vperm.xlu1 %3148, %v3075_v56   ;;  %1879 = vperm.xlu0 %3147, %v3034_v31   ;;  %v1402_v30 = vmul.f32 %v3598_v4, %v1324_v13  ;;  %v3052_v13 = vld [vmem:[%s3290_s15 + $0x1d] sm:$0xff] }
 0x12f   : > { %v3768_v0 = vpop.permute.xlu2 %2085 }
 0x130   : > { %v1589_v40 = vpop.permute.xlu1 %1588  ;;  %v1584_v33 = vpop.permute.xlu0 %1583 }
 0x131   : > { %v3770_v39 = vpop.f32.mrf.mxu1  ;;  %v1642_v32 = vmul.f32 %v1809_v52, %v1584_v33  ;;  %v1811_v52 = vmul.f32 %v3306_v53, %v1798_v3  ;;  %v1643_v12 = vmul.f32 %v1589_v40, %v1565_v51  ;;  %v1325_v40 = vmul.f32 %v3306_v53, %v1312_v15 }
 0x133   : > { %2961 = vmatmul.msk.f32.gmra.mxu0 %vm585_vm1, %v1400_v50  ;;  %2924 = vmatmul.msk.f32.gmra.mxu3 %vm585_vm1, %v1158_v63  ;;  %v2937_v50 = vld [vmem:[%s3290_s15 + $0x53] sm:$0xff]  ;;  %v1403_v54 = vmul.f32 %v3720_v27, %v1325_v40  ;;  %v2939_v40 = vld [vmem:[%s3290_s15 + $0x63] sm:$0xff] }
 0x134   : > { %2997 = vmatmul.msk.f32.vlgmr.msra.gmra.mxu1 %vm585_vm1, %v1641_v38  ;;  %v1567_v38 = vmul.f32 %v3306_v53, %v1554_v37  ;;  %v3051_v63 = vld [vmem:[%s3290_s15 + $0x15] sm:$0xff] }
 0x135   : > { %2130 = vperm.xlu2 %3149, %v3076_v57   ;;  %v3836_v57 = vld [vmem:[%s4311_s5] ss:$0 sm:$0xff] }
 0x136   : > { %1884 = vperm.xlu1 %3148, %v3035_v6   ;;  %1633 = vperm.xlu0 %3147, %v3699_v35   ;;  %v3117_v35 = vld [vmem:[%s3225_s10 + $0x76] sm:$0xff]  ;;  %v1313_v6 = vadd.f32 %v3836_v57, %v2937_v50 }
 0x137   : > { %v3797_v28 = vpop.permute.xlu2 %1844 }
 0x138   : > { %v1830_v9 = vpop.permute.xlu1 %1829  ;;  %v3787_v8 = vpop.permute.xlu0 %2070 }
 0x139   : > { %v1888_v60 = vmul.f32 %v1830_v9, %v1565_v51  ;;  %v3790_v44 = vpop.f32.mrf.mxu1 }
 0x13b   : > { %2962 = vmatmul.msk.f32.gmra.mxu0 %vm585_vm1, %v1401_v43  ;;  %3039 = vmatmul.msk.f32.gmra.mxu2 %vm585_vm1, %v1888_v60  ;;  %v2042_v43 = vadd.f32 %v3836_v57, %v3051_v63  ;;  %v3854_v60 = vld [vmem:[%s4310_s4] ss:$0 sm:$0xff] }
 0x13c   : > { %2998 = vmatmul.msk.f32.gmra.mxu1 %vm585_vm1, %v1642_v32  ;;  %2925 = vmatmul.msk.f32.gmra.mxu3 %vm585_vm1, %v1159_v14  ;;  %v1326_v3 = vmul.f32 %v3854_v60, %v1313_v6  ;;  %v2938_v32 = vld [vmem:[%s3290_s15 + $0x5b] sm:$0xff]  ;;  %v3859_v14 = vpop.f32.mrf.mxu0  ;;  %v1315_v6 = vadd.f32 %v3836_v57, %v2939_v40 }
 0x13d   : > { %2376 = vperm.xlu2 %3149, %v3117_v35   ;;  %v2055_v35 = vmul.f32 %v3854_v60, %v2042_v43  ;;  %v1314_v18 = vadd.f32 %v3836_v57, %v2938_v32 }
 0x13e   : > { %1638 = vperm.xlu1 %3148, %v3034_v31   ;;  %2371 = vperm.xlu0 %3147, %v3116_v55   ;;  %v1160_v31 = vmul.f32 %v3523_v46, %v3708_v47  ;;  %v1083_v46 = vmul.f32 %v3306_v53, %v1070_v21  ;;  %v3014_v47 = vld [vmem:[%s3290_s15 + $0x34] sm:$0xff]  ;;  %v3843_v51 = vpop.f32.mrf.mxu3 }
 0x13f   : > { %v3805_v7 = vpop.f32.mrf.mxu2  ;;  %v1599_v33 = vpop.permute.xlu2 %1598  ;;  %v1800_v53 = vadd.f32 %v3836_v57, %v3014_v47  ;;  %v2133_v21 = vmul.f32 %v3787_v8, %v2055_v35  ;;  %v3053_v47 = vld [vmem:[%s3290_s15 + $0x25] sm:$0xff] }
 0x140   : > { %v1835_v17 = vpop.permute.xlu1 %1834  ;;  %v3811_v56 = vpop.permute.xlu0 %2316  ;;  %v1161_v59 = vmul.f32 %v3630_v34, %v1083_v46  ;;  %v3015_v46 = vld [vmem:[%s3290_s15 + $0x3c] sm:$0xff]  ;;  %v2044_v32 = vadd.f32 %v3836_v57, %v3053_v47 }
 0x141   : > { %v1889_v23 = vmul.f32 %v1835_v17, %v1811_v52  ;;  %v3813_v20 = vpop.f32.mrf.mxu1  ;;  %v3862_v34 = vmul.f32 %v3854_v60, %v1800_v53  ;;  %v1404_v17 = vmul.f32 %v3716_v41, %v1326_v3  ;;  %v1801_v43 = vadd.f32 %v3836_v57, %v3015_v46 }
 0x143   : > { %2963 = vmatmul.msk.f32.gmra.mxu0 %vm585_vm1, %v1402_v30  ;;  %3040 = vmatmul.msk.f32.gmra.mxu2 %vm585_vm1, %v1889_v23  ;;  %v1891_v23 = vmul.f32 %v3797_v28, %v3862_v34 }
 0x144   : > { %2999 = vmatmul.msk.f32.gmra.mxu1 %vm585_vm1, %v1643_v12  ;;  %2926 = vmatmul.msk.f32.gmra.mxu3 %vm585_vm1, %v1160_v31  ;;  %v2043_v31 = vadd.f32 %v3836_v57, %v3052_v13  ;;  %v652_v63 = vpop.f32.mrf.mxu0  ;;  %v2940_v13 = vld [vmem:[%s3290_s15 + $0x6b] sm:$0xff] }
 0x146   : > { %v3882_v37 = vpop.f32.mrf.mxu3  ;;  %v2056_v28 = vmul.f32 %v3854_v60, %v2043_v31 }
 0x147   : > { %v3830_v48 = vpop.f32.mrf.mxu2  ;;  %v3868_v16 = vpop.permute.xlu2 %2336 }
 0x148   : > { %v1840_v36 = vpop.permute.xlu1 %1839  ;;  %v3840_v5 = vpop.permute.xlu0 %2321  ;;  %v2134_v3 = vmul.f32 %v3714_v45, %v2056_v28  ;;  %v2057_v45 = vmul.f32 %v3854_v60, %v2044_v32  ;;  %v3017_v32 = vld [vmem:[%s3290_s15 + $0x4c] sm:$0xff] }
 0x149   : > { %v1890_v61 = vmul.f32 %v1840_v36, %v1567_v38  ;;  %v3845_v9 = vpop.f32.mrf.mxu1 }
 0x14a   : > { %v2135_v47 = vmul.f32 %v3740_v58, %v2057_v45  ;;  %v3055_v45 = vld [vmem:[%s3290_s15 + $0x35] sm:$0xff] }
 0x14b   : > { %2964 = vmatmul.msk.f32.gmra.mxu0 %vm585_vm1, %v1403_v54  ;;  %3041 = vmatmul.msk.f32.gmra.mxu2 %vm585_vm1, %v1890_v61  ;;  %v1645_v54 = vmul.f32 %v1599_v33, %v1567_v38  ;;  %v1328_v33 = vmul.f32 %v3854_v60, %v1315_v6 }
 0x14c   : > { %2927 = vmatmul.msk.f32.gmra.mxu3 %vm585_vm1, %v1161_v59  ;;  %v655_v28 = vpop.f32.mrf.mxu0 }
 0x14f   : > { %v3865_v55 = vpop.f32.mrf.mxu2  ;;  %v3897_v53 = vpop.permute.xlu2 %2100 }
 0x150   : > { %v1594_v19 = vpop.permute.xlu1 %1593  ;;  %v3872_v15 = vpop.permute.xlu0 %2326 }
 0x151   : > { %v1644_v30 = vmul.f32 %v1811_v52, %v1594_v19  ;;  %v3876_v12 = vpop.f32.mrf.mxu1  ;;  %v1327_v52 = vmul.f32 %v3854_v60, %v1314_v18  ;;  %v3909_v19 = vpop.f32.mrf.mxu3  ;;  %v1814_v18 = vmul.f32 %v3854_v60, %v1801_v43 }
 0x153   : > { %2965 = vmatmul.msk.f32.gmra.mxu0 %vm585_vm1, %v1404_v17  ;;  %3000 = vmatmul.msk.f32.gmra.mxu1 %vm585_vm1, %v1644_v30  ;;  %v1405_v36 = vmul.f32 %v3624_v42, %v1327_v52  ;;  %v3054_v30 = vld [vmem:[%s3290_s15 + $0x2d] sm:$0xff]  ;;  %v1406_v52 = vmul.f32 %v3746_v1, %v1328_v33 }
 0x154   : > { %3042 = vmatmul.msk.f32.gmra.mxu2 %vm585_vm1, %v1891_v23  ;;  %3079 = vmatmul.msk.f32.vlgmr.msra.gmra.mxu3 %vm585_vm1, %v2133_v21  ;;  %v2976_v23 = vld [vmem:[%s3290_s15 + $0x44] sm:$0xff]  ;;  %v1316_v21 = vadd.f32 %v3836_v57, %v2940_v13 }
 0x157   : > { %v983_v50 = vpop.f32.mrf.mxu2 }
 0x158   : > { %v3891_v8 = vpop.permute.xlu1 %2331  ;;  %v3895_v61 = vpop.permute.xlu0 %2090 }
 0x159   : > { %v750_v59 = vpop.f32.mrf.mxu1  ;;  %v3932_v13 = vpop.f32.mrf.mxu3 }
 0x15a   : > { %v751_v35 = vadd.f32 %v750_v59, %v652_v63  ;;  %v2045_v63 = vadd.f32 %v3836_v57, %v3054_v30  ;;  %v1329_v59 = vmul.f32 %v3854_v60, %v1316_v21 }
 0x15b   : > { %2966 = vmatmul.msk.f32.gmra.mxu0 %vm585_vm1, %v1405_v36  ;;  %3001 = vmatmul.msk.f32.gmra.mxu1 %vm585_vm1, %v1645_v54  ;;  %v1557_v36 = vadd.f32 %v3836_v57, %v2976_v23  ;;  %v1860_v54 = vpop.permute.xlu2 %1859 }
 0x15c   : > { %3080 = vmatmul.msk.f32.gmra.mxu3 %vm585_vm1, %v2134_v3  ;;  %v3906_v38 = vadd.f32 %v983_v50, %v751_v35  ;;  %v3092_v3 = vld [vmem:[%s3290_s15 + $0x16] sm:$0xff]  ;;  %v2058_v58 = vmul.f32 %v3854_v60, %v2045_v63  ;;  %v1407_v23 = vmul.f32 %v3742_v11, %v1329_v59 }
 0x15d   : > { %v1570_v35 = vmul.f32 %v3854_v60, %v1557_v36  ;;  %v2288_v21 = vadd.f32 %v3836_v57, %v3092_v3 }
 0x15f   : > { %v986_v17 = vpop.f32.mrf.mxu2  ;;  %v2301_v36 = vmul.f32 %v3854_v60, %v2288_v21 }
 0x160   : > { %v3915_v31 = vpop.permute.xlu1 %2095  ;;  %v1850_v40 = vpop.permute.xlu0 %1849 }
 0x161   : > { %v1892_v50 = vmul.f32 %v1850_v40, %v1814_v18  ;;  %v753_v46 = vpop.f32.mrf.mxu1 }
 0x162   : > { %v754_v6 = vadd.f32 %v753_v46, %v655_v28  ;;  %v2136_v46 = vmul.f32 %v3768_v0, %v2058_v58  ;;  %v3056_v58 = vld [vmem:[%s3290_s15 + $0x3d] sm:$0xff] }
 0x163   : > { %2967 = vmatmul.msk.f32.gmra.mxu0 %vm585_vm1, %v1406_v52  ;;  %3043 = vmatmul.msk.f32.gmra.mxu2 %vm585_vm1, %v1892_v50  ;;  %v1614_v0 = vpop.permute.xlu2 %1613 }
 0x164   : > { %3081 = vmatmul.msk.f32.gmra.mxu3 %vm585_vm1, %v2135_v47  ;;  %v3926_v43 = vadd.f32 %v986_v17, %v754_v6  ;;  %v1803_v17 = vadd.f32 %v3836_v57, %v3017_v32  ;;  %v2046_v47 = vadd.f32 %v3836_v57, %v3055_v45  ;;  %v2379_v45 = vmul.f32 %v3811_v56, %v2301_v36 }
 0x166   : > { %v3951_v59 = vmul.f32 %v3854_v60, %v1803_v17  ;;  %v2059_v3 = vmul.f32 %v3854_v60, %v2046_v47  ;;  %v3018_v47 = vld [vmem:[%s3290_s15 + $0x54] sm:$0xff] }
 0x167   : > { %v989_v33 = vpop.f32.mrf.mxu2 }
 0x168   : > { %v1855_v30 = vpop.permute.xlu1 %1854  ;;  %v1604_v40 = vpop.permute.xlu0 %1603  ;;  %v2137_v17 = vmul.f32 %v3895_v61, %v2059_v3 }
 0x169   : > { %v1893_v52 = vmul.f32 %v1855_v30, %v1570_v35  ;;  %v1646_v28 = vmul.f32 %v3862_v34, %v1604_v40  ;;  %v756_v50 = vpop.f32.mrf.mxu1  ;;  %v3093_v34 = vld [vmem:[%s3290_s15 + $0x1e] sm:$0xff] }
 0x16a   : > { %v757_v63 = vadd.f32 %v756_v50, %v3750_v49  ;;  %v2289_v30 = vadd.f32 %v3836_v57, %v3093_v34 }
 0x16b   : > { %2968 = vmatmul.msk.f32.gmra.mxu0 %vm585_vm1, %v1407_v23  ;;  %3002 = vmatmul.msk.f32.gmra.mxu1 %vm585_vm1, %v1646_v28  ;;  %v2047_v28 = vadd.f32 %v3836_v57, %v3056_v58  ;;  %v3976_v36 = vpop.permute.xlu2 %2351 }
 0x16c   : > { %3044 = vmatmul.msk.f32.gmra.mxu2 %vm585_vm1, %v1893_v52  ;;  %3082 = vmatmul.msk.f32.gmra.mxu3 %vm585_vm1, %v2136_v46  ;;  %v3947_v6 = vadd.f32 %v989_v33, %v757_v63  ;;  %v1894_v33 = vmul.f32 %v1860_v54, %v3951_v59  ;;  %v2302_v56 = vmul.f32 %v3854_v60, %v2289_v30  ;;  %v3057_v63 = vld [vmem:[%s3290_s15 + $0x45] sm:$0xff] }
 0x16d   : > { %v2060_v46 = vmul.f32 %v3854_v60, %v2047_v28 }
 0x16e   : > { %v3955_v32 = vpop.f32.mrf.mxu3  ;;  %v2380_v34 = vmul.f32 %v3840_v5, %v2302_v56 }
 0x16f   : > { %v992_v49 = vpop.f32.mrf.mxu2 }
 0x170   : > { %v1609_v23 = vpop.permute.xlu1 %1608  ;;  %v3959_v21 = vpop.permute.xlu0 %2341 }
 0x171   : > { %v1647_v52 = vmul.f32 %v1814_v18, %v1609_v23  ;;  %v759_v40 = vpop.f32.mrf.mxu1  ;;  %v3094_v18 = vld [vmem:[%s3290_s15 + $0x26] sm:$0xff]  ;;  %v1804_v23 = vadd.f32 %v3836_v57, %v3018_v47  ;;  %v2979_v47 = vld [vmem:[%s3290_s15 + $0x5c] sm:$0xff] }
 0x172   : > { %v760_v50 = vadd.f32 %v759_v40, %v3770_v39  ;;  %v2290_v3 = vadd.f32 %v3836_v57, %v3094_v18 }
 0x173   : > { %3120 = vmatmul.msk.f32.vlgmr.msra.gmra.mxu0 %vm585_vm1, %v2379_v45  ;;  %3003 = vmatmul.msk.f32.gmra.mxu1 %vm585_vm1, %v1647_v52  ;;  %v2138_v52 = vmul.f32 %v3915_v31, %v2060_v46 }
 0x174   : > { %3045 = vmatmul.msk.f32.gmra.mxu2 %vm585_vm1, %v1894_v33  ;;  %3083 = vmatmul.msk.f32.gmra.mxu3 %vm585_vm1, %v2137_v17  ;;  %v3970_v54 = vadd.f32 %v992_v49, %v760_v50  ;;  %v1648_v49 = vmul.f32 %v1614_v0, %v1570_v35  ;;  %v2048_v33 = vadd.f32 %v3836_v57, %v3057_v63  ;;  %v3095_v35 = vld [vmem:[%s3290_s15 + $0x2e] sm:$0xff] }
 0x175   : > { %v2303_v5 = vmul.f32 %v3854_v60, %v2290_v3  ;;  %v3996_v0 = vmul.f32 %v3854_v60, %v1804_v23  ;;  %v3058_v50 = vld [vmem:[%s3290_s15 + $0x4d] sm:$0xff]  ;;  %v2291_v18 = vadd.f32 %v3836_v57, %v3095_v35 }
 0x176   : > { %v3978_v39 = vpop.f32.mrf.mxu3  ;;  %v2061_v28 = vmul.f32 %v3854_v60, %v2048_v33  ;;  %v1560_v33 = vadd.f32 %v3836_v57, %v2979_v47 }
 0x177   : > { %v995_v61 = vpop.f32.mrf.mxu2 }
 0x178   : > { %v3982_v58 = vpop.permute.xlu1 %2346  ;;  %v2106_v45 = vpop.permute.xlu0 %2105 }
 0x179   : > { %v762_v30 = vpop.f32.mrf.mxu1 }
 0x17a   : > { %v763_v40 = vadd.f32 %v762_v30, %v3790_v44  ;;  %v2381_v44 = vmul.f32 %v3872_v15, %v2303_v5  ;;  %v2139_v30 = vmul.f32 %v3897_v53, %v2061_v28  ;;  %v4012_v15 = vpop.permute.xlu2 %2115  ;;  %v3059_v28 = vld [vmem:[%s3290_s15 + $0x55] sm:$0xff] }
 0x17b   : > { %3121 = vmatmul.msk.f32.gmra.mxu0 %vm585_vm1, %v2380_v34  ;;  %3004 = vmatmul.msk.f32.gmra.mxu1 %vm585_vm1, %v1648_v49  ;;  %v745_v49 = vadd.f32 %v3845_v9, %v3821_v29  ;;  %v3096_v9 = vld [vmem:[%s3290_s15 + $0x36] sm:$0xff] }
 0x17c   : > { %3084 = vmatmul.msk.f32.gmra.mxu3 %vm585_vm1, %v2138_v52  ;;  %v3992_v17 = vadd.f32 %v995_v61, %v763_v40  ;;  %v2304_v52 = vmul.f32 %v3854_v60, %v2291_v18  ;;  %v3020_v40 = vld [vmem:[%s3290_s15 + $0x64] sm:$0xff] }
 0x17d   : > { %v1016_v53 = vadd.f32 %v3830_v48, %v745_v49 }
 0x17e   : > { %v1229_v56 = vpop.f32.mrf.mxu3 }
 0x17f   : > { %v998_v31 = vpop.f32.mrf.mxu2  ;;  %v4003_v46 = vadd.f32 %v1229_v56, %v3906_v38  ;;  %v2049_v38 = vadd.f32 %v3836_v57, %v3058_v50  ;;  %v2292_v56 = vadd.f32 %v3836_v57, %v3096_v9  ;;  %v1262_v18 = vadd.f32 %v3955_v32, %v1016_v53  ;;  %v3060_v53 = vld [vmem:[%s3290_s15 + $0x5d] sm:$0xff] }
 0x180   : > { %v4006_v61 = vpop.permute.xlu1 %2110  ;;  %v1865_v63 = vpop.permute.xlu0 %1864  ;;  %v2050_v32 = vadd.f32 %v3836_v57, %v3059_v28 }
 0x181   : > { %v1895_v34 = vmul.f32 %v1865_v63, %v3996_v0  ;;  %v765_v3 = vpop.f32.mrf.mxu1  ;;  %v2062_v5 = vmul.f32 %v3854_v60, %v2049_v38  ;;  %v748_v63 = vadd.f32 %v3876_v12, %v3859_v14  ;;  %v2305_v14 = vmul.f32 %v3854_v60, %v2292_v56 }
 0x182   : > { %v766_v23 = vadd.f32 %v765_v3, %v3813_v20  ;;  %v4028_v20 = vmul.f32 %v3854_v60, %v1560_v33  ;;  %v1875_v12 = vpop.permute.xlu2 %1874 }
 0x183   : > { %3122 = vmatmul.msk.f32.gmra.mxu0 %vm585_vm1, %v2381_v44  ;;  %3046 = vmatmul.msk.f32.gmra.mxu2 %vm585_vm1, %v1895_v34  ;;  %v2382_v44 = vmul.f32 %v3891_v8, %v2304_v52  ;;  %v1806_v34 = vadd.f32 %v3836_v57, %v3020_v40  ;;  %v2140_v8 = vmul.f32 %v2106_v45, %v2062_v5  ;;  %v3097_v45 = vld [vmem:[%s3290_s15 + $0x3e] sm:$0xff] }
 0x184   : > { %3085 = vmatmul.msk.f32.gmra.mxu3 %vm585_vm1, %v2139_v30  ;;  %v4021_v29 = vadd.f32 %v998_v31, %v766_v23  ;;  %v2063_v52 = vmul.f32 %v3854_v60, %v2050_v32  ;;  %v2383_v5 = vmul.f32 %v3868_v16, %v2305_v14  ;;  %v2293_v28 = vadd.f32 %v3836_v57, %v3097_v45 }
 0x185   : > { %v4055_v33 = vmul.f32 %v3854_v60, %v1806_v34  ;;  %v2051_v16 = vadd.f32 %v3836_v57, %v3060_v53 }
 0x186   : > { %v1232_v50 = vpop.f32.mrf.mxu3 }
 0x187   : > { %v1001_v35 = vpop.f32.mrf.mxu2  ;;  %v4035_v31 = vadd.f32 %v1232_v50, %v3926_v43 }
 0x188   : > { %v1870_v47 = vpop.permute.xlu1 %1869  ;;  %v1619_v48 = vpop.permute.xlu0 %1618 }
 0x189   : > { %v1896_v3 = vmul.f32 %v1870_v47, %v4028_v20  ;;  %v1649_v49 = vmul.f32 %v3951_v59, %v1619_v48  ;;  %v768_v30 = vpop.f32.mrf.mxu1  ;;  %v1469_v38 = vpop.f32.mrf.mxu0 }
 0x18a   : > { %v769_v43 = vadd.f32 %v768_v30, %v3805_v7  ;;  %v4044_v23 = vadd.f32 %v1469_v38, %v1262_v18  ;;  %v1017_v7 = vadd.f32 %v3865_v55, %v748_v63  ;;  %v1897_v55 = vmul.f32 %v1875_v12, %v4055_v33 }
 0x18b   : > { %3123 = vmatmul.msk.f32.gmra.mxu0 %vm585_vm1, %v2382_v44  ;;  %3005 = vmatmul.msk.f32.gmra.mxu1 %vm585_vm1, %v1649_v49  ;;  %v2141_v63 = vmul.f32 %v4006_v61, %v2063_v52  ;;  %v2064_v49 = vmul.f32 %v3854_v60, %v2051_v16  ;;  %v1629_v61 = vpop.permute.xlu2 %1628 }
 0x18c   : > { %3047 = vmatmul.msk.f32.gmra.mxu2 %vm585_vm1, %v1896_v3  ;;  %3086 = vmatmul.msk.f32.gmra.mxu3 %vm585_vm1, %v2140_v8  ;;  %v4051_v59 = vadd.f32 %v1001_v35, %v769_v43  ;;  %v1263_v50 = vadd.f32 %v3978_v39, %v1017_v7  ;;  %v3098_v3 = vld [vmem:[%s3290_s15 + $0x46] sm:$0xff]  ;;  %v1651_v7 = vmul.f32 %v1629_v61, %v4028_v20 }
 0x18d   : > { %v3061_v8 = vld [vmem:[%s3290_s15 + $0x65] sm:$0xff]  ;;  %v2294_v43 = vadd.f32 %v3836_v57, %v3098_v3 }
 0x18e   : > { %v1235_v40 = vpop.f32.mrf.mxu3 }
 0x18f   : > { %v1004_v9 = vpop.f32.mrf.mxu2  ;;  %v4064_v35 = vadd.f32 %v1235_v40, %v3947_v6  ;;  %v2142_v40 = vmul.f32 %v4012_v15, %v2064_v49  ;;  %v2307_v20 = vmul.f32 %v3854_v60, %v2294_v43  ;;  %v3100_v43 = vld [vmem:[%s3290_s15 + $0x56] sm:$0xff] }
 0x190   : > { %v1624_v56 = vpop.permute.xlu1 %1623  ;;  %v4066_v44 = vpop.permute.xlu0 %2356 }
 0x191   : > { %v1650_v18 = vmul.f32 %v3996_v0, %v1624_v56  ;;  %v771_v47 = vpop.f32.mrf.mxu1  ;;  %v1472_v48 = vpop.f32.mrf.mxu0  ;;  %v2306_v0 = vmul.f32 %v3854_v60, %v2293_v28 }
 0x192   : > { %v772_v39 = vadd.f32 %v771_v47, %v3843_v51  ;;  %v4073_v6 = vadd.f32 %v1472_v48, %v1263_v50  ;;  %v3021_v51 = vld [vmem:[%s3290_s15 + $0x6c] sm:$0xff]  ;;  %v2385_v48 = vmul.f32 %v3982_v58, %v2307_v20 }
 0x193   : > { %3124 = vmatmul.msk.f32.gmra.mxu0 %vm585_vm1, %v2383_v5  ;;  %3006 = vmatmul.msk.f32.gmra.mxu1 %vm585_vm1, %v1650_v18  ;;  %v2384_v32 = vmul.f32 %v3959_v21, %v2306_v0  ;;  %v1807_v53 = vadd.f32 %v3836_v57, %v3021_v51  ;;  %v2052_v21 = vadd.f32 %v3836_v57, %v3061_v8  ;;  %v3099_v50 = vld [vmem:[%s3290_s15 + $0x4e] sm:$0xff] }
 0x194   : > { %3048 = vmatmul.msk.f32.gmra.mxu2 %vm585_vm1, %v1897_v55  ;;  %3087 = vmatmul.msk.f32.gmra.mxu3 %vm585_vm1, %v2141_v63  ;;  %v4080_v34 = vadd.f32 %v1004_v9, %v772_v39  ;;  %v3022_v55 = vld [vmem:[%s3290_s15 + $0x74] sm:$0xff]  ;;  %v2295_v47 = vadd.f32 %v3836_v57, %v3099_v50 }
 0x195   : > { %v1820_v15 = vmul.f32 %v3854_v60, %v1807_v53  ;;  %v2065_v56 = vmul.f32 %v3854_v60, %v2052_v21  ;;  %v1808_v61 = vadd.f32 %v3836_v57, %v3022_v55 }
 0x196   : > { %v1238_v38 = vpop.f32.mrf.mxu3  ;;  %v2308_v58 = vmul.f32 %v3854_v60, %v2295_v47  ;;  %v3101_v47 = vld [vmem:[%s3290_s15 + $0x5e] sm:$0xff] }
 0x197   : > { %v1007_v30 = vpop.f32.mrf.mxu2  ;;  %v4089_v14 = vadd.f32 %v1238_v38, %v3970_v54 }
 0x198   : > { %v4091_v12 = vpop.permute.xlu1 %2361  ;;  %v2121_v45 = vpop.permute.xlu0 %2120 }
 0x199   : > { %v774_v52 = vpop.f32.mrf.mxu1  ;;  %v1475_v9 = vpop.f32.mrf.mxu0 }
 0x19a   : > { %v775_v5 = vadd.f32 %v774_v52, %v3882_v37  ;;  %v4099_v54 = vadd.f32 %v1475_v9, %v4003_v46  ;;  %v3062_v46 = vld [vmem:[%s3290_s15 + $0x6d] sm:$0xff]  ;;  %v2296_v9 = vadd.f32 %v3836_v57, %v3100_v43 }
 0x19b   : > { %3125 = vmatmul.msk.f32.gmra.mxu0 %vm585_vm1, %v2384_v32  ;;  %3007 = vmatmul.msk.f32.gmra.mxu1 %vm585_vm1, %v1651_v7  ;;  %v2053_v51 = vadd.f32 %v3836_v57, %v3062_v46  ;;  %v2367_v32 = vpop.permute.xlu2 %2366 }
 0x19c   : > { %3088 = vmatmul.msk.f32.gmra.mxu3 %vm585_vm1, %v2142_v40  ;;  %v4105_v28 = vadd.f32 %v1007_v30, %v775_v5  ;;  %v2143_v30 = vmul.f32 %v2121_v45, %v2065_v56  ;;  %v1821_v45 = vmul.f32 %v3854_v60, %v1808_v61 }
 0x19d   : > { %v2066_v7 = vmul.f32 %v3854_v60, %v2053_v51 }
 0x19e   : > { %v1241_v18 = vpop.f32.mrf.mxu3 }
 0x19f   : > { %v1010_v37 = vpop.f32.mrf.mxu2  ;;  %v4115_v16 = vadd.f32 %v1241_v18, %v3992_v17 }
 0x1a0   : > { %v2126_v63 = vpop.permute.xlu1 %2125  ;;  %v1880_v39 = vpop.permute.xlu0 %1879 }
 0x1a1   : > { %v1898_v0 = vmul.f32 %v1880_v39, %v1820_v15  ;;  %v777_v3 = vpop.f32.mrf.mxu1  ;;  %v1478_v49 = vpop.f32.mrf.mxu0  ;;  %v2297_v39 = vadd.f32 %v3836_v57, %v3101_v47 }
 0x1a2   : > { %v778_v38 = vadd.f32 %v777_v3, %v3909_v19  ;;  %v4121_v8 = vadd.f32 %v1478_v49, %v4035_v31  ;;  %v3063_v19 = vld [vmem:[%s3290_s15 + $0x75] sm:$0xff]  ;;  %v2386_v31 = vmul.f32 %v3976_v36, %v2308_v58 }
 0x1a3   : > { %3126 = vmatmul.msk.f32.gmra.mxu0 %vm585_vm1, %v2385_v48  ;;  %3049 = vmatmul.msk.f32.gmra.mxu2 %vm585_vm1, %v1898_v0  ;;  %v2054_v55 = vadd.f32 %v3836_v57, %v3063_v19  ;;  %v3103_v19 = vld [vmem:[%s3290_s15 + $0x6e] sm:$0xff] }
 0x1a4   : > { %3089 = vmatmul.msk.f32.gmra.mxu3 %vm585_vm1, %v2143_v30  ;;  %v4127_v17 = vadd.f32 %v1010_v37, %v778_v38  ;;  %v2144_v37 = vmul.f32 %v2126_v63, %v2066_v7  ;;  %v2310_v38 = vmul.f32 %v3854_v60, %v2297_v39 }
 0x1a5   : > { %v2067_v48 = vmul.f32 %v3854_v60, %v2054_v55 }
 0x1a6   : > { %v1244_v52 = vpop.f32.mrf.mxu3 }
 0x1a7   : > { %v1269_v53 = vadd.f32 %v1244_v52, %v4021_v29  ;;  %v1013_v36 = vpop.f32.mrf.mxu2  ;;  %v2309_v29 = vmul.f32 %v3854_v60, %v2296_v9  ;;  %v2299_v9 = vadd.f32 %v3836_v57, %v3103_v19 }
 0x1a8   : > { %v1885_v40 = vpop.permute.xlu1 %1884  ;;  %v1634_v21 = vpop.permute.xlu0 %1633 }
 0x1a9   : > { %v1899_v5 = vmul.f32 %v1885_v40, %v1821_v45  ;;  %v1652_v20 = vmul.f32 %v4055_v33, %v1634_v21  ;;  %v780_v50 = vpop.f32.mrf.mxu1  ;;  %v1481_v56 = vpop.f32.mrf.mxu0 }
 0x1aa   : > { %v781_v18 = vadd.f32 %v780_v50, %v3932_v13  ;;  %v4140_v46 = vadd.f32 %v1481_v56, %v4064_v35  ;;  %v2131_v13 = vpop.permute.xlu2 %2130  ;;  %v2387_v35 = vmul.f32 %v4066_v44, %v2309_v29  ;;  %v3102_v44 = vld [vmem:[%s3290_s15 + $0x66] sm:$0xff] }
 0x1ab   : > { %3127 = vmatmul.msk.f32.gmra.mxu0 %vm585_vm1, %v2386_v31  ;;  %3008 = vmatmul.msk.f32.gmra.mxu1 %vm585_vm1, %v1652_v20  ;;  %v2145_v30 = vmul.f32 %v2131_v13, %v2067_v48 }
 0x1ac   : > { %3050 = vmatmul.msk.f32.gmra.mxu2 %vm585_vm1, %v1899_v5  ;;  %3090 = vmatmul.msk.f32.gmra.mxu3 %vm585_vm1, %v2144_v37  ;;  %v1028_v33 = vadd.f32 %v1013_v36, %v781_v18 }
 0x1ae   : > { %v1247_v63 = vpop.f32.mrf.mxu3 }
 0x1af   : > { %v1270_v0 = vadd.f32 %v1247_v63, %v4051_v59  ;;  %v2298_v59 = vadd.f32 %v3836_v57, %v3102_v44 }
 0x1b0   : > { %v1639_v3 = vpop.permute.xlu1 %1638 }
 0x1b1   : > { %v1653_v49 = vmul.f32 %v1820_v15, %v1639_v3  ;;  %v1484_v61 = vpop.f32.mrf.mxu0  ;;  %v2388_v15 = vmul.f32 %v4091_v12, %v2310_v38  ;;  %v2311_v7 = vmul.f32 %v3854_v60, %v2298_v59  ;;  %v3104_v12 = vld [vmem:[%s3290_s15 + $0x76] sm:$0xff]  ;;  %s294_s15 = smul.u32 13, %s3215_s28  ;;  %s4318_s28 = smov (!%p300_p4, %s3215_s28), 1 }
 0x1b2   : > { %v4153_v51 = vadd.f32 %v1484_v61, %v4089_v14  ;;  %v2300_v50 = vadd.f32 %v3836_v57, %v3104_v12  ;;  %v1715_v57 = vpop.f32.mrf.mxu1  ;;  %s2789_s29 = sshll.u32 %s4318_s28, 3 }
 0x1b3   : > { %3128 = vmatmul.msk.f32.gmra.mxu0 %vm585_vm1, %v2387_v35  ;;  %3009 = vmatmul.msk.f32.gmra.mxu1 %vm585_vm1, %v1653_v49  ;;  %v2389_v31 = vmul.f32 %v2367_v32, %v2311_v7  ;;  %v1961_v35 = vpop.f32.mrf.mxu2  ;;  %p295_p3 = scmp.lt.s32.totalorder %s294_s15, 25  ;;  %s303_s11 = scalar_lea.vmem %s4313_s7, %s2789_s29 }
 0x1b4   : > { %3091 = vmatmul.msk.f32.gmra.mxu3 %vm585_vm1, %v2145_v30  ;;  %v1754_v30 = vadd.f32 %v1715_v57, %v4044_v23  ;;  %s307_s14 = scalar_lea.vmem %s4314_s8, %s2789_s29 }
 0x1b5   : > { %s4316_s15 = smov (!%p295_p3, %s294_s15), 25 }
 0x1b6   : > { %v1250_v58 = vpop.f32.mrf.mxu3  ;;  %s2788_s21 = sshll.u32 %s4316_s15, 3 }
 0x1b7   : > { %v1271_v43 = vadd.f32 %v1250_v58, %v4080_v34  ;;  %v2312_v34 = vmul.f32 %v3854_v60, %v2299_v9  ;;  %v2000_v58 = vadd.f32 %v1961_v35, %v1754_v30  ;;  %s4201_s26 = scalar_lea.vmem %s4312_s6, %s2788_s21 }
 0x1b9   : > { %v1487_v45 = vpop.f32.mrf.mxu0 }
 0x1ba   : > { %v4164_v14 = vadd.f32 %v1487_v45, %v4115_v16  ;;  %v2372_v16 = vpop.permute.xlu0 %2371 }
 0x1bb   : > { %3129 = vmatmul.msk.f32.gmra.mxu0 %vm585_vm1, %v2388_v15  ;;  %v2390_v56 = vmul.f32 %v2372_v16, %v2312_v34 }
 0x1be   : > { %v1964_v49 = vpop.f32.mrf.mxu2 }
 0x1bf   : > { %v1253_v52 = vpop.f32.mrf.mxu3 }
 0x1c0   : > { %v1272_v40 = vadd.f32 %v1253_v52, %v4105_v28  ;;  %v2313_v28 = vmul.f32 %v3854_v60, %v2300_v50 }
 0x1c1   : > { %v1490_v21 = vpop.f32.mrf.mxu0 }
 0x1c2   : > { %v4171_v5 = vadd.f32 %v1490_v21, %v1269_v53  ;;  %v2377_v53 = vpop.permute.xlu2 %2376 }
 0x1c3   : > { %3130 = vmatmul.msk.f32.gmra.mxu0 %vm585_vm1, %v2389_v31  ;;  %v2391_v36 = vmul.f32 %v2377_v53, %v2313_v28 }
 0x1c6   : > { %v1967_v59 = vpop.f32.mrf.mxu2 }
 0x1c7   : > { %v1256_v20 = vpop.f32.mrf.mxu3 }
 0x1c8   : > { %v1273_v55 = vadd.f32 %v1256_v20, %v4127_v17 }
 0x1c9   : > { %v1493_v32 = vpop.f32.mrf.mxu0 }
 0x1ca   : > { %v4178_v37 = vadd.f32 %v1493_v32, %v1270_v0  ;;  %v1718_v0 = vpop.f32.mrf.mxu1 }
 0x1cb   : > { %3131 = vmatmul.msk.f32.gmra.mxu0 %vm585_vm1, %v2390_v56  ;;  %v1755_v23 = vadd.f32 %v1718_v0, %v4073_v6 }
 0x1cd   : > { %v2001_v9 = vadd.f32 %v1964_v49, %v1755_v23 }
 0x1ce   : > { %v1970_v21 = vpop.f32.mrf.mxu2 }
 0x1cf   : > { %v1259_v18 = vpop.f32.mrf.mxu3 }
 0x1d0   : > { %v1274_v29 = vadd.f32 %v1259_v18, %v1028_v33 }
 0x1d1   : > { %v1496_v47 = vpop.f32.mrf.mxu0 }
 0x1d2   : > { %v4182_v48 = vadd.f32 %v1496_v47, %v1271_v43  ;;  %v1721_v44 = vpop.f32.mrf.mxu1  ;;  %v4196_v43 = vld [vmem:[%s4309_s3] ss:$0 sm:$0xff] }
 0x1d3   : > { %3132 = vmatmul.msk.f32.gmra.mxu0 %vm585_vm1, %v2391_v36  ;;  %v1756_v20 = vadd.f32 %v1721_v44, %v4099_v54 }
 0x1d5   : > { %v2002_v32 = vadd.f32 %v1967_v59, %v1756_v20 }
 0x1d7   : > { %v2207_v13 = vpop.f32.mrf.mxu3  ;;  %v1973_v35 = vpop.f32.mrf.mxu2 }
 0x1d8   : > { %v2246_v15 = vadd.f32 %v2207_v13, %v2000_v58 }
 0x1d9   : > { %v1499_v17 = vpop.f32.mrf.mxu0 }
 0x1da   : > { %v4185_v63 = vadd.f32 %v1499_v17, %v1272_v40  ;;  %v1724_v19 = vpop.f32.mrf.mxu1 }
 0x1db   : > { %v1757_v54 = vadd.f32 %v1724_v19, %v4121_v8 }
 0x1df   : > { %v2210_v39 = vpop.f32.mrf.mxu3 }
 0x1e0   : > { %v2247_v40 = vadd.f32 %v2210_v39, %v2001_v9 }
 0x1e1   : > { %v1502_v3 = vpop.f32.mrf.mxu0 }
 0x1e2   : > { %v4187_v60 = vadd.f32 %v1502_v3, %v1273_v55  ;;  %v1727_v56 = vpop.f32.mrf.mxu1  ;;  %v2003_v3 = vadd.f32 %v1970_v21, %v1757_v54 }
 0x1e3   : > { %v1758_v59 = vadd.f32 %v1727_v56, %v4140_v46 }
 0x1e7   : > { %v2213_v33 = vpop.f32.mrf.mxu3 }
 0x1e8   : > { %v2248_v53 = vadd.f32 %v2213_v33, %v2002_v32 }
 0x1e9   : > { %v1505_v61 = vpop.f32.mrf.mxu0 }
 0x1ea   : > { %v4191_v38 = vadd.f32 %v1505_v61, %v1274_v29  ;;  %v1730_v0 = vpop.f32.mrf.mxu1 }
 0x1ef   : > { %v2216_v52 = vpop.f32.mrf.mxu3 }
 0x1f0   : > { %v2249_v61 = vadd.f32 %v2216_v52, %v2003_v3 }
 0x1f1   : > { %v2453_v45 = vpop.f32.mrf.mxu0 }
 0x1f2   : > { %v2492_v7 = vadd.f32 %v2453_v45, %v2246_v15  ;;  %v1733_v52 = vpop.f32.mrf.mxu1 }
 0x1f4   : > { %v2509_v31 = vadd.f32 %v4196_v43, %v2492_v7  ;;  %v1976_v7 = vpop.f32.mrf.mxu2 }
 0x1f6   : > { %2523 = vst.msk [vmem:[%s4201_s26] sm:$0xff] %vm2522_vm2, %v2509_v31  ;;  %v2536_v12 = vmul.f32 %v2509_v31, %v3626_v25 }
 0x1f7   : > { %v2219_v55 = vpop.f32.mrf.mxu3 }
 0x1f8   : > { %v2581_v28 = vmul.f32 %v2536_v12, %v2509_v31  ;;  %v2549_v18 = vsel %vm2522_vm2, %v2536_v12, 0.0  ;;  %v2004_v31 = vadd.f32 %v1973_v35, %v1758_v59 }
 0x1f9   : > { %v2456_v34 = vpop.f32.mrf.mxu0 }
 0x1fa   : > { %v2493_v16 = vadd.f32 %v2456_v34, %v2247_v40  ;;  %v2594_v57 = vsel %vm2522_vm2, %v2581_v28, 0.0  ;;  %v2250_v9 = vadd.f32 %v2219_v55, %v2004_v31 }
 0x1fc   : > { %v2510_v50 = vadd.f32 %v4196_v43, %v2493_v16  ;;  %v1759_v16 = vadd.f32 %v1730_v0, %v4153_v51  ;;  %v1979_v28 = vpop.f32.mrf.mxu2 }
 0x1fe   : > { %2524 = vst.msk [vmem:[%s4201_s26 + $0x8] sm:$0xff] %vm2522_vm2, %v2510_v50  ;;  %v2537_v6 = vmul.f32 %v2510_v50, %v3548_v26 }
 0x1ff   : > { %v2222_v33 = vpop.f32.mrf.mxu3 }
 0x200   : > { %v2550_v36 = vsel %vm2522_vm2, %v2537_v6, 0.0  ;;  %v2582_v25 = vmul.f32 %v2537_v6, %v2510_v50  ;;  %v2005_v6 = vadd.f32 %v1976_v7, %v1759_v16 }
 0x201   : > { %v2551_v29 = vadd.f32 %v2550_v36, %v2549_v18  ;;  %v2459_v47 = vpop.f32.mrf.mxu0  ;;  %v1736_v36 = vpop.f32.mrf.mxu1 }
 0x202   : > { %v2595_v13 = vsel %vm2522_vm2, %v2582_v25, 0.0  ;;  %v2494_v17 = vadd.f32 %v2459_v47, %v2248_v53  ;;  %v2251_v55 = vadd.f32 %v2222_v33, %v2005_v6 }
 0x203   : > { %v2596_v39 = vadd.f32 %v2595_v13, %v2594_v57 }
 0x204   : > { %v2511_v26 = vadd.f32 %v4196_v43, %v2494_v17 }
 0x206   : > { %2525 = vst.msk [vmem:[%s4201_s26 + $0x10] sm:$0xff] %vm2522_vm2, %v2511_v26  ;;  %v2538_v49 = vmul.f32 %v2511_v26, %v3659_v2 }
 0x207   : > { %v2225_v34 = vpop.f32.mrf.mxu3 }
 0x208   : > { %v2552_v8 = vsel %vm2522_vm2, %v2538_v49, 0.0  ;;  %v2583_v30 = vmul.f32 %v2538_v49, %v2511_v26 }
 0x209   : > { %v2553_v44 = vadd.f32 %v2552_v8, %v2551_v29  ;;  %v2462_v58 = vpop.f32.mrf.mxu0  ;;  %v1760_v29 = vadd.f32 %v1733_v52, %v4164_v14  ;;  %v1739_v49 = vpop.f32.mrf.mxu1 }
 0x20a   : > { %v2597_v15 = vsel %vm2522_vm2, %v2583_v30, 0.0  ;;  %v2495_v45 = vadd.f32 %v2462_v58, %v2249_v61  ;;  %v1761_v61 = vadd.f32 %v1736_v36, %v4171_v5 }
 0x20b   : > { %v2598_v19 = vadd.f32 %v2597_v15, %v2596_v39  ;;  %v2006_v35 = vadd.f32 %v1979_v28, %v1760_v29  ;;  %v1982_v39 = vpop.f32.mrf.mxu2 }
 0x20c   : > { %v2512_v23 = vadd.f32 %v4196_v43, %v2495_v45  ;;  %v2007_v15 = vadd.f32 %v1982_v39, %v1761_v61 }
 0x20d   : > { %v2252_v26 = vadd.f32 %v2225_v34, %v2006_v35 }
 0x20e   : > { %2526 = vst.msk [vmem:[%s4201_s26 + $0x18] sm:$0xff] %vm2522_vm2, %v2512_v23  ;;  %v2539_v2 = vmul.f32 %v2512_v23, %v3656_v62 }
 0x20f   : > { %v2228_v57 = vpop.f32.mrf.mxu3 }
 0x210   : > { %v2554_v40 = vsel %vm2522_vm2, %v2539_v2, 0.0  ;;  %v2584_v21 = vmul.f32 %v2539_v2, %v2512_v23  ;;  %v2253_v7 = vadd.f32 %v2228_v57, %v2007_v15  ;;  %v1762_v2 = vadd.f32 %v1739_v49, %v4178_v37 }
 0x211   : > { %v2555_v46 = vadd.f32 %v2554_v40, %v2553_v44  ;;  %v2465_v12 = vpop.f32.mrf.mxu0  ;;  %v1742_v40 = vpop.f32.mrf.mxu1 }
 0x212   : > { %v2599_v20 = vsel %vm2522_vm2, %v2584_v21, 0.0  ;;  %v2496_v50 = vadd.f32 %v2465_v12, %v2250_v9  ;;  %v1763_v28 = vadd.f32 %v1742_v40, %v4182_v48 }
 0x213   : > { %v2600_v56 = vadd.f32 %v2599_v20, %v2598_v19  ;;  %v1985_v45 = vpop.f32.mrf.mxu2 }
 0x214   : > { %v2513_v32 = vadd.f32 %v4196_v43, %v2496_v50 }
 0x216   : > { %2527 = vst.msk [vmem:[%s4201_s26 + $0x20] sm:$0xff] %vm2522_vm2, %v2513_v32  ;;  %v2540_v62 = vmul.f32 %v2513_v32, %v3570_v10 }
 0x217   : > { %v2231_v59 = vpop.f32.mrf.mxu3 }
 0x218   : > { %v2556_v53 = vsel %vm2522_vm2, %v2540_v62, 0.0  ;;  %v2585_v18 = vmul.f32 %v2540_v62, %v2513_v32 }
 0x219   : > { %v2557_v25 = vadd.f32 %v2556_v53, %v2555_v46  ;;  %v2468_v51 = vpop.f32.mrf.mxu0  ;;  %v2008_v46 = vadd.f32 %v1985_v45, %v1762_v2 }
 0x21a   : > { %v2601_v47 = vsel %vm2522_vm2, %v2585_v18, 0.0  ;;  %v2497_v54 = vadd.f32 %v2468_v51, %v2251_v55  ;;  %v1745_v18 = vpop.f32.mrf.mxu1 }
 0x21b   : > { %v2602_v13 = vadd.f32 %v2601_v47, %v2600_v56  ;;  %v2254_v16 = vadd.f32 %v2231_v59, %v2008_v46  ;;  %v1988_v56 = vpop.f32.mrf.mxu2  ;;  %v1764_v57 = vadd.f32 %v1745_v18, %v4185_v63 }
 0x21c   : > { %v2514_v17 = vadd.f32 %v4196_v43, %v2497_v54  ;;  %v2009_v36 = vadd.f32 %v1988_v56, %v1763_v28 }
 0x21e   : > { %2528 = vst.msk [vmem:[%s4201_s26 + $0x28] sm:$0xff] %vm2522_vm2, %v2514_v17  ;;  %v2541_v10 = vmul.f32 %v2514_v17, %v3688_v24 }
 0x21f   : > { %v2234_v12 = vpop.f32.mrf.mxu3 }
 0x220   : > { %v2558_v0 = vsel %vm2522_vm2, %v2541_v10, 0.0  ;;  %v2586_v3 = vmul.f32 %v2541_v10, %v2514_v17 }
 0x221   : > { %v2559_v14 = vadd.f32 %v2558_v0, %v2557_v25  ;;  %v2471_v33 = vpop.f32.mrf.mxu0  ;;  %v2255_v25 = vadd.f32 %v2234_v12, %v2009_v36 }
 0x222   : > { %v2603_v8 = vsel %vm2522_vm2, %v2586_v3, 0.0  ;;  %v2498_v30 = vadd.f32 %v2471_v33, %v2252_v26 }
 0x223   : > { %v2604_v44 = vadd.f32 %v2603_v8, %v2602_v13  ;;  %v1991_v35 = vpop.f32.mrf.mxu2 }
 0x224   : > { %v2515_v58 = vadd.f32 %v4196_v43, %v2498_v30  ;;  %v2010_v0 = vadd.f32 %v1991_v35, %v1764_v57 }
 0x226   : > { %2529 = vst.msk [vmem:[%s4201_s26 + $0x30] sm:$0xff] %vm2522_vm2, %v2515_v58  ;;  %v2542_v24 = vmul.f32 %v2515_v58, %v3684_v22 }
 0x227   : > { %v2237_v47 = vpop.f32.mrf.mxu3 }
 0x228   : > { %v2560_v19 = vsel %vm2522_vm2, %v2542_v24, 0.0  ;;  %v2587_v23 = vmul.f32 %v2542_v24, %v2515_v58  ;;  %v1748_v26 = vpop.f32.mrf.mxu1  ;;  %v2256_v3 = vadd.f32 %v2237_v47, %v2010_v0 }
 0x229   : > { %v2561_v31 = vadd.f32 %v2560_v19, %v2559_v14  ;;  %v2474_v5 = vpop.f32.mrf.mxu0  ;;  %v1765_v61 = vadd.f32 %v1748_v26, %v4187_v60 }
 0x22a   : > { %v2605_v52 = vsel %vm2522_vm2, %v2587_v23, 0.0  ;;  %v2499_v9 = vadd.f32 %v2474_v5, %v2253_v7 }
 0x22b   : > { %v2606_v21 = vadd.f32 %v2605_v52, %v2604_v44  ;;  %v1994_v44 = vpop.f32.mrf.mxu2 }
 0x22c   : > { %v2516_v34 = vadd.f32 %v4196_v43, %v2499_v9  ;;  %v2011_v24 = vadd.f32 %v1994_v44, %v1765_v61 }
 0x22e   : > { %2530 = vst.msk [vmem:[%s4201_s26 + $0x38] sm:$0xff] %vm2522_vm2, %v2516_v34  ;;  %v2543_v22 = vmul.f32 %v2516_v34, %v3598_v4 }
 0x22f   : > { %v2240_v58 = vpop.f32.mrf.mxu3 }
 0x230   : > { %v2562_v20 = vsel %vm2522_vm2, %v2543_v22, 0.0  ;;  %v2588_v50 = vmul.f32 %v2543_v22, %v2516_v34  ;;  %v1751_v45 = vpop.f32.mrf.mxu1  ;;  %v2257_v7 = vadd.f32 %v2240_v58, %v2011_v24 }
 0x231   : > { %v2563_v37 = vadd.f32 %v2562_v20, %v2561_v31  ;;  %v2477_v32 = vpop.f32.mrf.mxu0  ;;  %v1766_v5 = vadd.f32 %v1751_v45, %v4191_v38 }
 0x232   : > { %v2607_v6 = vsel %vm2522_vm2, %v2588_v50, 0.0  ;;  %v2500_v62 = vadd.f32 %v2477_v32, %v2254_v16 }
 0x233   : > { %v2608_v55 = vadd.f32 %v2607_v6, %v2606_v21  ;;  %v1997_v21 = vpop.f32.mrf.mxu2 }
 0x234   : > { %v2517_v53 = vadd.f32 %v4196_v43, %v2500_v62  ;;  %v2012_v46 = vadd.f32 %v1997_v21, %v1766_v5 }
 0x236   : > { %2531 = vst.msk [vmem:[%s4201_s26 + $0x40] sm:$0xff] %vm2522_vm2, %v2517_v53  ;;  %v2544_v4 = vmul.f32 %v2517_v53, %v3720_v27 }
 0x237   : > { %v2243_v34 = vpop.f32.mrf.mxu3 }
 0x238   : > { %v2564_v51 = vsel %vm2522_vm2, %v2544_v4, 0.0  ;;  %v2589_v29 = vmul.f32 %v2544_v4, %v2517_v53  ;;  %v2258_v22 = vadd.f32 %v2243_v34, %v2012_v46 }
 0x239   : > { %v2565_v54 = vadd.f32 %v2564_v51, %v2563_v37  ;;  %v2480_v48 = vpop.f32.mrf.mxu0 }
 0x23a   : > { %v2609_v13 = vsel %vm2522_vm2, %v2589_v29, 0.0  ;;  %v2501_v17 = vadd.f32 %v2480_v48, %v2255_v25 }
 0x23b   : > { %v2610_v10 = vadd.f32 %v2609_v13, %v2608_v55 }
 0x23c   : > { %v2518_v39 = vadd.f32 %v4196_v43, %v2501_v17 }
 0x23e   : > { %2532 = vst.msk [vmem:[%s4201_s26 + $0x48] sm:$0xff] %vm2522_vm2, %v2518_v39  ;;  %v2545_v27 = vmul.f32 %v2518_v39, %v3716_v41 }
 0x240   : > { %v2566_v49 = vsel %vm2522_vm2, %v2545_v27, 0.0  ;;  %v2590_v14 = vmul.f32 %v2545_v27, %v2518_v39 }
 0x241   : > { %v2567_v33 = vadd.f32 %v2566_v49, %v2565_v54  ;;  %v2483_v63 = vpop.f32.mrf.mxu0 }
 0x242   : > { %v2611_v8 = vsel %vm2522_vm2, %v2590_v14, 0.0  ;;  %v2502_v30 = vadd.f32 %v2483_v63, %v2256_v3 }
 0x243   : > { %v2612_v59 = vadd.f32 %v2611_v8, %v2610_v10 }
 0x244   : > { %v2519_v15 = vadd.f32 %v4196_v43, %v2502_v30 }
 0x246   : > { %2533 = vst.msk [vmem:[%s4201_s26 + $0x50] sm:$0xff] %vm2522_vm2, %v2519_v15  ;;  %v2546_v41 = vmul.f32 %v2519_v15, %v3624_v42 }
 0x248   : > { %v2568_v19 = vsel %vm2522_vm2, %v2546_v41, 0.0  ;;  %v2591_v23 = vmul.f32 %v2546_v41, %v2519_v15 }
 0x249   : > { %v2569_v60 = vadd.f32 %v2568_v19, %v2567_v33  ;;  %v2486_v31 = vpop.f32.mrf.mxu0 }
 0x24a   : > { %v2613_v2 = vsel %vm2522_vm2, %v2591_v23, 0.0  ;;  %v2503_v52 = vadd.f32 %v2486_v31, %v2257_v7 }
 0x24b   : > { %v2614_v9 = vadd.f32 %v2613_v2, %v2612_v59 }
 0x24c   : > { %v2520_v40 = vadd.f32 %v4196_v43, %v2503_v52 }
 0x24e   : > { %2534 = vst.msk [vmem:[%s4201_s26 + $0x58] sm:$0xff] %vm2522_vm2, %v2520_v40  ;;  %v2547_v42 = vmul.f32 %v2520_v40, %v3746_v1 }
 0x250   : > { %v2570_v12 = vsel %vm2522_vm2, %v2547_v42, 0.0  ;;  %v2592_v16 = vmul.f32 %v2547_v42, %v2520_v40 }
 0x251   : > { %v2571_v38 = vadd.f32 %v2570_v12, %v2569_v60  ;;  %v2489_v20 = vpop.f32.mrf.mxu0 }
 0x252   : > { %v2615_v50 = vsel %vm2522_vm2, %v2592_v16, 0.0  ;;  %v2504_v56 = vadd.f32 %v2489_v20, %v2258_v22 }
 0x253   : > { %v2616_v37 = vadd.f32 %v2615_v50, %v2614_v9 }
 0x254   : > { %v2521_v32 = vadd.f32 %v4196_v43, %v2504_v56 }
 0x256   : > { %2535 = vst.msk [vmem:[%s4201_s26 + $0x60] sm:$0xff] %vm2522_vm2, %v2521_v32  ;;  %v2548_v28 = vmul.f32 %v2521_v32, %v3742_v11 }
 0x258   : > { %v2572_v6 = vsel %vm2522_vm2, %v2548_v28, 0.0  ;;  %v2593_v1 = vmul.f32 %v2548_v28, %v2521_v32 }
 0x259   : > { %v2573_v62 = vadd.f32 %v2572_v6, %v2571_v38 }
 0x25a   : > { %v2617_v55 = vsel %vm2522_vm2, %v2593_v1, 0.0 }
 0x25b   : > { %v2574_v53 = vrot.slane %v2573_v62, 4  ;;  %v2618_v18 = vadd.f32 %v2617_v55, %v2616_v37 }
 0x25d   : > { %v2575_v36 = vadd.f32 %v2574_v53, %v2573_v62  ;;  %v2619_v4 = vrot.slane %v2618_v18, 4 }
 0x25f   : > { %v2576_v25 = vrot.slane %v2575_v36, 2  ;;  %v2620_v51 = vadd.f32 %v2619_v4, %v2618_v18 }
 0x261   : > { %v2577_v43 = vadd.f32 %v2576_v25, %v2575_v36  ;;  %v2621_v29 = vrot.slane %v2620_v51, 2 }
 0x263   : > { %v2578_v47 = vrot.slane %v2577_v43, 1  ;;  %v2622_v54 = vadd.f32 %v2621_v29, %v2620_v51 }
 0x265   : > { %v2579_v11 = vadd.f32 %v2578_v47, %v2577_v43  ;;  %v2623_v48 = vrot.slane %v2622_v54, 1 }
 0x267   : > { %2580 = vst.msk [vmem:[%s303_s11] sm:$0xff] %vm2522_vm2, %v2579_v11  ;;  %v2624_v57 = vadd.f32 %v2623_v48, %v2622_v54 }
 0x269   : > { %2625 = vst.msk [vmem:[%s307_s14] sm:$0xff] %vm2522_vm2, %v2624_v57 }
 0x26a PF: > { %s19_s27 = sadd.s32 1, %s3161_s27  }
 0x26b   : > { %p16_p5 = scmp.ge.s32.totalorder %s19_s27, 4  }
 0x26d   :  { %18 = sbr.rel (!%p16_p5) target bundleno = 1 (0x1), region = 121 }

// kernel: glow_forward.9
= control target key start
LH: loop header
LB: loop body
LE: loop exit
PB: predicated region body
PF: predicated region fallthrough
CT: control target
= control target key end

     0   :  { %s3960_s13 = smov 0   ;;  %s5563_s0 = inlined_call_operand.vmem [shape: f32[230,16], index: 0, kind: input, shape index: {}]   ;;  %s5564_s1 = inlined_call_operand.vmem [shape: f32[230,1], index: 1, kind: input, shape index: {}]   ;;  %s5565_s2 = inlined_call_operand.vmem [shape: f32[9,16,12], index: 2, kind: input, shape index: {}]   ;;  %s5566_s3 = inlined_call_operand.vmem [shape: f32[1,12], index: 3, kind: input, shape index: {}]   ;;  %s5567_s4 = inlined_call_operand.vmem [shape: f32[1,16], index: 4, kind: input, shape index: {}]   ;;  %s5568_s5 = inlined_call_operand.vmem [shape: f32[1,16], index: 5, kind: input, shape index: {}]   ;;  %s5569_s6 = inlined_call_operand.vmem [shape: f32[208,6], index: 6, kind: input, shape index: {}]   ;;  %s5570_s7 = inlined_call_operand.vmem [shape: f32[1,6], index: 7, kind: input, shape index: {}]   ;;  %s5571_s8 = inlined_call_operand.vmem [shape: f32[1,6], index: 8, kind: input, shape index: {}]   ;;  %s5572_s9 = inlined_call_operand.vmem [shape: f32[208,6], index: 9, kind: output, shape index: {0}]   ;;  %s5573_s10 = inlined_call_operand.vmem [shape: f32[208,1], index: 10, kind: output, shape index: {1}]  }
   0x1 LB: > { %s3400_s14 = sadd.s32 4294967295, %s3901_s13   ;;  %p3404_p0 = scmp.ge.s32.totalorder %s3901_s13, 1  ;;  %s3901_s13 = sphi %s3960_s13, %s21_s13  }
   0x2   : > { %p316_p1 = scmp.lt.s32.totalorder %s3901_s13, 3 }
   0x4   : > { %p317_p2 = pnand %p3404_p0, %p316_p1 }
   0x5   : > { %s3970_s15 = smul.u32 (!%p317_p2), 104, %s3400_s14  ;;  %s3904_s17 = smov (!%p317_p2), 122  }
   0x6   : > { %320 = sbr.rel (%p317_p2) target bundleno = 881 (0x371), region = 56 }
   0x7   : > { %s3976_s18 = scalar_lea.vmem (!%p317_p2), %s5564_s1, %s3970_s15  ;;  %s4037_s25 = scalar_lea.vmem (!%p317_p2), %s5563_s0, %s3970_s15 }
   0x8   : > { %s359_s19 = smul.u32 (!%p317_p2), 13, %s3400_s14 }
   0xa   : > { %p360_p3 = scmp.lt.s32.totalorder (!%p317_p2), %s359_s19, 25 }
   0xb   : > { %v3903_v0 = vmov 0   ;;  %v399_v1 = vld [vmem:[%s3976_s18 + $0x20] sm:$0xff]  ;;  %v397_v2 = vld [vmem:[%s3976_s18 + $0x10] sm:$0xff]  ;;  %v400_v4 = vld [vmem:[%s3976_s18 + $0x28] sm:$0xff]  ;;  %vm682_vm0 = vcmask 130048   ;;  %vm3061_vm1 = vcmask 48128  }
   0xc   : > { %3769 = vset.pattern.permute.xlu2 %v3903_v0  ;;  %3768 = vset.pattern.permute.xlu1 %v3903_v0  ;;  %v395_v3 = vld [vmem:[%s3976_s18] sm:$0xff]  ;;  %v398_v5 = vld [vmem:[%s3976_s18 + $0x18] sm:$0xff]  ;;  %v396_v6 = vld [vmem:[%s3976_s18 + $0x8] sm:$0xff]  ;;  %s5585_s19 = smov (!%p360_p3, %s359_s19), 25 }
   0xd   : > { %3767 = vset.pattern.permute.xlu0 %v3903_v0  ;;  %475 = vperm.xlu2 %3769, %v399_v1   ;;  %v403_v7 = vld [vmem:[%s3976_s18 + $0x40] sm:$0xff]  ;;  %v402_v8 = vld [vmem:[%s3976_s18 + $0x38] sm:$0xff]  ;;  %v401_v9 = vld [vmem:[%s3976_s18 + $0x30] sm:$0xff]  ;;  %s5181_s14 = sshll.u32 %s5585_s19, 3 }
   0xe   : > { %465 = vperm.xlu1 %3768, %v397_v2   ;;  %455 = vperm.xlu0 %3767, %v395_v3   ;;  %v406_v10 = vld [vmem:[%s3976_s18 + $0x58] sm:$0xff]  ;;  %v405_v11 = vld [vmem:[%s3976_s18 + $0x50] sm:$0xff]  ;;  %v404_v12 = vld [vmem:[%s3976_s18 + $0x48] sm:$0xff]  ;;  %s5193_s22 = scalar_lea.vmem %s5569_s6, %s5181_s14  ;;  %s5242_s30 = scalar_lea.vmem %s5572_s9, %s5181_s14 }
   0xf   : > { %v3422_v13 = vld [vmem:[%s3976_s18 + $0x9] sm:$0xff]  ;;  %v3421_v14 = vld [vmem:[%s3976_s18 + $0x1] sm:$0xff]  ;;  %v3424_v17 = vld [vmem:[%s3976_s18 + $0x19] sm:$0xff]  ;;  %s5344_s15 = scalar_lea.vmem %s5573_s10, %s5181_s14 }
  0x10   : > { %v407_v15 = vld [vmem:[%s3976_s18 + $0x60] sm:$0xff]  ;;  %v3423_v18 = vld [vmem:[%s3976_s18 + $0x11] sm:$0xff]  ;;  %v3426_v21 = vld [vmem:[%s3976_s18 + $0x29] sm:$0xff] }
  0x11   : > { %v3425_v16 = vld [vmem:[%s3976_s18 + $0x21] sm:$0xff]  ;;  %v3428_v19 = vld [vmem:[%s3976_s18 + $0x39] sm:$0xff]  ;;  %v3427_v20 = vld [vmem:[%s3976_s18 + $0x31] sm:$0xff] }
  0x12   : > { %v3431_v22 = vld [vmem:[%s3976_s18 + $0x51] sm:$0xff]  ;;  %v3430_v23 = vld [vmem:[%s3976_s18 + $0x49] sm:$0xff]  ;;  %v3429_v24 = vld [vmem:[%s3976_s18 + $0x41] sm:$0xff] }
  0x13   : > { %v3475_v25 = vld [vmem:[%s3976_s18 + $0x2] sm:$0xff]  ;;  %v3432_v27 = vld [vmem:[%s3976_s18 + $0x59] sm:$0xff]  ;;  %v3476_v30 = vld [vmem:[%s3976_s18 + $0xa] sm:$0xff] }
  0x14   : > { %v3433_v26 = vld [vmem:[%s3976_s18 + $0x61] sm:$0xff]  ;;  %v3477_v29 = vld [vmem:[%s3976_s18 + $0x12] sm:$0xff]  ;;  %v3480_v32 = vld [vmem:[%s3976_s18 + $0x2a] sm:$0xff] }
  0x15   : > { %480 = vperm.xlu2 %3769, %v400_v4   ;;  %v3478_v28 = vld [vmem:[%s3976_s18 + $0x1a] sm:$0xff]  ;;  %v3481_v31 = vld [vmem:[%s3976_s18 + $0x32] sm:$0xff]  ;;  %v3479_v33 = vld [vmem:[%s3976_s18 + $0x22] sm:$0xff] }
  0x16   : > { %470 = vperm.xlu1 %3768, %v398_v5   ;;  %460 = vperm.xlu0 %3767, %v396_v6   ;;  %v3484_v34 = vld [vmem:[%s3976_s18 + $0x4a] sm:$0xff]  ;;  %v3483_v35 = vld [vmem:[%s3976_s18 + $0x42] sm:$0xff]  ;;  %v3482_v36 = vld [vmem:[%s3976_s18 + $0x3a] sm:$0xff] }
  0x17   : > { %v3487_v38 = vld [vmem:[%s3976_s18 + $0x62] sm:$0xff]  ;;  %v3486_v39 = vld [vmem:[%s3976_s18 + $0x5a] sm:$0xff]  ;;  %v3485_v40 = vld [vmem:[%s3976_s18 + $0x52] sm:$0xff] }
  0x18   : > { %v3435_v41 = vld [vmem:[%s5565_s2 + $0x18] sm:$0xff]  ;;  %v3434_v43 = vld [vmem:[%s5565_s2 + $0x10] sm:$0xff]  ;;  %v3412_v48 = vld [vmem:[%s4037_s25 + $0x21] sm:$0xff] }
  0x19   : > { %3751 = vmatpush.msra.mxu1 %v3435_v41  ;;  %736 = vmatpush.msra.mxu0 %v3435_v41  ;;  %v4045_v49 = vld [vmem:[%s5567_s4] ss:$0 sm:$0xff]  ;;  %v3408_v61 = vld [vmem:[%s4037_s25 + $0x1] sm:$0xff]  ;;  %v3558_v62 = vld [vmem:[%s3976_s18 + $0x13] sm:$0xff] }
  0x1a   : > { %3752 = vmatpush.msra.mxu2 %v3435_v41  ;;  %3753 = vmatpush.msra.mxu3 %v3435_v41  ;;  %v566_v50 = vmul.f32 %v4045_v49, %v3412_v48  ;;  %v4051_v51 = vld [vmem:[%s5568_s5] ss:$0 sm:$0xff]  ;;  %v3557_v63 = vld [vmem:[%s3976_s18 + $0xb] sm:$0xff]  ;;  %v562_v1 = vmul.f32 %v4045_v49, %v3408_v61  ;;  %v3416_v41 = vld [vmem:[%s4037_s25 + $0x41] sm:$0xff] }
  0x1b   : > { %3754 = vmatpush.msra.mxu1 %v3434_v43  ;;  %737 = vmatpush.msra.mxu0 %v3434_v43  ;;  %v3528_v0 = vld [vmem:[%s3976_s18 + $0x6a] sm:$0xff] }
  0x1c   : > { %3755 = vmatpush.msra.mxu2 %v3434_v43  ;;  %3756 = vmatpush.msra.mxu3 %v3434_v43  ;;  %v579_v55 = vadd.f32 %v4051_v51, %v566_v50  ;;  %v575_v5 = vadd.f32 %v4051_v51, %v562_v1  ;;  %v3409_v6 = vld [vmem:[%s4037_s25 + $0x9] sm:$0xff] }
  0x1d   : > { %495 = vperm.xlu2 %3769, %v403_v7   ;;  %v3561_v7 = vld [vmem:[%s3976_s18 + $0x2b] sm:$0xff] }
  0x1e   : > { %490 = vperm.xlu1 %3768, %v402_v8   ;;  %485 = vperm.xlu0 %3767, %v401_v9   ;;  %v592_v56 = vmax.f32 %v579_v55, 0.0  ;;  %v3560_v8 = vld [vmem:[%s3976_s18 + $0x23] sm:$0xff]  ;;  %v3559_v9 = vld [vmem:[%s3976_s18 + $0x1b] sm:$0xff]  ;;  %v3565_v43 = vld [vmem:[%s3976_s18 + $0x4b] sm:$0xff] }
  0x25   : > { %510 = vperm.xlu2 %3769, %v406_v10   ;;  %v563_v10 = vmul.f32 %v4045_v49, %v3409_v6  ;;  %v3418_v6 = vld [vmem:[%s4037_s25 + $0x51] sm:$0xff] }
  0x26   : > { %505 = vperm.xlu1 %3768, %v405_v11   ;;  %500 = vperm.xlu0 %3767, %v404_v12   ;;  %v588_v11 = vmax.f32 %v575_v5, 0.0  ;;  %v3489_v12 = vld [vmem:[%s5565_s2 + $0x28] sm:$0xff]  ;;  %v3415_v5 = vld [vmem:[%s4037_s25 + $0x39] sm:$0xff] }
  0x27   : > { %1075 = vmatpush.msrb.mxu2 %v3489_v12  ;;  %v3569_v12 = vld [vmem:[%s3976_s18 + $0x6b] sm:$0xff] }
  0x2d   : > { %608 = vperm.xlu2 %3769, %v3422_v13  }
  0x2e   : > { %603 = vperm.xlu1 %3768, %v3421_v14   ;;  %515 = vperm.xlu0 %3767, %v407_v15   ;;  %v576_v15 = vadd.f32 %v4051_v51, %v563_v10  ;;  %v3462_v10 = vld [vmem:[%s4037_s25 + $0x2] sm:$0xff] }
  0x35   : > { %623 = vperm.xlu2 %3769, %v3425_v16  }
  0x36   : > { %618 = vperm.xlu1 %3768, %v3424_v17   ;;  %613 = vperm.xlu0 %3767, %v3423_v18   ;;  %v3410_v18 = vld [vmem:[%s4037_s25 + $0x11] sm:$0xff] }
  0x3d   : > { %638 = vperm.xlu2 %3769, %v3428_v19   ;;  %v3488_v19 = vld [vmem:[%s5565_s2 + $0x20] sm:$0xff] }
  0x3e   : > { %633 = vperm.xlu1 %3768, %v3427_v20   ;;  %628 = vperm.xlu0 %3767, %v3426_v21   ;;  %v3564_v20 = vld [vmem:[%s3976_s18 + $0x43] sm:$0xff]  ;;  %v3563_v21 = vld [vmem:[%s3976_s18 + $0x3b] sm:$0xff] }
  0x3f   : > { %1076 = vmatpush.msrb.mxu2 %v3488_v19  ;;  %v569_v19 = vmul.f32 %v4045_v49, %v3415_v5 }
  0x45   : > { %653 = vperm.xlu2 %3769, %v3431_v22   ;;  %v3413_v22 = vld [vmem:[%s4037_s25 + $0x29] sm:$0xff] }
  0x46   : > { %648 = vperm.xlu1 %3768, %v3430_v23   ;;  %643 = vperm.xlu0 %3767, %v3429_v24   ;;  %v3562_v23 = vld [vmem:[%s3976_s18 + $0x33] sm:$0xff]  ;;  %v589_v24 = vmax.f32 %v576_v15, 0.0  ;;  %v572_v15 = vmul.f32 %v4045_v49, %v3418_v6 }
  0x4d   : > { %943 = vperm.xlu2 %3769, %v3475_v25   ;;  %v564_v25 = vmul.f32 %v4045_v49, %v3410_v18 }
  0x4e   : > { %663 = vperm.xlu1 %3768, %v3433_v26   ;;  %658 = vperm.xlu0 %3767, %v3432_v27   ;;  %v567_v26 = vmul.f32 %v4045_v49, %v3413_v22  ;;  %v532_v27 = vld [vmem:[%s5565_s2 + $0x8] sm:$0xff] }
  0x4f   : > { %831 = vmatpush.msrb.mxu1 %v532_v27 }
  0x55   : > { %958 = vperm.xlu2 %3769, %v3478_v28  }
  0x56   : > { %953 = vperm.xlu1 %3768, %v3477_v29   ;;  %948 = vperm.xlu0 %3767, %v3476_v30  }
  0x5d   : > { %973 = vperm.xlu2 %3769, %v3481_v31  }
  0x5e   : > { %968 = vperm.xlu1 %3768, %v3480_v32   ;;  %963 = vperm.xlu0 %3767, %v3479_v33  }
  0x65   : > { %988 = vperm.xlu2 %3769, %v3484_v34  }
  0x66   : > { %983 = vperm.xlu1 %3768, %v3483_v35   ;;  %978 = vperm.xlu0 %3767, %v3482_v36  }
  0x67   : > { %v4014_v37 = vpop.permute.xlu2 %475 }
  0x6d   : > { %1003 = vperm.xlu2 %3769, %v3487_v38  }
  0x6e   : > { %998 = vperm.xlu1 %3768, %v3486_v39   ;;  %993 = vperm.xlu0 %3767, %v3485_v40  }
  0x6f   : > { %v4022_v42 = vpop.permute.xlu2 %480 }
  0x75   : > { %1210 = vperm.xlu2 %3769, %v3478_v28  }
  0x76   : > { %1205 = vperm.xlu1 %3768, %v3477_v29   ;;  %1200 = vperm.xlu0 %3767, %v3476_v30  }
  0x77   : > { %v4027_v44 = vpop.permute.xlu2 %495 }
  0x7d   : > { %1225 = vperm.xlu2 %3769, %v3481_v31   ;;  %v3411_v31 = vld [vmem:[%s4037_s25 + $0x19] sm:$0xff] }
  0x7e   : > { %1220 = vperm.xlu1 %3768, %v3480_v32   ;;  %1215 = vperm.xlu0 %3767, %v3479_v33   ;;  %v577_v33 = vadd.f32 %v4051_v51, %v564_v25  ;;  %v565_v48 = vmul.f32 %v4045_v49, %v3411_v31  ;;  %v585_v25 = vadd.f32 %v4051_v51, %v572_v15  ;;  %v381_v31 = vld [vmem:[%s4037_s25] sm:$0xff] }
  0x7f   : > { %v4029_v45 = vpop.permute.xlu2 %510 }
  0x80   : > { %v4031_v46 = vpop.permute.xlu1 %465  ;;  %v4039_v47 = vpop.permute.xlu0 %455  ;;  %v590_v50 = vmax.f32 %v577_v33, 0.0 }
  0x85   : > { %1240 = vperm.xlu2 %3769, %v3484_v34   ;;  %v3567_v34 = vld [vmem:[%s3976_s18 + $0x5b] sm:$0xff] }
  0x86   : > { %1235 = vperm.xlu1 %3768, %v3483_v35   ;;  %1230 = vperm.xlu0 %3767, %v3482_v36   ;;  %v580_v35 = vadd.f32 %v4051_v51, %v567_v26  ;;  %v3417_v36 = vld [vmem:[%s4037_s25 + $0x49] sm:$0xff] }
  0x87   : > { %v609_v52 = vpop.permute.xlu2 %608 }
  0x88   : > { %v4053_v53 = vpop.permute.xlu1 %470  ;;  %v4055_v54 = vpop.permute.xlu0 %460  ;;  %v667_v30 = vmul.f32 %v609_v52, %v589_v24  ;;  %v571_v52 = vmul.f32 %v4045_v49, %v3417_v36  ;;  %v3419_v36 = vld [vmem:[%s4037_s25 + $0x59] sm:$0xff] }
  0x8a   : > { %v584_v1 = vadd.f32 %v4051_v51, %v571_v52 }
  0x8c   : > { %v597_v18 = vmax.f32 %v584_v1, 0.0  ;;  %v382_v1 = vld [vmem:[%s4037_s25 + $0x8] sm:$0xff] }
  0x8d   : > { %1255 = vperm.xlu2 %3769, %v3487_v38   ;;  %v531_v38 = vld [vmem:[%s5565_s2] sm:$0xff]  ;;  %v412_v15 = vmul.f32 %v4045_v49, %v382_v1 }
  0x8e   : > { %1250 = vperm.xlu1 %3768, %v3486_v39   ;;  %1245 = vperm.xlu0 %3767, %v3485_v40   ;;  %v3566_v39 = vld [vmem:[%s3976_s18 + $0x53] sm:$0xff] }
  0x8f   : > { %v624_v57 = vpop.permute.xlu2 %623  ;;  %v3414_v40 = vld [vmem:[%s4037_s25 + $0x31] sm:$0xff]  ;;  %832 = vmatpush.msrb.mxu1 %v531_v38  ;;  %v4148_v38 = vld [vmem:[%s3976_s18 + $0x24] sm:$0xff] }
  0x90   : > { %v4058_v58 = vpop.permute.xlu1 %490  ;;  %v670_v59 = vmul.f32 %v624_v57, %v592_v56  ;;  %v4060_v60 = vpop.permute.xlu0 %485  ;;  %v568_v55 = vmul.f32 %v4045_v49, %v3414_v40  ;;  %v593_v56 = vmax.f32 %v580_v35, 0.0  ;;  %v570_v57 = vmul.f32 %v4045_v49, %v3416_v41  ;;  %v4157_v40 = vld [vmem:[%s3976_s18 + $0x14] sm:$0xff] }
  0x91   : > { %v598_v41 = vmax.f32 %v585_v25, 0.0  ;;  %v383_v25 = vld [vmem:[%s4037_s25 + $0x10] sm:$0xff] }
  0x92   : > { %3440 = vmatmul.msk.f32.vlgmr.msra.gmra.mxu1 %vm682_vm0, %v670_v59 }
  0x95   : > { %1462 = vperm.xlu2 %3769, %v3558_v62   ;;  %v578_v62 = vadd.f32 %v4051_v51, %v565_v48  ;;  %v411_v48 = vmul.f32 %v4045_v49, %v381_v31 }
  0x96   : > { %1457 = vperm.xlu1 %3768, %v3557_v63   ;;  %1260 = vperm.xlu0 %3767, %v3528_v0  }
  0x97   : > { %v4068_v2 = vpop.permute.xlu2 %638 }
  0x98   : > { %v4070_v3 = vpop.permute.xlu1 %505  ;;  %v4072_v4 = vpop.permute.xlu0 %500 }
  0x9d   : > { %1477 = vperm.xlu2 %3769, %v3561_v7   ;;  %v581_v7 = vadd.f32 %v4051_v51, %v568_v55 }
  0x9e   : > { %1472 = vperm.xlu1 %3768, %v3560_v8   ;;  %1467 = vperm.xlu0 %3767, %v3559_v9   ;;  %v583_v9 = vadd.f32 %v4051_v51, %v570_v57 }
  0x9f   : > { %v4083_v13 = vpop.permute.xlu2 %653 }
  0xa0   : > { %v604_v14 = vpop.permute.xlu1 %603  ;;  %v4086_v17 = vpop.permute.xlu0 %515  ;;  %v596_v22 = vmax.f32 %v583_v9, 0.0  ;;  %v4179_v9 = vld [vmem:[%s3976_s18 + $0x3c] sm:$0xff] }
  0xa1   : > { %v666_v16 = vmul.f32 %v604_v14, %v588_v11  ;;  %v3598_v11 = vld [vmem:[%s3976_s18 + $0xc] sm:$0xff]  ;;  %v3568_v14 = vld [vmem:[%s3976_s18 + $0x63] sm:$0xff] }
  0xa3   : > { %3436 = vmatmul.msk.f32.vlgmr.msra.gmra.mxu0 %vm682_vm0, %v666_v16  ;;  %v591_v16 = vmax.f32 %v578_v62, 0.0 }
  0xa5   : > { %1492 = vperm.xlu2 %3769, %v3564_v20   ;;  %v902_v20 = vmul.f32 %v4045_v49, %v3462_v10  ;;  %v4182_v10 = vld [vmem:[%s3976_s18 + $0x34] sm:$0xff] }
  0xa6   : > { %1487 = vperm.xlu1 %3768, %v3563_v21   ;;  %1482 = vperm.xlu0 %3767, %v3562_v23   ;;  %v594_v21 = vmax.f32 %v581_v7, 0.0  ;;  %v3420_v7 = vld [vmem:[%s4037_s25 + $0x61] sm:$0xff] }
  0xa7   : > { %v4102_v28 = vpop.permute.xlu2 %943  ;;  %v915_v33 = vadd.f32 %v4051_v51, %v902_v20 }
  0xa8   : > { %v619_v29 = vpop.permute.xlu1 %618  ;;  %v614_v32 = vpop.permute.xlu0 %613 }
  0xa9   : > { %v668_v63 = vmul.f32 %v614_v32, %v590_v50  ;;  %v669_v26 = vmul.f32 %v619_v29, %v591_v16  ;;  %v582_v32 = vadd.f32 %v4051_v51, %v569_v19  ;;  %v3463_v29 = vld [vmem:[%s4037_s25 + $0xa] sm:$0xff]  ;;  %v928_v52 = vmax.f32 %v915_v33, 0.0  ;;  %v3465_v33 = vld [vmem:[%s4037_s25 + $0x1a] sm:$0xff] }
  0xaa   : > { %v903_v55 = vmul.f32 %v4045_v49, %v3463_v29  ;;  %v3571_v29 = vld [vmem:[%s5565_s2 + $0x48] sm:$0xff] }
  0xab   : > { %3437 = vmatmul.msk.f32.gmra.mxu0 %vm682_vm0, %v667_v30  ;;  %v595_v50 = vmax.f32 %v582_v32, 0.0  ;;  %v1006_v6 = vmul.f32 %v4102_v28, %v928_v52  ;;  %v574_v28 = vmul.f32 %v4045_v49, %v3420_v7  ;;  %v3529_v32 = vld [vmem:[%s5565_s2 + $0x30] sm:$0xff]  ;;  %v3466_v7 = vld [vmem:[%s4037_s25 + $0x22] sm:$0xff] }
  0xac   : > { %1589 = vmatpush.msrb.mxu0 %v3571_v29 }
  0xad   : > { %1507 = vperm.xlu2 %3769, %v3567_v34   ;;  %v673_v5 = vmul.f32 %v4068_v2, %v595_v50  ;;  %v3530_v2 = vld [vmem:[%s5565_s2 + $0x38] sm:$0xff] }
  0xae   : > { %1502 = vperm.xlu1 %3768, %v3566_v39   ;;  %1497 = vperm.xlu0 %3767, %v3565_v43   ;;  %v4151_v39 = vld [vmem:[%s3976_s18 + $0x1c] sm:$0xff]  ;;  %v573_v43 = vmul.f32 %v4045_v49, %v3419_v36 }
  0xaf   : > { %v4121_v59 = vpop.permute.xlu2 %958  ;;  %1332 = vmatpush.msrb.mxu3 %v3530_v2 }
  0xb0   : > { %v634_v61 = vpop.permute.xlu1 %633  ;;  %v629_v0 = vpop.permute.xlu0 %628 }
  0xb1   : > { %v671_v8 = vmul.f32 %v629_v0, %v593_v56  ;;  %v672_v34 = vmul.f32 %v634_v61, %v594_v21  ;;  %v676_v61 = vmul.f32 %v4083_v13, %v598_v41  ;;  %v427_v0 = vadd.f32 %v4051_v51, %v411_v48  ;;  %v3464_v13 = vld [vmem:[%s4037_s25 + $0x12] sm:$0xff]  ;;  %1333 = vmatpush.msrb.mxu3 %v3529_v32 }
  0xb2   : > { %v904_v16 = vmul.f32 %v4045_v49, %v3464_v13  ;;  %v587_v21 = vadd.f32 %v4051_v51, %v574_v28  ;;  %v413_v41 = vmul.f32 %v4045_v49, %v383_v25  ;;  %v905_v48 = vmul.f32 %v4045_v49, %v3465_v33  ;;  %v3680_v13 = vld [vmem:[%s3976_s18 + $0x15] sm:$0xff]  ;;  %v3681_v25 = vld [vmem:[%s3976_s18 + $0x1d] sm:$0xff] }
  0xb3   : > { %3438 = vmatmul.msk.f32.gmra.mxu0 %vm682_vm0, %v668_v63  ;;  %3441 = vmatmul.msk.f32.gmra.mxu1 %vm682_vm0, %v671_v8  ;;  %v586_v63 = vadd.f32 %v4051_v51, %v573_v43  ;;  %v4175_v8 = vadd.f32 %v4051_v51, %v903_v55  ;;  %v906_v28 = vmul.f32 %v4045_v49, %v3466_v7 }
  0xb4   : > { %v600_v36 = vmax.f32 %v587_v21, 0.0  ;;  %v4243_v1 = vadd.f32 %v4051_v51, %v905_v48 }
  0xb5   : > { %1714 = vperm.xlu2 %3769, %v3598_v11   ;;  %v4188_v11 = vld [vmem:[%s3976_s18 + $0x2c] sm:$0xff] }
  0xb6   : > { %1517 = vperm.xlu1 %3768, %v3569_v12   ;;  %1512 = vperm.xlu0 %3767, %v3568_v14   ;;  %v599_v12 = vmax.f32 %v586_v63, 0.0  ;;  %v440_v14 = vmax.f32 %v427_v0, 0.0  ;;  %v429_v63 = vadd.f32 %v4051_v51, %v413_v41  ;;  %v931_v2 = vmax.f32 %v4243_v1, 0.0  ;;  %v386_v41 = vld [vmem:[%s4037_s25 + $0x28] sm:$0xff] }
  0xb7   : > { %v4138_v23 = vpop.permute.xlu2 %973 }
  0xb8   : > { %v649_v24 = vpop.permute.xlu1 %648  ;;  %v644_v30 = vpop.permute.xlu0 %643  ;;  %v1009_v21 = vmul.f32 %v4121_v59, %v931_v2 }
  0xb9   : > { %v675_v27 = vmul.f32 %v649_v24, %v597_v18  ;;  %v674_v35 = vmul.f32 %v644_v30, %v596_v22  ;;  %v929_v18 = vmax.f32 %v4175_v8, 0.0  ;;  %v4207_v30 = vadd.f32 %v4051_v51, %v904_v16 }
  0xbb   : > { %3439 = vmatmul.msk.f32.gmra.mxu0 %vm682_vm0, %v669_v26  ;;  %3445 = vmatmul.msk.f32.vlgmr.msra.gmra.mxu3 %vm682_vm0, %v675_v27  ;;  %v518_v26 = vmul.f32 %v4039_v47, %v440_v14  ;;  %v428_v27 = vadd.f32 %v4051_v51, %v412_v15  ;;  %v4225_v47 = vld [vmem:[%s3976_s18 + $0x44] sm:$0xff]  ;;  %v930_v50 = vmax.f32 %v4207_v30, 0.0 }
  0xbc   : > { %3442 = vmatmul.msk.f32.gmra.mxu1 %vm682_vm0, %v672_v34  ;;  %3444 = vmatmul.msk.f32.vlgmr.msra.gmra.mxu2 %vm682_vm0, %v674_v35  ;;  %v4217_v34 = vld [vmem:[%s3976_s18 + $0x54] sm:$0xff]  ;;  %v4220_v35 = vld [vmem:[%s3976_s18 + $0x4c] sm:$0xff] }
  0xbd   : > { %1729 = vperm.xlu2 %3769, %v4148_v38   ;;  %v441_v43 = vmax.f32 %v428_v27, 0.0 }
  0xbe   : > { %1724 = vperm.xlu1 %3768, %v4151_v39   ;;  %1719 = vperm.xlu0 %3767, %v4157_v40  }
  0xbf   : > { %v4165_v56 = vpop.permute.xlu2 %988  ;;  %v519_v0 = vmul.f32 %v4055_v54, %v441_v43 }
  0xc0   : > { %v664_v57 = vpop.permute.xlu1 %663  ;;  %v659_v62 = vpop.permute.xlu0 %658 }
  0xc1   : > { %v677_v22 = vmul.f32 %v659_v62, %v599_v12 }
  0xc3   : > { %3446 = vmatmul.msk.f32.gmra.mxu3 %vm682_vm0, %v676_v61  ;;  %v678_v61 = vmul.f32 %v664_v57, %v600_v36  ;;  %v442_v57 = vmax.f32 %v429_v63, 0.0  ;;  %v3468_v63 = vld [vmem:[%s4037_s25 + $0x32] sm:$0xff] }
  0xc4   : > { %3443 = vmatmul.msk.f32.gmra.mxu1 %vm682_vm0, %v673_v5  ;;  %3490 = vmatmul.msk.f32.vlgmr.msrb.gmra.mxu2 %vm682_vm0, %v1006_v6  ;;  %v384_v6 = vld [vmem:[%s4037_s25 + $0x18] sm:$0xff] }
  0xc5   : > { %1744 = vperm.xlu2 %3769, %v4179_v9   ;;  %v414_v54 = vmul.f32 %v4045_v49, %v384_v6  ;;  %v520_v16 = vmul.f32 %v4031_v46, %v442_v57  ;;  %v3570_v46 = vld [vmem:[%s5565_s2 + $0x40] sm:$0xff]  ;;  %v3694_v6 = vld [vmem:[%s5565_s2 + $0x78] sm:$0xff] }
  0xc6   : > { %1739 = vperm.xlu1 %3768, %v4182_v10   ;;  %1734 = vperm.xlu0 %3767, %v4188_v11  }
  0xc7   : > { %v4200_v19 = vpop.permute.xlu2 %1003  ;;  %1590 = vmatpush.msrb.mxu0 %v3570_v46  ;;  %2360 = vmatpush.msra.mxu3 %v3694_v6  ;;  %v3723_v46 = vld [vmem:[%s3976_s18 + $0x26] sm:$0xff] }
  0xc8   : > { %v954_v20 = vpop.permute.xlu1 %953  ;;  %v949_v24 = vpop.permute.xlu0 %948 }
  0xc9   : > { %v1007_v31 = vmul.f32 %v949_v24, %v929_v18  ;;  %v1008_v5 = vmul.f32 %v954_v20, %v930_v50  ;;  %v430_v20 = vadd.f32 %v4051_v51, %v414_v54  ;;  %v3467_v24 = vld [vmem:[%s4037_s25 + $0x2a] sm:$0xff] }
  0xca   : > { %v907_v59 = vmul.f32 %v4045_v49, %v3467_v24 }
  0xcb   : > { %3447 = vmatmul.msk.f32.gmra.mxu3 %vm682_vm0, %v677_v22  ;;  %v4270_v22 = vadd.f32 %v4051_v51, %v906_v28  ;;  %v443_v27 = vmax.f32 %v430_v20, 0.0 }
  0xcc   : > { %3449 = vmatmul.msk.f32.vlgmr.msrb.gmra.mxu1 %vm682_vm0, %v518_v26  ;;  %3491 = vmatmul.msk.f32.gmra.mxu2 %vm682_vm0, %v1007_v31  ;;  %v4295_v48 = vadd.f32 %v4051_v51, %v907_v59 }
  0xcd   : > { %1759 = vperm.xlu2 %3769, %v4217_v34   ;;  %v932_v31 = vmax.f32 %v4270_v22, 0.0  ;;  %v521_v43 = vmul.f32 %v4053_v53, %v443_v27  ;;  %v416_v53 = vmul.f32 %v4045_v49, %v386_v41 }
  0xce   : > { %1754 = vperm.xlu1 %3768, %v4220_v35   ;;  %1749 = vperm.xlu0 %3767, %v4225_v47   ;;  %v933_v57 = vmax.f32 %v4295_v48, 0.0 }
  0xcf   : > { %v4236_v52 = vpop.permute.xlu2 %1210 }
  0xd0   : > { %v4238_v55 = vpop.permute.xlu1 %968  ;;  %v964_v62 = vpop.permute.xlu0 %963 }
  0xd3   : > { %3448 = vmatmul.msk.f32.gmra.mxu3 %vm682_vm0, %v678_v61  ;;  %v3653_v61 = vld [vmem:[%s5565_s2 + $0x68] sm:$0xff] }
  0xd4   : > { %3450 = vmatmul.msk.f32.gmra.mxu1 %vm682_vm0, %v519_v0  ;;  %3492 = vmatmul.msk.f32.gmra.mxu2 %vm682_vm0, %v1008_v5  ;;  %v3722_v0 = vld [vmem:[%s3976_s18 + $0x1e] sm:$0xff] }
  0xd5   : > { %1976 = vperm.xlu2 %3769, %v4151_v39   ;;  %v385_v39 = vld [vmem:[%s4037_s25 + $0x20] sm:$0xff]  ;;  %2103 = vmatpush.msra.mxu2 %v3653_v61 }
  0xd6   : > { %2228 = vperm.xlu1 %3768, %v3680_v13   ;;  %1971 = vperm.xlu0 %3767, %v4157_v40   ;;  %v3721_v40 = vld [vmem:[%s3976_s18 + $0x16] sm:$0xff]  ;;  %v415_v26 = vmul.f32 %v4045_v49, %v385_v39  ;;  %v3682_v5 = vld [vmem:[%s3976_s18 + $0x25] sm:$0xff]  ;;  %v908_v13 = vmul.f32 %v4045_v49, %v3468_v63 }
  0xd7   : > { %v4258_v12 = vpop.permute.xlu2 %1225 }
  0xd8   : > { %v4260_v14 = vpop.permute.xlu1 %983  ;;  %v4262_v15 = vpop.permute.xlu0 %978  ;;  %v431_v29 = vadd.f32 %v4051_v51, %v415_v26  ;;  %v4322_v39 = vadd.f32 %v4051_v51, %v908_v13  ;;  %v3683_v26 = vld [vmem:[%s3976_s18 + $0x2d] sm:$0xff] }
  0xda   : > { %v444_v7 = vmax.f32 %v431_v29, 0.0 }
  0xdc   : > { %3451 = vmatmul.msk.f32.gmra.mxu1 %vm682_vm0, %v520_v16  ;;  %3493 = vmatmul.msk.f32.gmra.mxu2 %vm682_vm0, %v1009_v21  ;;  %v432_v16 = vadd.f32 %v4051_v51, %v416_v53  ;;  %v522_v21 = vmul.f32 %v4014_v37, %v444_v7  ;;  %v3735_v37 = vld [vmem:[%s5565_s2 + $0x88] sm:$0xff] }
  0xdd   : > { %1981 = vperm.xlu2 %3769, %v4148_v38   ;;  %v1010_v38 = vmul.f32 %v964_v62, %v932_v31  ;;  %v3612_v62 = vld [vmem:[%s5565_s2 + $0x58] sm:$0xff]  ;;  %2617 = vmatpush.msra.mxu0 %v3735_v37  ;;  %v3724_v53 = vld [vmem:[%s3976_s18 + $0x2e] sm:$0xff] }
  0xde   : > { %2485 = vperm.xlu1 %3768, %v3721_v40   ;;  %2233 = vperm.xlu0 %3767, %v3681_v25   ;;  %v387_v40 = vld [vmem:[%s4037_s25 + $0x30] sm:$0xff]  ;;  %v3469_v25 = vld [vmem:[%s4037_s25 + $0x3a] sm:$0xff]  ;;  %v445_v27 = vmax.f32 %v432_v16, 0.0 }
  0xdf   : > { %v4285_v32 = vpop.permute.xlu2 %1240  ;;  %1846 = vmatpush.msra.mxu1 %v3612_v62  ;;  %v417_v8 = vmul.f32 %v4045_v49, %v387_v40  ;;  %v1265_v40 = vmul.f32 %v4236_v52, %v931_v2 }
  0xe0   : > { %v4287_v33 = vpop.permute.xlu1 %998  ;;  %v4289_v36 = vpop.permute.xlu0 %993 }
  0xe4   : > { %3452 = vmatmul.msk.f32.gmra.mxu1 %vm682_vm0, %v521_v43  ;;  %3494 = vmatmul.msk.f32.gmra.mxu2 %vm682_vm0, %v1010_v38  ;;  %v523_v43 = vmul.f32 %v4022_v42, %v445_v27  ;;  %v433_v38 = vadd.f32 %v4051_v51, %v417_v8  ;;  %v3684_v42 = vld [vmem:[%s3976_s18 + $0x35] sm:$0xff] }
  0xe5   : > { %1986 = vperm.xlu2 %3769, %v4188_v11   ;;  %v1011_v11 = vmul.f32 %v4238_v55, %v933_v57  ;;  %v909_v55 = vmul.f32 %v4045_v49, %v3469_v25  ;;  %v3725_v25 = vld [vmem:[%s3976_s18 + $0x36] sm:$0xff] }
  0xe6   : > { %2490 = vperm.xlu1 %3768, %v3722_v0   ;;  %2238 = vperm.xlu0 %3767, %v3682_v5   ;;  %v3470_v0 = vld [vmem:[%s4037_s25 + $0x42] sm:$0xff]  ;;  %v446_v6 = vmax.f32 %v433_v38, 0.0 }
  0xe7   : > { %v4317_v54 = vpop.permute.xlu2 %1255  ;;  %v4353_v63 = vadd.f32 %v4051_v51, %v909_v55  ;;  %v910_v62 = vmul.f32 %v4045_v49, %v3470_v0  ;;  %v3472_v0 = vld [vmem:[%s4037_s25 + $0x52] sm:$0xff] }
  0xe8   : > { %v1206_v28 = vpop.permute.xlu1 %1205  ;;  %v1201_v20 = vpop.permute.xlu0 %1200  ;;  %v524_v16 = vmul.f32 %v4060_v60, %v446_v6  ;;  %v3685_v60 = vld [vmem:[%s3976_s18 + $0x3d] sm:$0xff]  ;;  %v912_v22 = vmul.f32 %v4045_v49, %v3472_v0 }
  0xe9   : > { %v1263_v24 = vmul.f32 %v1201_v20, %v929_v18  ;;  %v934_v18 = vmax.f32 %v4322_v39, 0.0  ;;  %v1264_v5 = vmul.f32 %v1206_v28, %v930_v50  ;;  %v935_v30 = vmax.f32 %v4353_v63, 0.0 }
  0xea   : > { %v4377_v20 = vadd.f32 %v4051_v51, %v910_v62 }
  0xeb   : > { %3531 = vmatmul.msk.f32.vlgmr.msrb.gmra.mxu3 %vm682_vm0, %v1263_v24  ;;  %v1012_v61 = vmul.f32 %v4138_v23, %v934_v18  ;;  %v3471_v24 = vld [vmem:[%s4037_s25 + $0x4a] sm:$0xff] }
  0xec   : > { %3453 = vmatmul.msk.f32.gmra.mxu1 %vm682_vm0, %v522_v21  ;;  %3495 = vmatmul.msk.f32.gmra.mxu2 %vm682_vm0, %v1011_v11  ;;  %v3544_v21 = vld [vmem:[%s4037_s25 + $0xb] sm:$0xff]  ;;  %v389_v11 = vld [vmem:[%s4037_s25 + $0x40] sm:$0xff]  ;;  %v911_v1 = vmul.f32 %v4045_v49, %v3471_v24  ;;  %v936_v52 = vmax.f32 %v4377_v20, 0.0  ;;  %v4439_v24 = vadd.f32 %v4051_v51, %v912_v22 }
  0xed   : > { %1991 = vperm.xlu2 %3769, %v4182_v10   ;;  %v388_v10 = vld [vmem:[%s4037_s25 + $0x38] sm:$0xff] }
  0xee   : > { %2495 = vperm.xlu1 %3768, %v3723_v46   ;;  %2243 = vperm.xlu0 %3767, %v3683_v26   ;;  %v418_v23 = vmul.f32 %v4045_v49, %v388_v10  ;;  %v1416_v46 = vmul.f32 %v4045_v49, %v3544_v21  ;;  %v4408_v38 = vadd.f32 %v4051_v51, %v911_v1  ;;  %v390_v10 = vld [vmem:[%s4037_s25 + $0x48] sm:$0xff] }
  0xef   : > { %v4343_v59 = vpop.permute.xlu2 %1462 }
  0xf0   : > { %v4345_v29 = vpop.permute.xlu1 %1220  ;;  %v1216_v41 = vpop.permute.xlu0 %1215  ;;  %v434_v28 = vadd.f32 %v4051_v51, %v418_v23  ;;  %v1429_v8 = vadd.f32 %v4051_v51, %v1416_v46  ;;  %v937_v62 = vmax.f32 %v4408_v38, 0.0 }
  0xf1   : > { %v1267_v46 = vmul.f32 %v4345_v29, %v933_v57  ;;  %v938_v57 = vmax.f32 %v4439_v24, 0.0 }
  0xf2   : > { %v447_v26 = vmax.f32 %v434_v28, 0.0  ;;  %v1442_v23 = vmax.f32 %v1429_v8, 0.0 }
  0xf3   : > { %3532 = vmatmul.msk.f32.gmra.mxu3 %vm682_vm0, %v1264_v5  ;;  %v1266_v5 = vmul.f32 %v1216_v41, %v932_v31 }
  0xf4   : > { %3454 = vmatmul.msk.f32.gmra.mxu1 %vm682_vm0, %v523_v43  ;;  %3496 = vmatmul.msk.f32.gmra.mxu2 %vm682_vm0, %v1012_v61  ;;  %v525_v43 = vmul.f32 %v4058_v58, %v447_v26  ;;  %v3545_v61 = vld [vmem:[%s4037_s25 + $0x13] sm:$0xff] }
  0xf5   : > { %1996 = vperm.xlu2 %3769, %v4179_v9   ;;  %v1013_v9 = vmul.f32 %v4262_v15, %v935_v30  ;;  %v419_v15 = vmul.f32 %v4045_v49, %v389_v11  ;;  %v1417_v58 = vmul.f32 %v4045_v49, %v3545_v61 }
  0xf6   : > { %2500 = vperm.xlu1 %3768, %v3724_v53   ;;  %2248 = vperm.xlu0 %3767, %v3684_v42   ;;  %v3726_v53 = vld [vmem:[%s3976_s18 + $0x3e] sm:$0xff] }
  0xf7   : > { %v4368_v50 = vpop.permute.xlu2 %1477  ;;  %v435_v55 = vadd.f32 %v4051_v51, %v419_v15  ;;  %v3686_v42 = vld [vmem:[%s3976_s18 + $0x45] sm:$0xff]  ;;  %v1430_v28 = vadd.f32 %v4051_v51, %v1417_v58 }
  0xf8   : > { %v4370_v7 = vpop.permute.xlu1 %1235  ;;  %v4372_v13 = vpop.permute.xlu0 %1230  ;;  %v3727_v15 = vld [vmem:[%s3976_s18 + $0x46] sm:$0xff] }
  0xf9   : > { %v448_v6 = vmax.f32 %v435_v55, 0.0  ;;  %v3474_v58 = vld [vmem:[%s4037_s25 + $0x62] sm:$0xff] }
  0xfb   : > { %3533 = vmatmul.msk.f32.gmra.mxu3 %vm682_vm0, %v1265_v40  ;;  %v526_v21 = vmul.f32 %v4027_v44, %v448_v6  ;;  %v3546_v40 = vld [vmem:[%s4037_s25 + $0x1b] sm:$0xff]  ;;  %v3687_v44 = vld [vmem:[%s3976_s18 + $0x4d] sm:$0xff] }
  0xfc   : > { %3455 = vmatmul.msk.f32.gmra.mxu1 %vm682_vm0, %v524_v16  ;;  %3497 = vmatmul.msk.f32.gmra.mxu2 %vm682_vm0, %v1013_v9  ;;  %v1418_v26 = vmul.f32 %v4045_v49, %v3546_v40  ;;  %v3728_v6 = vld [vmem:[%s3976_s18 + $0x4e] sm:$0xff] }
  0xfd   : > { %2001 = vperm.xlu2 %3769, %v4225_v47   ;;  %v1014_v47 = vmul.f32 %v4260_v14, %v936_v52  ;;  %v420_v14 = vmul.f32 %v4045_v49, %v390_v10  ;;  %v392_v10 = vld [vmem:[%s4037_s25 + $0x58] sm:$0xff] }
  0xfe   : > { %2505 = vperm.xlu1 %3768, %v3725_v25   ;;  %2253 = vperm.xlu0 %3767, %v3685_v60   ;;  %v391_v25 = vld [vmem:[%s4037_s25 + $0x50] sm:$0xff]  ;;  %v3473_v60 = vld [vmem:[%s4037_s25 + $0x5a] sm:$0xff]  ;;  %v1431_v61 = vadd.f32 %v4051_v51, %v1418_v26  ;;  %v422_v39 = vmul.f32 %v4045_v49, %v392_v10 }
  0xff   : > { %v4398_v2 = vpop.permute.xlu2 %1492  ;;  %v436_v11 = vadd.f32 %v4051_v51, %v420_v14  ;;  %v421_v1 = vmul.f32 %v4045_v49, %v391_v25  ;;  %v913_v48 = vmul.f32 %v4045_v49, %v3473_v60  ;;  %v393_v26 = vld [vmem:[%s4037_s25 + $0x60] sm:$0xff] }
 0x100   : > { %v4400_v37 = vpop.permute.xlu1 %1250  ;;  %v4402_v27 = vpop.permute.xlu0 %1245  ;;  %v1444_v22 = vmax.f32 %v1431_v61, 0.0  ;;  %v438_v60 = vadd.f32 %v4051_v51, %v422_v39  ;;  %v423_v63 = vmul.f32 %v4045_v49, %v393_v26 }
 0x101   : > { %v449_v8 = vmax.f32 %v436_v11, 0.0  ;;  %v437_v0 = vadd.f32 %v4051_v51, %v421_v1  ;;  %v1269_v1 = vmul.f32 %v4372_v13, %v935_v30  ;;  %v3734_v13 = vld [vmem:[%s5565_s2 + $0x80] sm:$0xff] }
 0x102   : > { %2618 = vmatpush.msra.mxu0 %v3734_v13  ;;  %v3627_v13 = vld [vmem:[%s4037_s25 + $0x1c] sm:$0xff] }
 0x103   : > { %3534 = vmatmul.msk.f32.gmra.mxu3 %vm682_vm0, %v1266_v5  ;;  %v527_v5 = vmul.f32 %v4072_v4, %v449_v8  ;;  %v4483_v4 = vld [vmem:[%s3976_s18 + $0x5c] sm:$0xff]  ;;  %v4523_v8 = vld [vmem:[%s3976_s18 + $0x64] sm:$0xff] }
 0x104   : > { %3456 = vmatmul.msk.f32.gmra.mxu1 %vm682_vm0, %v525_v43  ;;  %3498 = vmatmul.msk.f32.gmra.mxu2 %vm682_vm0, %v1014_v47 }
 0x105   : > { %2006 = vperm.xlu2 %3769, %v4220_v35   ;;  %v1015_v35 = vmul.f32 %v4165_v56, %v937_v62  ;;  %v1443_v56 = vmax.f32 %v1430_v28, 0.0 }
 0x106   : > { %2510 = vperm.xlu1 %3768, %v3726_v53   ;;  %2258 = vperm.xlu0 %3767, %v3686_v42   ;;  %v1016_v53 = vmul.f32 %v4289_v36, %v938_v57  ;;  %v3547_v42 = vld [vmem:[%s4037_s25 + $0x23] sm:$0xff]  ;;  %v3688_v36 = vld [vmem:[%s3976_s18 + $0x55] sm:$0xff] }
 0x107   : > { %v4428_v31 = vpop.permute.xlu2 %1507  ;;  %v1521_v43 = vmul.f32 %v4343_v59, %v1443_v56  ;;  %v3611_v59 = vld [vmem:[%s5565_s2 + $0x50] sm:$0xff]  ;;  %v1419_v14 = vmul.f32 %v4045_v49, %v3547_v42 }
 0x108   : > { %v1458_v41 = vpop.permute.xlu1 %1457  ;;  %v4431_v9 = vpop.permute.xlu0 %1260  ;;  %1847 = vmatpush.msra.mxu1 %v3611_v59  ;;  %v3548_v56 = vld [vmem:[%s4037_s25 + $0x2b] sm:$0xff]  ;;  %v439_v59 = vadd.f32 %v4051_v51, %v423_v63 }
 0x109   : > { %v1520_v16 = vmul.f32 %v1458_v41, %v1442_v23  ;;  %v1268_v23 = vmul.f32 %v4258_v12, %v934_v18  ;;  %v3652_v12 = vld [vmem:[%s5565_s2 + $0x60] sm:$0xff]  ;;  %v450_v18 = vmax.f32 %v437_v0, 0.0  ;;  %v914_v41 = vmul.f32 %v4045_v49, %v3474_v58 }
 0x10a   : > { %2104 = vmatpush.msra.mxu2 %v3652_v12 }
 0x10b   : > { %3572 = vmatmul.msk.f32.vlgmr.msrb.gmra.mxu0 %vm682_vm0, %v1520_v16  ;;  %3535 = vmatmul.msk.f32.gmra.mxu3 %vm682_vm0, %v1267_v46  ;;  %v3693_v16 = vld [vmem:[%s5565_s2 + $0x70] sm:$0xff]  ;;  %v528_v46 = vmul.f32 %v4070_v3, %v450_v18  ;;  %v3689_v3 = vld [vmem:[%s3976_s18 + $0x5d] sm:$0xff] }
 0x10c   : > { %3457 = vmatmul.msk.f32.gmra.mxu1 %vm682_vm0, %v526_v21  ;;  %3499 = vmatmul.msk.f32.gmra.mxu2 %vm682_vm0, %v1015_v35  ;;  %v1432_v35 = vadd.f32 %v4051_v51, %v1419_v14  ;;  %v3730_v14 = vld [vmem:[%s3976_s18 + $0x5e] sm:$0xff] }
 0x10d   : > { %2011 = vperm.xlu2 %3769, %v4217_v34   ;;  %v4468_v34 = vadd.f32 %v4051_v51, %v913_v48  ;;  %2361 = vmatpush.msra.mxu3 %v3693_v16  ;;  %v3729_v48 = vld [vmem:[%s3976_s18 + $0x56] sm:$0xff] }
 0x10e   : > { %2515 = vperm.xlu1 %3768, %v3727_v15   ;;  %2263 = vperm.xlu0 %3767, %v3687_v44   ;;  %v4511_v15 = vadd.f32 %v4051_v51, %v914_v41 }
 0x10f   : > { %v4458_v29 = vpop.permute.xlu2 %1714  ;;  %v939_v28 = vmax.f32 %v4468_v34, 0.0 }
 0x110   : > { %v4460_v55 = vpop.permute.xlu1 %1472  ;;  %v1468_v47 = vpop.permute.xlu0 %1467  ;;  %v940_v30 = vmax.f32 %v4511_v15, 0.0 }
 0x111   : > { %v1522_v40 = vmul.f32 %v1468_v47, %v1444_v22  ;;  %v1017_v44 = vmul.f32 %v4287_v33, %v939_v28  ;;  %v1445_v47 = vmax.f32 %v1432_v35, 0.0  ;;  %v451_v33 = vmax.f32 %v438_v60, 0.0  ;;  %v4574_v35 = vpop.f32.mrf.mxu1  ;;  %v3731_v60 = vld [vmem:[%s3976_s18 + $0x66] sm:$0xff] }
 0x112   : > { %v1018_v58 = vmul.f32 %v4200_v19, %v940_v30  ;;  %v452_v19 = vmax.f32 %v439_v59, 0.0  ;;  %v4625_v59 = vld [vmem:[%s5568_s5] ss:$0 sm:$0xff] }
 0x113   : > { %3573 = vmatmul.msk.f32.gmra.mxu0 %vm682_vm0, %v1521_v43  ;;  %3536 = vmatmul.msk.f32.gmra.mxu3 %vm682_vm0, %v1268_v23  ;;  %v1420_v43 = vmul.f32 %v4045_v49, %v3548_v56  ;;  %v529_v42 = vmul.f32 %v4029_v45, %v451_v33  ;;  %v3549_v23 = vld [vmem:[%s4037_s25 + $0x33] sm:$0xff]  ;;  %v3690_v45 = vld [vmem:[%s3976_s18 + $0x65] sm:$0xff] }
 0x114   : > { %3458 = vmatmul.msk.f32.gmra.mxu1 %vm682_vm0, %v527_v5  ;;  %3500 = vmatmul.msk.f32.gmra.mxu2 %vm682_vm0, %v1016_v53  ;;  %v1523_v5 = vmul.f32 %v4460_v55, %v1445_v47  ;;  %v1421_v22 = vmul.f32 %v4045_v49, %v3549_v23  ;;  %v530_v41 = vmul.f32 %v4086_v17, %v452_v19  ;;  %v3733_v19 = vld [vmem:[%s3976_s18 + $0x76] sm:$0xff] }
 0x115   : > { %2016 = vperm.xlu2 %3769, %v4483_v4   ;;  %v1433_v0 = vadd.f32 %v4051_v51, %v1420_v43  ;;  %v3551_v43 = vld [vmem:[%s4037_s25 + $0x43] sm:$0xff] }
 0x116   : > { %2520 = vperm.xlu1 %3768, %v3728_v6   ;;  %2268 = vperm.xlu0 %3767, %v3688_v36   ;;  %v1270_v6 = vmul.f32 %v4370_v7, %v936_v52  ;;  %v3585_v36 = vld [vmem:[%s4037_s25 + $0xc] sm:$0xff]  ;;  %v1434_v39 = vadd.f32 %v4051_v51, %v1421_v22  ;;  %v3588_v22 = vld [vmem:[%s4037_s25 + $0x24] sm:$0xff] }
 0x117   : > { %v4501_v21 = vpop.permute.xlu2 %1729  ;;  %v1446_v55 = vmax.f32 %v1433_v0, 0.0  ;;  %v1673_v20 = vmul.f32 %v4045_v49, %v3585_v36  ;;  %v3692_v0 = vld [vmem:[%s3976_s18 + $0x75] sm:$0xff]  ;;  %v3552_v36 = vld [vmem:[%s4037_s25 + $0x4b] sm:$0xff] }
 0x118   : > { %v4503_v11 = vpop.permute.xlu1 %1487  ;;  %v4506_v25 = vpop.permute.xlu0 %1482  ;;  %v1447_v56 = vmax.f32 %v1434_v39, 0.0 }
 0x119   : > { %v1524_v12 = vmul.f32 %v4368_v50, %v1446_v55  ;;  %v1686_v16 = vadd.f32 %v4051_v51, %v1673_v20  ;;  %v3586_v50 = vld [vmem:[%s4037_s25 + $0x14] sm:$0xff]  ;;  %v1273_v55 = vmul.f32 %v4400_v37, %v939_v28 }
 0x11a   : > { %v3732_v20 = vld [vmem:[%s3976_s18 + $0x6e] sm:$0xff] }
 0x11b   : > { %3574 = vmatmul.msk.f32.gmra.mxu0 %vm682_vm0, %v1522_v40  ;;  %3537 = vmatmul.msk.f32.gmra.mxu3 %vm682_vm0, %v1269_v1  ;;  %v1271_v40 = vmul.f32 %v4285_v32, %v937_v62  ;;  %v1699_v26 = vmax.f32 %v1686_v16, 0.0  ;;  %v1674_v32 = vmul.f32 %v4045_v49, %v3586_v50 }
 0x11c   : > { %3459 = vmatmul.msk.f32.gmra.mxu1 %vm682_vm0, %v528_v46  ;;  %3501 = vmatmul.msk.f32.gmra.mxu2 %vm682_vm0, %v1017_v44  ;;  %v3691_v46 = vld [vmem:[%s3976_s18 + $0x6d] sm:$0xff] }
 0x11d   : > { %2021 = vperm.xlu2 %3769, %v4523_v8   ;;  %v3650_v44 = vld [vmem:[%s3976_s18 + $0x6c] sm:$0xff]  ;;  %v1777_v47 = vmul.f32 %v4458_v29, %v1699_v26  ;;  %v4596_v33 = vadd.f32 %v4051_v51, %v1674_v32  ;;  %v4611_v29 = vld [vmem:[%s5567_s4] ss:$0 sm:$0xff]  ;;  %v1274_v26 = vmul.f32 %v4317_v54, %v940_v30 }
 0x11e   : > { %2525 = vperm.xlu1 %3768, %v3729_v48   ;;  %2273 = vperm.xlu0 %3767, %v3689_v3   ;;  %v1525_v48 = vmul.f32 %v4506_v25, %v1447_v56  ;;  %v1424_v39 = vmul.f32 %v4611_v29, %v3552_v36 }
 0x11f   : > { %v4537_v61 = vpop.permute.xlu2 %1744  ;;  %v1700_v24 = vmax.f32 %v4596_v33, 0.0 }
 0x120   : > { %v4539_v10 = vpop.permute.xlu1 %1502  ;;  %v4543_v53 = vpop.permute.xlu0 %1497 }
 0x123   : > { %3575 = vmatmul.msk.f32.gmra.mxu0 %vm682_vm0, %v1523_v5  ;;  %3538 = vmatmul.msk.f32.gmra.mxu3 %vm682_vm0, %v1270_v6  ;;  %v3651_v5 = vld [vmem:[%s3976_s18 + $0x74] sm:$0xff] }
 0x124   : > { %3460 = vmatmul.msk.f32.gmra.mxu1 %vm682_vm0, %v529_v42  ;;  %3502 = vmatmul.msk.f32.gmra.mxu2 %vm682_vm0, %v1018_v58 }
 0x125   : > { %1764 = vperm.xlu2 %3769, %v4483_v4   ;;  %v3550_v4 = vld [vmem:[%s4037_s25 + $0x3b] sm:$0xff] }
 0x126   : > { %2530 = vperm.xlu1 %3768, %v3730_v14   ;;  %2278 = vperm.xlu0 %3767, %v3690_v45   ;;  %v1422_v17 = vmul.f32 %v4045_v49, %v3550_v4  ;;  %v1272_v49 = vmul.f32 %v4402_v27, %v938_v57  ;;  %v1931_v27 = vmul.f32 %v4611_v29, %v3627_v13 }
 0x127   : > { %v4564_v7 = vpop.permute.xlu2 %1759 }
 0x128   : > { %v4566_v52 = vpop.permute.xlu1 %1517  ;;  %v4570_v18 = vpop.permute.xlu0 %1512  ;;  %v1435_v1 = vadd.f32 %v4051_v51, %v1422_v17  ;;  %v1423_v51 = vmul.f32 %v4611_v29, %v3551_v43  ;;  %v4633_v14 = vadd.f32 %v4625_v59, %v1931_v27  ;;  %v3554_v27 = vld [vmem:[%s4037_s25 + $0x5b] sm:$0xff] }
 0x12a   : > { %v1448_v25 = vmax.f32 %v1435_v1, 0.0  ;;  %v1436_v58 = vadd.f32 %v4625_v59, %v1423_v51  ;;  %v1957_v34 = vmax.f32 %v4633_v14, 0.0  ;;  %v3589_v1 = vld [vmem:[%s4037_s25 + $0x2c] sm:$0xff] }
 0x12b   : > { %3576 = vmatmul.msk.f32.gmra.mxu0 %vm682_vm0, %v1524_v12  ;;  %3539 = vmatmul.msk.f32.gmra.mxu3 %vm682_vm0, %v1271_v40  ;;  %v1677_v54 = vmul.f32 %v4611_v29, %v3589_v1 }
 0x12c   : > { %3461 = vmatmul.msk.f32.gmra.mxu1 %vm682_vm0, %v530_v41  ;;  %v1526_v23 = vmul.f32 %v4503_v11, %v1448_v25  ;;  %v3515_v11 = vld [vmem:[%s4037_s25 + $0x6a] sm:$0xff]  ;;  %v1449_v12 = vmax.f32 %v1436_v58, 0.0  ;;  %v1676_v41 = vmul.f32 %v4611_v29, %v3588_v22  ;;  %v3590_v22 = vld [vmem:[%s4037_s25 + $0x34] sm:$0xff] }
 0x12d   : > { %2535 = vperm.xlu2 %3769, %v3731_v60   ;;  %v1171_v37 = vmul.f32 %v4611_v29, %v3515_v11  ;;  %v1437_v60 = vadd.f32 %v4625_v59, %v1424_v39 }
 0x12e   : > { %2283 = vperm.xlu1 %3768, %v3691_v46   ;;  %2026 = vperm.xlu0 %3767, %v3650_v44   ;;  %v1527_v40 = vmul.f32 %v4398_v2, %v1449_v12  ;;  %v4664_v50 = vadd.f32 %v4625_v59, %v1676_v41  ;;  %v4675_v2 = vpop.f32.mrf.mxu0 }
 0x12f   : > { %v4589_v38 = vpop.permute.xlu2 %1976  ;;  %v1184_v32 = vadd.f32 %v4625_v59, %v1171_v37 }
 0x130   : > { %v1725_v62 = vpop.permute.xlu1 %1724  ;;  %v1720_v3 = vpop.permute.xlu0 %1719  ;;  %v1702_v15 = vmax.f32 %v4664_v50, 0.0 }
 0x131   : > { %v4598_v63 = vpop.f32.mrf.mxu1  ;;  %v1779_v17 = vmul.f32 %v1957_v34, %v1725_v62  ;;  %v1450_v62 = vmax.f32 %v1437_v60, 0.0  ;;  %v1197_v30 = vmax.f32 %v1184_v32, 0.0 }
 0x132   : > { %v1780_v58 = vmul.f32 %v4501_v21, %v1702_v15  ;;  %v3668_v21 = vld [vmem:[%s4037_s25 + $0x1d] sm:$0xff] }
 0x133   : > { %3577 = vmatmul.msk.f32.gmra.mxu0 %vm682_vm0, %v1525_v48  ;;  %3540 = vmatmul.msk.f32.gmra.mxu3 %vm682_vm0, %v1272_v49  ;;  %v3667_v48 = vld [vmem:[%s4037_s25 + $0x15] sm:$0xff]  ;;  %v2188_v39 = vmul.f32 %v4611_v29, %v3668_v21 }
 0x134   : > { %3613 = vmatmul.msk.f32.vlgmr.msra.gmra.mxu1 %vm682_vm0, %v1777_v47  ;;  %v2187_v47 = vmul.f32 %v4611_v29, %v3667_v48 }
 0x135   : > { %2288 = vperm.xlu2 %3769, %v3692_v0  }
 0x136   : > { %2031 = vperm.xlu1 %3768, %v3651_v5   ;;  %1769 = vperm.xlu0 %3767, %v4523_v8   ;;  %v1778_v8 = vmul.f32 %v1720_v3, %v1700_v24  ;;  %v1528_v5 = vmul.f32 %v4543_v53, %v1450_v62  ;;  %v2200_v53 = vadd.f32 %v4625_v59, %v2187_v47  ;;  %v4713_v33 = vpop.f32.mrf.mxu0 }
 0x137   : > { %v4618_v57 = vpop.permute.xlu2 %1981 }
 0x138   : > { %v4620_v42 = vpop.permute.xlu1 %1739  ;;  %v4629_v6 = vpop.permute.xlu0 %1734  ;;  %v2036_v21 = vmul.f32 %v4618_v57, %v1702_v15 }
 0x139   : > { %v4637_v45 = vpop.f32.mrf.mxu1 }
 0x13b   : > { %3578 = vmatmul.msk.f32.gmra.mxu0 %vm682_vm0, %v1526_v23  ;;  %3541 = vmatmul.msk.f32.gmra.mxu3 %vm682_vm0, %v1273_v55  ;;  %v4699_v23 = vadd.f32 %v4625_v59, %v1677_v54  ;;  %v1275_v55 = vmul.f32 %v4431_v9, %v1197_v30  ;;  %v1678_v9 = vmul.f32 %v4611_v29, %v3590_v22 }
 0x13c   : > { %3614 = vmatmul.msk.f32.gmra.mxu1 %vm682_vm0, %v1778_v8 }
 0x13d   : > { %2545 = vperm.xlu2 %3769, %v3733_v19   ;;  %v1426_v19 = vmul.f32 %v4611_v29, %v3554_v27  ;;  %v4732_v32 = vadd.f32 %v4625_v59, %v1678_v9  ;;  %v3592_v9 = vld [vmem:[%s4037_s25 + $0x44] sm:$0xff] }
 0x13e   : > { %1774 = vperm.xlu1 %3768, %v3650_v44   ;;  %2540 = vperm.xlu0 %3767, %v3732_v20   ;;  %v3553_v44 = vld [vmem:[%s4037_s25 + $0x53] sm:$0xff]  ;;  %v4692_v51 = vpop.f32.mrf.mxu3  ;;  %v2213_v20 = vmax.f32 %v2200_v53, 0.0  ;;  %v745_v47 = vpop.f32.mrf.mxu0  ;;  %v3556_v53 = vld [vmem:[%s4037_s25 + $0x6b] sm:$0xff] }
 0x13f   : > { %v4653_v28 = vpop.f32.mrf.mxu2  ;;  %v4655_v16 = vpop.permute.xlu2 %1986  ;;  %v1425_v3 = vmul.f32 %v4611_v29, %v3553_v44  ;;  %v1704_v30 = vmax.f32 %v4732_v32, 0.0  ;;  %v1428_v50 = vmul.f32 %v4611_v29, %v3556_v53 }
 0x140   : > { %v4657_v4 = vpop.permute.xlu1 %1754  ;;  %v4661_v46 = vpop.permute.xlu0 %1749 }
 0x141   : > { %v4669_v56 = vpop.f32.mrf.mxu1  ;;  %v1438_v0 = vadd.f32 %v4625_v59, %v1425_v3  ;;  %v3591_v3 = vld [vmem:[%s4037_s25 + $0x3c] sm:$0xff] }
 0x143   : > { %3579 = vmatmul.msk.f32.gmra.mxu0 %vm682_vm0, %v1527_v40  ;;  %3542 = vmatmul.msk.f32.gmra.mxu3 %vm682_vm0, %v1274_v26  ;;  %v1451_v11 = vmax.f32 %v1438_v0, 0.0  ;;  %v1439_v40 = vadd.f32 %v4625_v59, %v1426_v19  ;;  %v2035_v26 = vmul.f32 %v4589_v38, %v1957_v34  ;;  %v3669_v38 = vld [vmem:[%s4037_s25 + $0x25] sm:$0xff]  ;;  %v1782_v19 = vmul.f32 %v4620_v42, %v1704_v30 }
 0x144   : > { %3615 = vmatmul.msk.f32.gmra.mxu1 %vm682_vm0, %v1779_v17  ;;  %v3555_v17 = vld [vmem:[%s4037_s25 + $0x63] sm:$0xff] }
 0x145   : > { %v1529_v60 = vmul.f32 %v4539_v10, %v1451_v11  ;;  %v2201_v10 = vadd.f32 %v4625_v59, %v2188_v39  ;;  %v1452_v14 = vmax.f32 %v1439_v40, 0.0  ;;  %v1427_v34 = vmul.f32 %v4611_v29, %v3555_v17  ;;  %v3670_v40 = vld [vmem:[%s4037_s25 + $0x2d] sm:$0xff] }
 0x146   : > { %v4740_v62 = vpop.f32.mrf.mxu3 }
 0x147   : > { %v4685_v43 = vpop.f32.mrf.mxu2  ;;  %v4688_v49 = vpop.permute.xlu2 %1991 }
 0x148   : > { %v2229_v13 = vpop.permute.xlu1 %2228  ;;  %v1972_v25 = vpop.permute.xlu0 %1971 }
 0x149   : > { %v2034_v36 = vmul.f32 %v1972_v25, %v1700_v24  ;;  %v4703_v8 = vpop.f32.mrf.mxu1  ;;  %v1703_v24 = vmax.f32 %v4699_v23, 0.0  ;;  %v2291_v54 = vmul.f32 %v2229_v13, %v2213_v20  ;;  %v2214_v13 = vmax.f32 %v2201_v10, 0.0 }
 0x14a   : > { %v1441_v10 = vadd.f32 %v4625_v59, %v1428_v50 }
 0x14b   : > { %3580 = vmatmul.msk.f32.gmra.mxu0 %vm682_vm0, %v1528_v5  ;;  %3654 = vmatmul.msk.f32.vlgmr.msra.gmra.mxu2 %vm682_vm0, %v2034_v36  ;;  %v1781_v1 = vmul.f32 %v4629_v6, %v1703_v24  ;;  %v1679_v6 = vmul.f32 %v4611_v29, %v3591_v3  ;;  %v2189_v5 = vmul.f32 %v4611_v29, %v3669_v38 }
 0x14c   : > { %3616 = vmatmul.msk.f32.gmra.mxu1 %vm682_vm0, %v1780_v58  ;;  %3543 = vmatmul.msk.f32.gmra.mxu3 %vm682_vm0, %v1275_v55  ;;  %v1530_v58 = vmul.f32 %v4428_v31, %v1452_v14  ;;  %v1440_v36 = vadd.f32 %v4625_v59, %v1427_v34  ;;  %v1454_v23 = vmax.f32 %v1441_v10, 0.0 }
 0x14d   : > { %v4759_v22 = vadd.f32 %v4625_v59, %v1679_v6  ;;  %v2202_v31 = vadd.f32 %v4625_v59, %v2189_v5  ;;  %v748_v6 = vpop.f32.mrf.mxu0 }
 0x14e   : > { %v1453_v57 = vmax.f32 %v1440_v36, 0.0  ;;  %v4775_v15 = vpop.f32.mrf.mxu3 }
 0x14f   : > { %v4718_v12 = vpop.f32.mrf.mxu2  ;;  %v4721_v41 = vpop.permute.xlu2 %1996  ;;  %v2215_v17 = vmax.f32 %v2202_v31, 0.0 }
 0x150   : > { %v4723_v37 = vpop.permute.xlu1 %2485  ;;  %v2234_v44 = vpop.permute.xlu0 %2233  ;;  %v1531_v38 = vmul.f32 %v4570_v18, %v1453_v57 }
 0x151   : > { %v4737_v48 = vpop.f32.mrf.mxu1  ;;  %v2292_v20 = vmul.f32 %v2234_v44, %v2214_v13  ;;  %v1680_v44 = vmul.f32 %v4611_v29, %v3592_v9 }
 0x153   : > { %3581 = vmatmul.msk.f32.gmra.mxu0 %vm682_vm0, %v1529_v60  ;;  %3655 = vmatmul.msk.f32.gmra.mxu2 %vm682_vm0, %v2035_v26  ;;  %v1705_v60 = vmax.f32 %v4759_v22, 0.0  ;;  %v4796_v13 = vadd.f32 %v4625_v59, %v1680_v44 }
 0x154   : > { %3617 = vmatmul.msk.f32.gmra.mxu1 %vm682_vm0, %v1781_v1  ;;  %3695 = vmatmul.msk.f32.vlgmr.msra.gmra.mxu3 %vm682_vm0, %v2291_v54  ;;  %v2190_v1 = vmul.f32 %v4611_v29, %v3670_v40  ;;  %v1532_v40 = vmul.f32 %v4566_v52, %v1454_v23 }
 0x155   : > { %v1783_v34 = vmul.f32 %v4537_v61, %v1705_v60  ;;  %v3671_v61 = vld [vmem:[%s4037_s25 + $0x35] sm:$0xff] }
 0x156   : > { %v2203_v53 = vadd.f32 %v4625_v59, %v2190_v1  ;;  %v3709_v1 = vld [vmem:[%s4037_s25 + $0x1e] sm:$0xff] }
 0x157   : > { %v1084_v0 = vpop.f32.mrf.mxu2  ;;  %v4752_v25 = vpop.permute.xlu2 %2001  ;;  %v2445_v32 = vmul.f32 %v4611_v29, %v3709_v1 }
 0x158   : > { %v4754_v27 = vpop.permute.xlu1 %2490  ;;  %v2239_v55 = vpop.permute.xlu0 %2238 }
 0x159   : > { %v840_v11 = vpop.f32.mrf.mxu1  ;;  %v2293_v36 = vmul.f32 %v2239_v55, %v2215_v17 }
 0x15a   : > { %v841_v39 = vadd.f32 %v840_v11, %v745_v47  ;;  %v2037_v47 = vmul.f32 %v4655_v16, %v1703_v24  ;;  %v2216_v11 = vmax.f32 %v2203_v53, 0.0 }
 0x15b   : > { %3582 = vmatmul.msk.f32.gmra.mxu0 %vm682_vm0, %v1530_v58  ;;  %3656 = vmatmul.msk.f32.gmra.mxu2 %vm682_vm0, %v2036_v21  ;;  %v3593_v58 = vld [vmem:[%s4037_s25 + $0x4c] sm:$0xff]  ;;  %v1706_v21 = vmax.f32 %v4796_v13, 0.0 }
 0x15c   : > { %3618 = vmatmul.msk.f32.gmra.mxu1 %vm682_vm0, %v1782_v19  ;;  %3696 = vmatmul.msk.f32.gmra.mxu3 %vm682_vm0, %v2292_v20  ;;  %v4778_v42 = vadd.f32 %v1084_v0, %v841_v39  ;;  %v3708_v0 = vld [vmem:[%s4037_s25 + $0x16] sm:$0xff]  ;;  %v1681_v55 = vmul.f32 %v4611_v29, %v3593_v58  ;;  %v4811_v19 = vpop.f32.mrf.mxu3  ;;  %v2191_v20 = vmul.f32 %v4611_v29, %v3671_v61 }
 0x15d   : > { %v2444_v16 = vmul.f32 %v4611_v29, %v3708_v0  ;;  %v1784_v17 = vmul.f32 %v4661_v46, %v1706_v21 }
 0x15e   : > { %v4821_v44 = vadd.f32 %v4625_v59, %v1681_v55  ;;  %v2204_v52 = vadd.f32 %v4625_v59, %v2191_v20 }
 0x15f   : > { %v1087_v26 = vpop.f32.mrf.mxu2  ;;  %v4783_v3 = vpop.permute.xlu2 %2006  ;;  %v2457_v50 = vadd.f32 %v4625_v59, %v2444_v16 }
 0x160   : > { %v4785_v54 = vpop.permute.xlu1 %2495  ;;  %v2244_v14 = vpop.permute.xlu0 %2243 }
 0x161   : > { %v843_v5 = vpop.f32.mrf.mxu1  ;;  %v2470_v46 = vmax.f32 %v2457_v50, 0.0 }
 0x162   : > { %v844_v18 = vadd.f32 %v843_v5, %v748_v6 }
 0x163   : > { %3583 = vmatmul.msk.f32.gmra.mxu0 %vm682_vm0, %v1531_v38  ;;  %3657 = vmatmul.msk.f32.gmra.mxu2 %vm682_vm0, %v2037_v47  ;;  %v3594_v38 = vld [vmem:[%s4037_s25 + $0x54] sm:$0xff]  ;;  %v3672_v47 = vld [vmem:[%s4037_s25 + $0x3d] sm:$0xff]  ;;  %v2548_v53 = vmul.f32 %v4723_v37, %v2470_v46 }
 0x164   : > { %3619 = vmatmul.msk.f32.gmra.mxu1 %vm682_vm0, %v1783_v34  ;;  %3697 = vmatmul.msk.f32.gmra.mxu3 %vm682_vm0, %v2293_v36  ;;  %v4807_v24 = vadd.f32 %v1087_v26, %v844_v18  ;;  %v2038_v26 = vmul.f32 %v4688_v49, %v1704_v30  ;;  %v2294_v34 = vmul.f32 %v2244_v14, %v2216_v11  ;;  %v1707_v14 = vmax.f32 %v4821_v44, 0.0 }
 0x165   : > { %v1682_v30 = vmul.f32 %v4611_v29, %v3594_v38  ;;  %v2192_v5 = vmul.f32 %v4611_v29, %v3672_v47  ;;  %v2458_v18 = vadd.f32 %v4625_v59, %v2445_v32  ;;  %v2039_v11 = vmul.f32 %v4721_v41, %v1705_v60 }
 0x166   : > { %v1785_v55 = vmul.f32 %v4657_v4, %v1707_v14 }
 0x167   : > { %v1090_v9 = vpop.f32.mrf.mxu2  ;;  %v4814_v31 = vpop.permute.xlu2 %2011  ;;  %v4853_v16 = vadd.f32 %v4625_v59, %v1682_v30  ;;  %v2471_v4 = vmax.f32 %v2458_v18, 0.0  ;;  %v2040_v30 = vmul.f32 %v4752_v25, %v1706_v21 }
 0x168   : > { %v4816_v39 = vpop.permute.xlu1 %2500  ;;  %v2249_v57 = vpop.permute.xlu0 %2248 }
 0x169   : > { %v846_v10 = vpop.f32.mrf.mxu1  ;;  %v1708_v60 = vmax.f32 %v4853_v16, 0.0 }
 0x16a   : > { %v847_v6 = vadd.f32 %v846_v10, %v4574_v35  ;;  %v2217_v35 = vmax.f32 %v2204_v52, 0.0  ;;  %v2549_v52 = vmul.f32 %v4754_v27, %v2471_v4 }
 0x16b   : > { %3584 = vmatmul.msk.f32.gmra.mxu0 %vm682_vm0, %v1532_v40  ;;  %3658 = vmatmul.msk.f32.gmra.mxu2 %vm682_vm0, %v2038_v26  ;;  %v2205_v40 = vadd.f32 %v4625_v59, %v2192_v5  ;;  %v3673_v26 = vld [vmem:[%s4037_s25 + $0x45] sm:$0xff]  ;;  %v1786_v32 = vmul.f32 %v4564_v7, %v1708_v60  ;;  %v3674_v7 = vld [vmem:[%s4037_s25 + $0x4d] sm:$0xff] }
 0x16c   : > { %3620 = vmatmul.msk.f32.gmra.mxu1 %vm682_vm0, %v1784_v17  ;;  %3698 = vmatmul.msk.f32.gmra.mxu3 %vm682_vm0, %v2294_v34  ;;  %v4839_v49 = vadd.f32 %v1090_v9, %v847_v6  ;;  %v3710_v9 = vld [vmem:[%s4037_s25 + $0x26] sm:$0xff]  ;;  %v2295_v37 = vmul.f32 %v2249_v57, %v2217_v35  ;;  %v3635_v17 = vld [vmem:[%s4037_s25 + $0x5c] sm:$0xff]  ;;  %v2193_v10 = vmul.f32 %v4611_v29, %v3673_v26  ;;  %v3711_v35 = vld [vmem:[%s4037_s25 + $0x2e] sm:$0xff] }
 0x16d   : > { %v2446_v22 = vmul.f32 %v4611_v29, %v3710_v9  ;;  %v2218_v57 = vmax.f32 %v2205_v40, 0.0  ;;  %v2447_v25 = vmul.f32 %v4611_v29, %v3711_v35 }
 0x16e   : > { %v4844_v58 = vpop.f32.mrf.mxu3  ;;  %v2206_v27 = vadd.f32 %v4625_v59, %v2193_v10 }
 0x16f   : > { %v1093_v0 = vpop.f32.mrf.mxu2  ;;  %v4846_v36 = vpop.permute.xlu2 %2016  ;;  %v2459_v6 = vadd.f32 %v4625_v59, %v2446_v22  ;;  %v2460_v40 = vadd.f32 %v4625_v59, %v2447_v25  ;;  %v2041_v22 = vmul.f32 %v4783_v3, %v1707_v14 }
 0x170   : > { %v4850_v61 = vpop.permute.xlu1 %2505  ;;  %v2254_v23 = vpop.permute.xlu0 %2253 }
 0x171   : > { %v849_v20 = vpop.f32.mrf.mxu1  ;;  %v2472_v13 = vmax.f32 %v2459_v6, 0.0  ;;  %v2473_v44 = vmax.f32 %v2460_v40, 0.0 }
 0x172   : > { %v850_v50 = vadd.f32 %v849_v20, %v4598_v63  ;;  %v1939_v63 = vmul.f32 %v4611_v29, %v3635_v17 }
 0x173   : > { %3736 = vmatmul.msk.f32.vlgmr.msra.gmra.mxu0 %vm682_vm0, %v2548_v53  ;;  %3659 = vmatmul.msk.f32.gmra.mxu2 %vm682_vm0, %v2039_v11  ;;  %v2296_v53 = vmul.f32 %v2254_v23, %v2218_v57 }
 0x174   : > { %3621 = vmatmul.msk.f32.gmra.mxu1 %vm682_vm0, %v1785_v55  ;;  %3699 = vmatmul.msk.f32.gmra.mxu3 %vm682_vm0, %v2295_v37  ;;  %v4871_v41 = vadd.f32 %v1093_v0, %v850_v50  ;;  %v4892_v5 = vadd.f32 %v4625_v59, %v1939_v63  ;;  %v2219_v55 = vmax.f32 %v2206_v27, 0.0  ;;  %v2550_v37 = vmul.f32 %v4785_v54, %v2472_v13  ;;  %v3712_v63 = vld [vmem:[%s4037_s25 + $0x36] sm:$0xff] }
 0x175   : > { %v835_v54 = vadd.f32 %v4703_v8, %v4675_v2  ;;  %v2448_v3 = vmul.f32 %v4611_v29, %v3712_v63 }
 0x176   : > { %v4876_v38 = vpop.f32.mrf.mxu3  ;;  %v1965_v23 = vmax.f32 %v4892_v5, 0.0  ;;  %v3677_v5 = vld [vmem:[%s4037_s25 + $0x65] sm:$0xff] }
 0x177   : > { %v1096_v1 = vpop.f32.mrf.mxu2  ;;  %v4878_v34 = vpop.permute.xlu2 %2021  ;;  %v1117_v2 = vadd.f32 %v4685_v43, %v835_v54  ;;  %v2461_v35 = vadd.f32 %v4625_v59, %v2448_v3  ;;  %v838_v43 = vadd.f32 %v4737_v48, %v4713_v33  ;;  %v3676_v33 = vld [vmem:[%s4037_s25 + $0x5d] sm:$0xff] }
 0x178   : > { %v4882_v47 = vpop.permute.xlu1 %2510  ;;  %v2259_v46 = vpop.permute.xlu0 %2258 }
 0x179   : > { %v852_v0 = vpop.f32.mrf.mxu1  ;;  %v2474_v48 = vmax.f32 %v2461_v35, 0.0 }
 0x17a   : > { %v853_v18 = vadd.f32 %v852_v0, %v4637_v45  ;;  %v2194_v45 = vmul.f32 %v4611_v29, %v3674_v7  ;;  %v3713_v7 = vld [vmem:[%s4037_s25 + $0x3e] sm:$0xff] }
 0x17b   : > { %3737 = vmatmul.msk.f32.gmra.mxu0 %vm682_vm0, %v2549_v52  ;;  %3660 = vmatmul.msk.f32.gmra.mxu2 %vm682_vm0, %v2040_v30  ;;  %v3675_v52 = vld [vmem:[%s4037_s25 + $0x55] sm:$0xff]  ;;  %v1374_v30 = vadd.f32 %v4844_v58, %v1117_v2  ;;  %v3636_v58 = vld [vmem:[%s4037_s25 + $0x64] sm:$0xff]  ;;  %v2449_v16 = vmul.f32 %v4611_v29, %v3713_v7  ;;  %v2552_v40 = vmul.f32 %v4850_v61, %v2474_v48 }
 0x17c   : > { %3622 = vmatmul.msk.f32.gmra.mxu1 %vm682_vm0, %v1786_v32  ;;  %3700 = vmatmul.msk.f32.gmra.mxu3 %vm682_vm0, %v2296_v53  ;;  %v4902_v21 = vadd.f32 %v1096_v1, %v853_v18  ;;  %v2297_v1 = vmul.f32 %v2259_v46, %v2219_v55  ;;  %v2207_v10 = vadd.f32 %v4625_v59, %v2194_v45  ;;  %v3714_v61 = vld [vmem:[%s4037_s25 + $0x46] sm:$0xff]  ;;  %v3715_v7 = vld [vmem:[%s4037_s25 + $0x4e] sm:$0xff] }
 0x17d   : > { %v2195_v6 = vmul.f32 %v4611_v29, %v3675_v52  ;;  %v2551_v32 = vmul.f32 %v4816_v39, %v2473_v44  ;;  %v2042_v18 = vmul.f32 %v4814_v31, %v1708_v60  ;;  %v1940_v60 = vmul.f32 %v4611_v29, %v3636_v58  ;;  %v3637_v44 = vld [vmem:[%s4037_s25 + $0x6c] sm:$0xff] }
 0x17e   : > { %v1341_v9 = vpop.f32.mrf.mxu3  ;;  %v2220_v8 = vmax.f32 %v2207_v10, 0.0  ;;  %v1118_v45 = vadd.f32 %v4718_v12, %v838_v43  ;;  %v2043_v12 = vmul.f32 %v4846_v36, %v1965_v23  ;;  %v2451_v48 = vmul.f32 %v4611_v29, %v3715_v7 }
 0x17f   : > { %v1099_v11 = vpop.f32.mrf.mxu2  ;;  %v1765_v20 = vpop.permute.xlu2 %1764  ;;  %v4909_v50 = vadd.f32 %v1341_v9, %v4778_v42  ;;  %v2208_v55 = vadd.f32 %v4625_v59, %v2195_v6  ;;  %v4974_v54 = vadd.f32 %v4625_v59, %v1940_v60  ;;  %v2197_v6 = vmul.f32 %v4611_v29, %v3677_v5 }
 0x180   : > { %v1787_v17 = vmul.f32 %v1965_v23, %v1765_v20  ;;  %v4913_v26 = vpop.permute.xlu1 %2515  ;;  %v2264_v4 = vpop.permute.xlu0 %2263  ;;  %v2196_v20 = vmul.f32 %v4611_v29, %v3676_v33  ;;  %v2450_v23 = vmul.f32 %v4611_v29, %v3714_v61 }
 0x181   : > { %v855_v57 = vpop.f32.mrf.mxu1  ;;  %v2298_v25 = vmul.f32 %v2264_v4, %v2220_v8  ;;  %v2462_v4 = vadd.f32 %v4625_v59, %v2449_v16  ;;  %v1966_v2 = vmax.f32 %v4974_v54, 0.0 }
 0x182   : > { %v856_v42 = vadd.f32 %v855_v57, %v4669_v56 }
 0x183   : > { %3738 = vmatmul.msk.f32.gmra.mxu0 %vm682_vm0, %v2550_v37  ;;  %3661 = vmatmul.msk.f32.gmra.mxu2 %vm682_vm0, %v2041_v22  ;;  %v2475_v36 = vmax.f32 %v2462_v4, 0.0 }
 0x184   : > { %3623 = vmatmul.msk.f32.gmra.mxu1 %vm682_vm0, %v1787_v17  ;;  %3701 = vmatmul.msk.f32.gmra.mxu3 %vm682_vm0, %v2297_v1  ;;  %v4929_v14 = vadd.f32 %v1099_v11, %v856_v42  ;;  %v1375_v17 = vadd.f32 %v4876_v38, %v1118_v45  ;;  %v2209_v42 = vadd.f32 %v4625_v59, %v2196_v20 }
 0x186   : > { %v1344_v46 = vpop.f32.mrf.mxu3  ;;  %v2222_v8 = vmax.f32 %v2209_v42, 0.0 }
 0x187   : > { %v1102_v56 = vpop.f32.mrf.mxu2  ;;  %v4937_v0 = vadd.f32 %v1344_v46, %v4807_v24 }
 0x188   : > { %v4939_v53 = vpop.permute.xlu1 %2520  ;;  %v2269_v27 = vpop.permute.xlu0 %2268 }
 0x189   : > { %v858_v39 = vpop.f32.mrf.mxu1  ;;  %v1592_v13 = vpop.f32.mrf.mxu0 }
 0x18a   : > { %v859_v24 = vadd.f32 %v858_v39, %v4653_v28  ;;  %v4950_v11 = vadd.f32 %v1592_v13, %v1374_v30  ;;  %v2221_v28 = vmax.f32 %v2208_v55, 0.0  ;;  %v2463_v30 = vadd.f32 %v4625_v59, %v2450_v23  ;;  %v2536_v23 = vpop.permute.xlu2 %2535 }
 0x18b   : > { %3739 = vmatmul.msk.f32.gmra.mxu0 %vm682_vm0, %v2551_v32  ;;  %3662 = vmatmul.msk.f32.gmra.mxu2 %vm682_vm0, %v2042_v18  ;;  %v2553_v32 = vmul.f32 %v4882_v47, %v2475_v36  ;;  %v2044_v18 = vmul.f32 %v4878_v34, %v1966_v2  ;;  %v3678_v34 = vld [vmem:[%s4037_s25 + $0x6d] sm:$0xff] }
 0x18c   : > { %3702 = vmatmul.msk.f32.gmra.mxu3 %vm682_vm0, %v2298_v25  ;;  %v4957_v31 = vadd.f32 %v1102_v56, %v859_v24  ;;  %v2299_v38 = vmul.f32 %v2269_v27, %v2221_v28  ;;  %v2210_v25 = vadd.f32 %v4625_v59, %v2197_v6  ;;  %v3638_v24 = vld [vmem:[%s4037_s25 + $0x74] sm:$0xff]  ;;  %v2476_v33 = vmax.f32 %v2463_v30, 0.0 }
 0x18d   : > { %v2198_v45 = vmul.f32 %v4611_v29, %v3678_v34 }
 0x18e   : > { %v1347_v37 = vpop.f32.mrf.mxu3  ;;  %v2554_v20 = vmul.f32 %v4913_v26, %v2476_v33 }
 0x18f   : > { %v1105_v9 = vpop.f32.mrf.mxu2  ;;  %v4966_v22 = vadd.f32 %v1347_v37, %v4839_v49  ;;  %v2464_v37 = vadd.f32 %v4625_v59, %v2451_v48  ;;  %v2211_v42 = vadd.f32 %v4625_v59, %v2198_v45 }
 0x190   : > { %v4968_v63 = vpop.permute.xlu1 %2525  ;;  %v2274_v57 = vpop.permute.xlu0 %2273 }
 0x191   : > { %v861_v1 = vpop.f32.mrf.mxu1  ;;  %v1595_v10 = vpop.f32.mrf.mxu0  ;;  %v2300_v47 = vmul.f32 %v2274_v57, %v2222_v8  ;;  %v3716_v57 = vld [vmem:[%s4037_s25 + $0x56] sm:$0xff]  ;;  %v2224_v8 = vmax.f32 %v2211_v42, 0.0 }
 0x192   : > { %v862_v52 = vadd.f32 %v861_v1, %v4692_v51  ;;  %v4979_v49 = vadd.f32 %v1595_v10, %v1375_v17  ;;  %v1941_v51 = vmul.f32 %v4611_v29, %v3637_v44  ;;  %v2477_v44 = vmax.f32 %v2464_v37, 0.0  ;;  %v2289_v34 = vpop.permute.xlu2 %2288 }
 0x193   : > { %3740 = vmatmul.msk.f32.gmra.mxu0 %vm682_vm0, %v2552_v40  ;;  %3663 = vmatmul.msk.f32.gmra.mxu2 %vm682_vm0, %v2043_v12  ;;  %v2452_v5 = vmul.f32 %v4611_v29, %v3716_v57  ;;  %v3719_v57 = vld [vmem:[%s4037_s25 + $0x6e] sm:$0xff] }
 0x194   : > { %3703 = vmatmul.msk.f32.gmra.mxu3 %vm682_vm0, %v2299_v38  ;;  %v4987_v3 = vadd.f32 %v1105_v9, %v862_v52  ;;  %v5004_v58 = vadd.f32 %v4625_v59, %v1941_v51 }
 0x195   : > { %v2465_v6 = vadd.f32 %v4625_v59, %v2452_v5 }
 0x196   : > { %v1350_v46 = vpop.f32.mrf.mxu3  ;;  %v1967_v60 = vmax.f32 %v5004_v58, 0.0 }
 0x197   : > { %v1108_v56 = vpop.f32.mrf.mxu2  ;;  %v4995_v35 = vadd.f32 %v1350_v46, %v4871_v41  ;;  %v2478_v54 = vmax.f32 %v2465_v6, 0.0 }
 0x198   : > { %v4997_v27 = vpop.permute.xlu1 %2530  ;;  %v2279_v43 = vpop.permute.xlu0 %2278 }
 0x199   : > { %v864_v39 = vpop.f32.mrf.mxu1  ;;  %v1598_v13 = vpop.f32.mrf.mxu0 }
 0x19a   : > { %v865_v55 = vadd.f32 %v864_v39, %v4740_v62  ;;  %v5009_v41 = vadd.f32 %v1598_v13, %v4909_v50  ;;  %v1942_v62 = vmul.f32 %v4611_v29, %v3638_v24  ;;  %v2223_v50 = vmax.f32 %v2210_v25, 0.0  ;;  %v2546_v6 = vpop.permute.xlu2 %2545 }
 0x19b   : > { %3741 = vmatmul.msk.f32.gmra.mxu0 %vm682_vm0, %v2553_v32  ;;  %3664 = vmatmul.msk.f32.gmra.mxu2 %vm682_vm0, %v2044_v18 }
 0x19c   : > { %3704 = vmatmul.msk.f32.gmra.mxu3 %vm682_vm0, %v2300_v47  ;;  %v5017_v16 = vadd.f32 %v1108_v56, %v865_v55  ;;  %v1955_v10 = vadd.f32 %v4625_v59, %v1942_v62  ;;  %v2301_v38 = vmul.f32 %v2279_v43, %v2223_v50  ;;  %v2555_v56 = vmul.f32 %v4939_v53, %v2477_v44  ;;  %v3717_v43 = vld [vmem:[%s4037_s25 + $0x5e] sm:$0xff]  ;;  %v3718_v50 = vld [vmem:[%s4037_s25 + $0x66] sm:$0xff] }
 0x19d   : > { %v2454_v37 = vmul.f32 %v4611_v29, %v3718_v50 }
 0x19e   : > { %v1353_v9 = vpop.f32.mrf.mxu3  ;;  %v1968_v51 = vmax.f32 %v1955_v10, 0.0 }
 0x19f   : > { %v1111_v28 = vpop.f32.mrf.mxu2  ;;  %v5025_v40 = vadd.f32 %v1353_v9, %v4902_v21  ;;  %v3679_v21 = vld [vmem:[%s4037_s25 + $0x75] sm:$0xff] }
 0x1a0   : > { %v2284_v17 = vpop.permute.xlu1 %2283  ;;  %v2027_v4 = vpop.permute.xlu0 %2026 }
 0x1a1   : > { %v2045_v12 = vmul.f32 %v2027_v4, %v1967_v60  ;;  %v867_v61 = vpop.f32.mrf.mxu1  ;;  %v1601_v1 = vpop.f32.mrf.mxu0  ;;  %v2302_v47 = vmul.f32 %v2284_v17, %v2224_v8  ;;  %v2467_v17 = vadd.f32 %v4625_v59, %v2454_v37 }
 0x1a2   : > { %v868_v52 = vadd.f32 %v867_v61, %v4775_v15  ;;  %v5032_v26 = vadd.f32 %v1601_v1, %v4937_v0  ;;  %v2199_v15 = vmul.f32 %v4611_v29, %v3679_v21  ;;  %v2455_v1 = vmul.f32 %v4611_v29, %v3719_v57  ;;  %v3720_v21 = vld [vmem:[%s4037_s25 + $0x76] sm:$0xff] }
 0x1a3   : > { %3742 = vmatmul.msk.f32.gmra.mxu0 %vm682_vm0, %v2554_v20  ;;  %3665 = vmatmul.msk.f32.gmra.mxu2 %vm682_vm0, %v2045_v12  ;;  %v2480_v61 = vmax.f32 %v2467_v17, 0.0 }
 0x1a4   : > { %3705 = vmatmul.msk.f32.gmra.mxu3 %vm682_vm0, %v2301_v38  ;;  %v5039_v36 = vadd.f32 %v1111_v28, %v868_v52  ;;  %v2212_v58 = vadd.f32 %v4625_v59, %v2199_v15  ;;  %v2468_v42 = vadd.f32 %v4625_v59, %v2455_v1 }
 0x1a5   : > { %v2558_v38 = vmul.f32 %v2536_v23, %v2480_v61 }
 0x1a6   : > { %v1356_v0 = vpop.f32.mrf.mxu3  ;;  %v2225_v24 = vmax.f32 %v2212_v58, 0.0 }
 0x1a7   : > { %v1381_v46 = vadd.f32 %v1356_v0, %v4929_v14  ;;  %v1114_v14 = vpop.f32.mrf.mxu2 }
 0x1a8   : > { %v2032_v32 = vpop.permute.xlu1 %2031  ;;  %v1770_v30 = vpop.permute.xlu0 %1769  ;;  %v2303_v9 = vmul.f32 %v2289_v34, %v2225_v24  ;;  %v5103_v34 = vld [vmem:[%s5566_s3] ss:$0 sm:$0xff] }
 0x1a9   : > { %v2046_v18 = vmul.f32 %v2032_v32, %v1968_v51  ;;  %v1788_v7 = vmul.f32 %v1966_v2, %v1770_v30  ;;  %v870_v39 = vpop.f32.mrf.mxu1  ;;  %v1604_v13 = vpop.f32.mrf.mxu0  ;;  %v2453_v2 = vmul.f32 %v4611_v29, %v3717_v43 }
 0x1aa   : > { %v871_v25 = vadd.f32 %v870_v39, %v4811_v19  ;;  %v5051_v53 = vadd.f32 %v1604_v13, %v4966_v22  ;;  %v2556_v22 = vmul.f32 %v4968_v63, %v2478_v54 }
 0x1ab   : > { %3743 = vmatmul.msk.f32.gmra.mxu0 %vm682_vm0, %v2555_v56  ;;  %3624 = vmatmul.msk.f32.gmra.mxu1 %vm682_vm0, %v1788_v7  ;;  %v2466_v33 = vadd.f32 %v4625_v59, %v2453_v2 }
 0x1ac   : > { %3666 = vmatmul.msk.f32.gmra.mxu2 %vm682_vm0, %v2046_v18  ;;  %3706 = vmatmul.msk.f32.gmra.mxu3 %vm682_vm0, %v2302_v47  ;;  %v1129_v55 = vadd.f32 %v1114_v14, %v871_v25 }
 0x1ad   : > { %v2479_v63 = vmax.f32 %v2466_v33, 0.0 }
 0x1ae   : > { %v1359_v19 = vpop.f32.mrf.mxu3 }
 0x1af   : > { %v1382_v48 = vadd.f32 %v1359_v19, %v4957_v31 }
 0x1b0   : > { %v1775_v62 = vpop.permute.xlu1 %1774  ;;  %v2541_v5 = vpop.permute.xlu0 %2540 }
 0x1b1   : > { %v1789_v45 = vmul.f32 %v1967_v60, %v1775_v62  ;;  %v1607_v28 = vpop.f32.mrf.mxu0  ;;  %v2557_v60 = vmul.f32 %v4997_v27, %v2479_v63  ;;  %v1849_v39 = vpop.f32.mrf.mxu1 }
 0x1b2   : > { %v5063_v20 = vadd.f32 %v1607_v28, %v4995_v35  ;;  %v1888_v14 = vadd.f32 %v1849_v39, %v4950_v11 }
 0x1b3   : > { %3744 = vmatmul.msk.f32.gmra.mxu0 %vm682_vm0, %v2556_v22  ;;  %3625 = vmatmul.msk.f32.gmra.mxu1 %vm682_vm0, %v1789_v45 }
 0x1b4   : > { %3707 = vmatmul.msk.f32.gmra.mxu3 %vm682_vm0, %v2303_v9 }
 0x1b6   : > { %v1362_v31 = vpop.f32.mrf.mxu3 }
 0x1b7   : > { %v1383_v4 = vadd.f32 %v1362_v31, %v4987_v3  ;;  %v2456_v3 = vmul.f32 %v4611_v29, %v3720_v21 }
 0x1b9   : > { %v1610_v35 = vpop.f32.mrf.mxu0  ;;  %v2469_v15 = vadd.f32 %v4625_v59, %v2456_v3  ;;  %v1852_v54 = vpop.f32.mrf.mxu1 }
 0x1ba   : > { %v5074_v12 = vadd.f32 %v1610_v35, %v5025_v40  ;;  %v2481_v40 = vmax.f32 %v2468_v42, 0.0 }
 0x1bb   : > { %3745 = vmatmul.msk.f32.gmra.mxu0 %vm682_vm0, %v2557_v60 }
 0x1bc   : > { %v2559_v8 = vmul.f32 %v2541_v5, %v2481_v40 }
 0x1be   : > { %v1365_v10 = vpop.f32.mrf.mxu3 }
 0x1bf   : > { %v1384_v52 = vadd.f32 %v1365_v10, %v5017_v16  ;;  %v2482_v16 = vmax.f32 %v2469_v15, 0.0 }
 0x1c1   : > { %v1613_v27 = vpop.f32.mrf.mxu0  ;;  %v2560_v32 = vmul.f32 %v2546_v6, %v2482_v16  ;;  %v1855_v11 = vpop.f32.mrf.mxu1 }
 0x1c2   : > { %v5081_v44 = vadd.f32 %v1613_v27, %v1381_v46  ;;  %v1890_v31 = vadd.f32 %v1855_v11, %v5009_v41 }
 0x1c3   : > { %3746 = vmatmul.msk.f32.gmra.mxu0 %vm682_vm0, %v2558_v38 }
 0x1c6   : > { %v1368_v51 = vpop.f32.mrf.mxu3 }
 0x1c7   : > { %v1385_v23 = vadd.f32 %v1368_v51, %v5039_v36 }
 0x1c9   : > { %v1616_v0 = vpop.f32.mrf.mxu0  ;;  %v1858_v57 = vpop.f32.mrf.mxu1 }
 0x1ca   : > { %v5087_v56 = vadd.f32 %v1616_v0, %v1382_v48  ;;  %v1889_v48 = vadd.f32 %v1852_v54, %v4979_v49  ;;  %v1891_v38 = vadd.f32 %v1858_v57, %v5032_v26 }
 0x1cb   : > { %3747 = vmatmul.msk.f32.gmra.mxu0 %vm682_vm0, %v2559_v8 }
 0x1ce   : > { %v2106_v13 = vpop.f32.mrf.mxu2 }
 0x1cf   : > { %v1371_v46 = vpop.f32.mrf.mxu3  ;;  %v2145_v2 = vadd.f32 %v2106_v13, %v1888_v14 }
 0x1d0   : > { %v1386_v30 = vadd.f32 %v1371_v46, %v1129_v55 }
 0x1d1   : > { %v1619_v43 = vpop.f32.mrf.mxu0  ;;  %v1861_v6 = vpop.f32.mrf.mxu1 }
 0x1d2   : > { %v5090_v29 = vadd.f32 %v1619_v43, %v1383_v4 }
 0x1d3   : > { %3748 = vmatmul.msk.f32.gmra.mxu0 %vm682_vm0, %v2560_v32 }
 0x1d6   : > { %v2109_v55 = vpop.f32.mrf.mxu2 }
 0x1d7   : > { %v2363_v58 = vpop.f32.mrf.mxu3  ;;  %v2146_v50 = vadd.f32 %v2109_v55, %v1889_v48 }
 0x1d8   : > { %v2402_v24 = vadd.f32 %v2363_v58, %v2145_v2 }
 0x1d9   : > { %v1622_v18 = vpop.f32.mrf.mxu0  ;;  %v1864_v13 = vpop.f32.mrf.mxu1 }
 0x1da   : > { %v5093_v59 = vadd.f32 %v1622_v18, %v1384_v52 }
 0x1de   : > { %v2112_v28 = vpop.f32.mrf.mxu2 }
 0x1df   : > { %v2366_v19 = vpop.f32.mrf.mxu3  ;;  %v2147_v60 = vadd.f32 %v2112_v28, %v1890_v31 }
 0x1e0   : > { %v2403_v45 = vadd.f32 %v2366_v19, %v2146_v50 }
 0x1e1   : > { %v1625_v7 = vpop.f32.mrf.mxu0  ;;  %v1867_v48 = vpop.f32.mrf.mxu1 }
 0x1e2   : > { %v5095_v36 = vadd.f32 %v1625_v7, %v1385_v23 }
 0x1e6   : > { %v2115_v10 = vpop.f32.mrf.mxu2 }
 0x1e7   : > { %v2369_v63 = vpop.f32.mrf.mxu3  ;;  %v2148_v27 = vadd.f32 %v2115_v10, %v1891_v38 }
 0x1e8   : > { %v2404_v4 = vadd.f32 %v2369_v63, %v2147_v60 }
 0x1e9   : > { %v1628_v47 = vpop.f32.mrf.mxu0  ;;  %v1870_v60 = vpop.f32.mrf.mxu1 }
 0x1ea   : > { %v5097_v25 = vadd.f32 %v1628_v47, %v1386_v30 }
 0x1ee   : > { %v2118_v46 = vpop.f32.mrf.mxu2 }
 0x1ef   : > { %v2372_v52 = vpop.f32.mrf.mxu3 }
 0x1f0   : > { %v2405_v3 = vadd.f32 %v2372_v52, %v2148_v27 }
 0x1f1   : > { %v2620_v22 = vpop.f32.mrf.mxu0 }
 0x1f2   : > { %v2659_v33 = vadd.f32 %v2620_v22, %v2402_v24 }
 0x1f4   : > { %v5107_v62 = vadd.f32 %v5103_v34, %v2659_v33 }
 0x1f6   : > { %2996 = vrot.lane.b32.xlu0 %v5107_v62, %s3904_s17  ;;  %v3088_v49 = vand.u32 2147483647, %v5107_v62  ;;  %v2121_v47 = vpop.f32.mrf.mxu2  ;;  %v3075_v2 = vmin.f32 %v5107_v62, 0.0  ;;  %v2689_v27 = vsub.f32 0.0, %v5107_v62 }
 0x1f7   : > { %v2375_v43 = vpop.f32.mrf.mxu3 }
 0x1f8   : > { %v3101_v61 = vsub.f32 0.0, %v3088_v49 }
 0x1f9   : > { %v2623_v9 = vpop.f32.mrf.mxu0 }
 0x1fa   : > { %v2660_v37 = vadd.f32 %v2623_v9, %v2403_v45  ;;  %v3114_v21 = vmul.f32 1.442695, %v3101_v61 }
 0x1fc   : > { %v5113_v17 = vadd.f32 %v5103_v34, %v2660_v37  ;;  %3775 = vpow2.f32 %v3114_v21 }
 0x1fe   : > { %2998 = vrot.lane.b32.xlu1 %v5113_v17, %s3904_s17  ;;  %v3089_v41 = vand.u32 2147483647, %v5113_v17  ;;  %v3076_v11 = vmin.f32 %v5113_v17, 0.0  ;;  %v2124_v45 = vpop.f32.mrf.mxu2 }
 0x1ff   : > { %v2378_v54 = vpop.f32.mrf.mxu3 }
 0x200   : > { %v3102_v40 = vsub.f32 0.0, %v3089_v41 }
 0x201   : > { %v2626_v35 = vpop.f32.mrf.mxu0 }
 0x202   : > { %v2661_v1 = vadd.f32 %v2626_v35, %v2404_v4  ;;  %v3116_v8 = vmul.f32 1.442695, %v3102_v40  ;;  %v3776_v26 = vpop.eup %3775  ;;  %v1893_v40 = vadd.f32 %v1864_v13, %v5063_v20  ;;  %v1894_v20 = vadd.f32 %v1867_v48, %v5074_v12 }
 0x203   : > { %v3140_v16 = vadd.f32 1.0, %v3776_v26 }
 0x204   : > { %v2678_v42 = vadd.f32 %v5103_v34, %v2661_v1  ;;  %3777 = vpow2.f32 %v3116_v8  ;;  %v1892_v1 = vadd.f32 %v1861_v6, %v5051_v53  ;;  %v2702_v8 = vmul.f32 1.442695, %v2689_v27 }
 0x205   : > { %3779 = vlog2.f32 %v3140_v16  ;;  %v2150_v53 = vadd.f32 %v2121_v47, %v1893_v40  ;;  %v5213_v40 = vld [vmem:[%s5570_s7] ss:$0 sm:$0xff] }
 0x206   : > { %3000 = vrot.lane.b32.xlu2 %v2678_v42, %s3904_s17  ;;  %v3090_v23 = vand.u32 2147483647, %v2678_v42  ;;  %v2691_v4 = vsub.f32 0.0, %v2678_v42  ;;  %v3077_v57 = vmin.f32 %v2678_v42, 0.0  ;;  %v2127_v35 = vpop.f32.mrf.mxu2  ;;  %v2149_v41 = vadd.f32 %v2118_v46, %v1892_v1 }
 0x207   : > { %v2381_v9 = vpop.f32.mrf.mxu3  ;;  %v2690_v46 = vsub.f32 0.0, %v5113_v17 }
 0x208   : > { %v3103_v0 = vsub.f32 0.0, %v3090_v23  ;;  %v2706_v10 = vmul.f32 1.442695, %v2691_v4 }
 0x209   : > { %v2629_v5 = vpop.f32.mrf.mxu0 }
 0x20a   : > { %v2662_v51 = vadd.f32 %v2629_v5, %v2405_v3  ;;  %v3118_v32 = vmul.f32 1.442695, %v3103_v0  ;;  %v3778_v30 = vpop.eup %3777  ;;  %v2406_v3 = vadd.f32 %v2375_v43, %v2149_v41  ;;  %v5135_v5 = vpop.f32.mrf.mxu1  ;;  %v2407_v0 = vadd.f32 %v2378_v54, %v2150_v53  ;;  %v2938_v41 = vld [vmem:[%s5193_s22 + $0x10] sm:$0xff] }
 0x20b   : > { %v3141_v7 = vadd.f32 1.0, %v3778_v30  ;;  %v3780_v39 = vpop.eup %3779  ;;  %v2151_v43 = vadd.f32 %v2124_v45, %v1894_v20 }
 0x20c   : > { %v5123_v15 = vadd.f32 %v5103_v34, %v2662_v51  ;;  %3781 = vpow2.f32 %v3118_v32  ;;  %v3154_v14 = vmul.f32 0.6931472, %v3780_v39  ;;  %v1895_v51 = vadd.f32 %v1870_v60, %v5081_v44 }
 0x20d   : > { %3783 = vlog2.f32 %v3141_v7  ;;  %v2408_v39 = vadd.f32 %v2381_v9, %v2151_v43 }
 0x20e   : > { %3002 = vrot.lane.b32.xlu0 %v5123_v15, %s3904_s17  ;;  %v3179_v22 = vsub.f32 %v3075_v2, %v3154_v14  ;;  %v5138_v23 = vpop.f32.mrf.mxu2  ;;  %v2152_v16 = vadd.f32 %v2127_v35, %v1895_v51  ;;  %v3091_v17 = vand.u32 2147483647, %v5123_v15  ;;  %v2692_v60 = vsub.f32 0.0, %v5123_v15 }
 0x20f   : > { %v2384_v38 = vpop.f32.mrf.mxu3 }
 0x210   : > { %v3192_v50 = vsel %vm3061_vm1, %v3179_v22, 0.0  ;;  %v2409_v32 = vadd.f32 %v2384_v38, %v2152_v16  ;;  %v3104_v22 = vsub.f32 0.0, %v3091_v17  ;;  %v5203_v38 = vld [vmem:[%s5571_s8] ss:$0 sm:$0xff] }
 0x211   : > { %v2632_v18 = vpop.f32.mrf.mxu0 }
 0x212   : > { %v3782_v58 = vpop.eup %3781  ;;  %v2663_v42 = vadd.f32 %v2632_v18, %v2406_v3  ;;  %v1876_v13 = vpop.f32.mrf.mxu1  ;;  %v3120_v9 = vmul.f32 1.442695, %v3104_v22 }
 0x213   : > { %v3142_v55 = vadd.f32 1.0, %v3782_v58  ;;  %v3784_v24 = vpop.eup %3783  ;;  %v2704_v58 = vmul.f32 1.442695, %v2690_v46 }
 0x214   : > { %v3156_v33 = vmul.f32 0.6931472, %v3784_v24  ;;  %v5141_v6 = vadd.f32 %v5103_v34, %v2663_v42  ;;  %v2955_v42 = vadd.f32 %v5203_v38, %v2938_v41 }
 0x215   : > { %3785 = vlog2.f32 %v3142_v55  ;;  %v1897_v55 = vadd.f32 %v1876_v13, %v5090_v29 }
 0x216   : > { %v3180_v28 = vsub.f32 %v3076_v11, %v3156_v33  ;;  %3787 = vpow2.f32 %v2706_v10  ;;  %v2133_v54 = vpop.f32.mrf.mxu2  ;;  %v3092_v24 = vand.u32 2147483647, %v5141_v6  ;;  %v2708_v10 = vmul.f32 1.442695, %v2692_v60 }
 0x217   : > { %v5143_v62 = vpop.f32.mrf.mxu3  ;;  %3789 = vpow2.f32 %v2702_v8  ;;  %v2154_v48 = vadd.f32 %v2133_v54, %v1897_v55 }
 0x218   : > { %v3195_v31 = vsel %vm3061_vm1, %v3180_v28, 0.0  ;;  %v3105_v29 = vsub.f32 0.0, %v3092_v24 }
 0x219   : > { %v2635_v19 = vpop.f32.mrf.mxu0 }
 0x21a   : > { %v2664_v44 = vadd.f32 %v2635_v19, %v2407_v0 }
 0x21b   : > { %v3786_v37 = vpop.eup %3785 }
 0x21c   : > { %v3158_v49 = vmul.f32 0.6931472, %v3786_v37  ;;  %v3788_v26 = vpop.eup %3787  ;;  %v5156_v12 = vadd.f32 %v5103_v34, %v2664_v44 }
 0x21d   : > { %v5151_v18 = vadd.f32 1.0, %v3788_v26  ;;  %v3790_v14 = vpop.eup %3789 }
 0x21e   : > { %v3181_v61 = vsub.f32 %v3077_v57, %v3158_v49  ;;  %v5169_v33 = vadd.f32 1.0, %v3790_v14  ;;  %v3122_v49 = vmul.f32 1.442695, %v3105_v29 }
 0x21f   : > { %3791 = vrcp.f32 %v5151_v18  ;;  %v2390_v19 = vpop.f32.mrf.mxu3  ;;  %v2782_v20 = vand.u32 2147483648, %v5151_v18  ;;  %vm2776_vm3 = vweird.f32 %v5151_v18  ;;  %v2780_v46 = vand.u32 2147483647, %v5151_v18 }
 0x220   : > { %v3198_v21 = vsel %vm3061_vm1, %v3181_v61, 0.0  ;;  %3793 = vpow2.f32 %v2704_v58  ;;  %v2411_v28 = vadd.f32 %v2390_v19, %v2154_v48  ;;  %vm2746_vm7 = vweird.f32 %v5169_v33 }
 0x221   : > { %v2638_v63 = vpop.f32.mrf.mxu0  ;;  %3795 = vrcp.f32 %v5169_v33  ;;  %vm2781_vm5 = vcmp.eq.f32.partialorder %v2780_v46, 8.507059e+37  ;;  %v2750_v29 = vand.u32 2147483647, %v5169_v33 }
 0x222   : > { %v2665_v47 = vadd.f32 %v2638_v63, %v2408_v39  ;;  %3797 = vpow2.f32 %v3120_v9 }
 0x223   : > { %3799 = vpow2.f32 %v3122_v49  ;;  %vm2751_vm9 = vcmp.eq.f32.partialorder %v2750_v29, 8.507059e+37 }
 0x225   : > { %v5174_v45 = vpop.eup %3791 }
 0x226   : > { %v3794_v63 = vpop.eup %3793  ;;  %vm2777_vm2 = vweird.f32 %v5174_v45 }
 0x227   : > { %v5184_v4 = vadd.f32 1.0, %v3794_v63  ;;  %v5196_v1 = vpop.eup %3795  ;;  %vm5224_vm4 = vmor %vm2776_vm3, %vm2777_vm2  ;;  %vm3244_vm3 = vcmask 7168  }
 0x228   : > { %3193 = vadd.xlane.f32.xlu1 %v3192_v50  ;;  %v5172_v50 = vadd.f32 %v5103_v34, %v2665_v47  ;;  %v2742_v27 = vmul.f32 %v5196_v1, %v5169_v33  ;;  %v2783_v47 = vor.u32 1.1754944e-38, %v2782_v20  ;;  %vm2747_vm6 = vweird.f32 %v5196_v1  ;;  %v1879_v20 = vpop.f32.mrf.mxu1 }
 0x229   : > { %v2641_v52 = vpop.f32.mrf.mxu0  ;;  %3801 = vrcp.f32 %v5184_v4  ;;  %vm2748_vm8 = vmor %vm2746_vm7, %vm2747_vm6  ;;  %vm2761_vm11 = vweird.f32 %v5184_v4 }
 0x22a   : > { %v2666_v7 = vadd.f32 %v2641_v52, %v2409_v32  ;;  %v3094_v61 = vand.u32 2147483647, %v5172_v50  ;;  %v3798_v52 = vpop.eup %3797  ;;  %3803 = vpow2.f32 %v2708_v10  ;;  %v2743_v26 = vsub.f32 1.0, %v2742_v27 }
 0x22b   : > { %v3800_v51 = vpop.eup %3799  ;;  %v3143_v8 = vadd.f32 1.0, %v3798_v52  ;;  %v2972_v32 = vmul.f32 %v5213_v40, %v2955_v42  ;;  %v3078_v52 = vmin.f32 %v5123_v15, 0.0  ;;  %v2765_v15 = vand.u32 2147483647, %v5184_v4 }
 0x22c   : > { %v5161_v2 = vadd.f32 %v5103_v34, %v2666_v7  ;;  %v3107_v3 = vsub.f32 0.0, %v3094_v61  ;;  %v3144_v44 = vadd.f32 1.0, %v3800_v51  ;;  %v2936_v7 = vld [vmem:[%s5193_s22] sm:$0xff]  ;;  %v2744_v58 = vmul.f32 %v5196_v1, %v2743_v26 }
 0x22d   : > { %3805 = vlog2.f32 %v3143_v8  ;;  %v2953_v54 = vadd.f32 %v5203_v38, %v2936_v7  ;;  %v2767_v8 = vand.u32 2147483648, %v5184_v4  ;;  %vm2766_vm13 = vcmp.eq.f32.partialorder %v2765_v15, 8.507059e+37 }
 0x22e   : > { %v3126_v0 = vmul.f32 1.442695, %v3107_v3  ;;  %v2745_v22 = vadd.f32 %v5196_v1, %v2744_v58 }
 0x22f   : > { %3196 = vadd.xlane.f32.xlu2 %v3195_v31  ;;  %v2772_v31 = vmul.f32 %v5174_v45, %v5151_v18  ;;  %v5218_v16 = vpop.eup %3801  ;;  %v2970_v9 = vmul.f32 %v5213_v40, %v2953_v54  ;;  %v2768_v7 = vor.u32 1.1754944e-38, %v2767_v8 }
 0x230   : > { %v3804_v39 = vpop.eup %3803  ;;  %v2757_v18 = vmul.f32 %v5218_v16, %v5184_v4  ;;  %3807 = vpow2.f32 %v3126_v0  ;;  %vm2762_vm10 = vweird.f32 %v5218_v16 }
 0x231   : > { %v5147_v30 = vpop.f32.mrf.mxu0  ;;  %v2773_v35 = vsub.f32 1.0, %v2772_v31  ;;  %3809 = vlog2.f32 %v3144_v44  ;;  %v5236_v55 = vadd.f32 1.0, %v3804_v39  ;;  %v2749_v31 = vsel %vm2748_vm8, %v5196_v1, %v2745_v22  ;;  %vm2763_vm12 = vmor %vm2761_vm11, %vm2762_vm10 }
 0x232   : > { %v2758_v48 = vsub.f32 1.0, %v2757_v18  ;;  %v2136_v18 = vpop.f32.mrf.mxu2  ;;  %v3081_v22 = vmin.f32 %v5172_v50, 0.0 }
 0x233   : > { %3811 = vrcp.f32 %v5236_v55  ;;  %vm2791_vm15 = vweird.f32 %v5236_v55 }
 0x234   : > { %v2759_v49 = vmul.f32 %v5218_v16, %v2758_v48 }
 0x236   : > { %v2760_v42 = vadd.f32 %v5218_v16, %v2759_v49 }
 0x238   : > { %3199 = vadd.xlane.f32.xlu0 %v3198_v21  ;;  %v2774_v21 = vmul.f32 %v5174_v45, %v2773_v35  ;;  %v2764_v46 = vsel %vm2763_vm12, %v5218_v16, %v2760_v42 }
 0x239   : > { %v2647_v11 = vpop.f32.mrf.mxu0 }
 0x23a   : > { %v2668_v37 = vadd.f32 %v2647_v11, %v2411_v28  ;;  %v2775_v53 = vadd.f32 %v5174_v45, %v2774_v21  ;;  %v3806_v11 = vpop.eup %3805 }
 0x23b   : > { %v3808_v28 = vpop.eup %3807  ;;  %v3160_v60 = vmul.f32 0.6931472, %v3806_v11 }
 0x23c   : > { %v5187_v57 = vadd.f32 %v5103_v34, %v2668_v37  ;;  %v2779_v13 = vsel %vm5224_vm4, %v5174_v45, %v2775_v53  ;;  %v2752_v45 = vand.u32 2147483648, %v5169_v33  ;;  %v2937_v37 = vld [vmem:[%s5193_s22 + $0x8] sm:$0xff]  ;;  %v3810_v63 = vpop.eup %3809  ;;  %v3146_v10 = vadd.f32 1.0, %v3808_v28 }
 0x23d   : > { %v2784_v24 = vsel %vm2781_vm5, %v2783_v47, %v2779_v13  ;;  %v2954_v33 = vadd.f32 %v5203_v38, %v2937_v37  ;;  %v3162_v27 = vmul.f32 0.6931472, %v3810_v63  ;;  %v3182_v1 = vsub.f32 %v3078_v52, %v3160_v60  ;;  %v5260_v51 = vpop.eup %3811  ;;  %v5288_v63 = vpop.f32.mrf.mxu2 }
 0x23e   : > { %v2753_v61 = vor.u32 1.1754944e-38, %v2752_v45  ;;  %v3079_v53 = vmin.f32 %v5141_v6, 0.0  ;;  %3813 = vlog2.f32 %v3146_v10  ;;  %v2787_v44 = vmul.f32 %v5260_v51, %v5236_v55 }
 0x23f   : > { %v2971_v26 = vmul.f32 %v5213_v40, %v2954_v33  ;;  %v2769_v13 = vsel %vm2766_vm13, %v2768_v7, %v2764_v46  ;;  %v2694_v28 = vsub.f32 0.0, %v5156_v12  ;;  %vm2792_vm14 = vweird.f32 %v5260_v51 }
 0x240   : > { %v2754_v21 = vsel %vm2751_vm9, %v2753_v61, %v2749_v31  ;;  %v3183_v0 = vsub.f32 %v3079_v53, %v3162_v27  ;;  %v2788_v16 = vsub.f32 1.0, %v2787_v44  ;;  %v2797_v37 = vand.u32 2147483648, %v5236_v55  ;;  %vm2793_vm0 = vmor %vm2791_vm15, %vm2792_vm14 }
 0x241   : > { %3004 = vrot.lane.b32.xlu1 %v5141_v6, %s3904_s17  ;;  %v2795_v60 = vand.u32 2147483647, %v5236_v55  ;;  %v2712_v10 = vmul.f32 1.442695, %v2694_v28  ;;  %v3095_v7 = vand.u32 2147483647, %v5161_v2 }
 0x242   : > { %v3204_v58 = vsel %vm3061_vm1, %v3183_v0, 0.0  ;;  %v2789_v48 = vmul.f32 %v5260_v51, %v2788_v16  ;;  %v2798_v52 = vor.u32 1.1754944e-38, %v2797_v37 }
 0x243   : > { %vm2796_vm2 = vcmp.eq.f32.partialorder %v2795_v60, 8.507059e+37  ;;  %3815 = vpow2.f32 %v2712_v10 }
 0x244   : > { %v3814_v4 = vpop.eup %3813  ;;  %v2790_v29 = vadd.f32 %v5260_v51, %v2789_v48 }
 0x245   : > { %v3166_v54 = vmul.f32 0.6931472, %v3814_v4  ;;  %v2142_v0 = vpop.f32.mrf.mxu2  ;;  %v2696_v4 = vsub.f32 0.0, %v5161_v2 }
 0x247   : > { %3006 = vrot.lane.b32.xlu2 %v5156_v12, %s3904_s17  ;;  %v3185_v11 = vsub.f32 %v3081_v22, %v3166_v54  ;;  %v3097_v54 = vand.u32 2147483647, %v5187_v57 }
 0x249   : > { %3010 = vrot.lane.b32.xlu1 %v5161_v2, %s3904_s17  ;;  %v3210_v49 = vsel %vm3061_vm1, %v3185_v11, 0.0  ;;  %v3110_v11 = vsub.f32 0.0, %v3097_v54 }
 0x24b   : > { %v3132_v37 = vmul.f32 1.442695, %v3110_v11 }
 0x24c   : > { %3008 = vrot.lane.b32.xlu0 %v5172_v50, %s3904_s17 }
 0x254   : > { %3014 = vrot.lane.b32.xlu0 %v5187_v57, %s3904_s17 }
 0x260   : > { %v3001_v17 = vpop.permute.xlu2 %3000 }
 0x261   : > { %v3037_v14 = vadd.f32 %v3001_v17, %v2972_v32  ;;  %v3201_v32 = vsel %vm3061_vm1, %v3182_v1, 0.0  ;;  %v2393_v17 = vpop.f32.mrf.mxu3  ;;  %v2693_v1 = vsub.f32 0.0, %v5141_v6  ;;  %v3816_v6 = vpop.eup %3815 }
 0x263   : > { %v3050_v19 = vmul.f32 %v3037_v14, %v2784_v24  ;;  %v2650_v14 = vpop.f32.mrf.mxu0  ;;  %v2939_v24 = vld [vmem:[%s5193_s22 + $0x18] sm:$0xff] }
 0x264   : > { %v2956_v45 = vadd.f32 %v5203_v38, %v2939_v24 }
 0x265   : > { %3064 = vst.msk [vmem:[%s5242_s30 + $0x10] sm:$0xff] %vm3061_vm1, %v3050_v19  ;;  %v5277_v19 = vpop.f32.mrf.mxu1 }
 0x268   : > { %v2997_v35 = vpop.permute.xlu0 %2996 }
 0x269   : > { %v3035_v41 = vadd.f32 %v2997_v35, %v2970_v9  ;;  %v1896_v9 = vadd.f32 %v5135_v5, %v5087_v56  ;;  %v5290_v31 = vpop.f32.mrf.mxu3  ;;  %v2973_v35 = vmul.f32 %v5213_v40, %v2956_v45  ;;  %v2794_v5 = vsel %vm2793_vm0, %v5260_v51, %v2790_v29 }
 0x26a   : > { %v2799_v42 = vsel %vm2796_vm2, %v2798_v52, %v2794_v5  ;;  %v3093_v51 = vand.u32 2147483647, %v5156_v12 }
 0x26b   : > { %v3048_v3 = vmul.f32 %v3035_v41, %v2754_v21  ;;  %v2153_v61 = vadd.f32 %v5138_v23, %v1896_v9  ;;  %v5297_v56 = vpop.f32.mrf.mxu0  ;;  %v1898_v41 = vadd.f32 %v1879_v20, %v5093_v59 }
 0x26d   : > { %3062 = vst.msk [vmem:[%s5242_s30] sm:$0xff] %vm3061_vm1, %v3048_v3  ;;  %v2410_v33 = vadd.f32 %v5143_v62, %v2153_v61  ;;  %v1885_v27 = vpop.f32.mrf.mxu1  ;;  %v2155_v3 = vadd.f32 %v2136_v18, %v1898_v41  ;;  %v3108_v18 = vsub.f32 0.0, %v3095_v7  ;;  %v3881_v41 = vld [vmem:[%s3976_s18 + $0xb] sm:$0xff] }
 0x26e   : > { %v1900_v59 = vadd.f32 %v1885_v27, %v5097_v25 }
 0x26f   : > { %v2667_v23 = vadd.f32 %v5147_v30, %v2410_v33  ;;  %v2412_v53 = vadd.f32 %v2393_v17, %v2155_v3  ;;  %v3106_v30 = vsub.f32 0.0, %v3093_v51  ;;  %v2716_v17 = vmul.f32 1.442695, %v2696_v4 }
 0x270   : > { %v2999_v43 = vpop.permute.xlu1 %2998  ;;  %3202 = vadd.xlane.f32.xlu2 %v3201_v32  ;;  %v2157_v46 = vadd.f32 %v2142_v0, %v1900_v59  ;;  %v3128_v24 = vmul.f32 1.442695, %v3108_v18  ;;  %v3882_v0 = vld [vmem:[%s3976_s18 + $0x13] sm:$0xff] }
 0x271   : > { %v3036_v39 = vadd.f32 %v2999_v43, %v2971_v26  ;;  %v5309_v62 = vadd.f32 %v5103_v34, %v2667_v23  ;;  %v2669_v15 = vadd.f32 %v2650_v14, %v2412_v53  ;;  %v2710_v26 = vmul.f32 1.442695, %v2693_v1  ;;  %v2399_v20 = vpop.f32.mrf.mxu3 }
 0x272   : > { %v2414_v44 = vadd.f32 %v2399_v20, %v2157_v46  ;;  %v3124_v25 = vmul.f32 1.442695, %v3106_v30 }
 0x273   : > { %v3049_v47 = vmul.f32 %v3036_v39, %v2769_v13  ;;  %3205 = vadd.xlane.f32.xlu1 %v3204_v58  ;;  %v2656_v32 = vpop.f32.mrf.mxu0  ;;  %v5314_v43 = vadd.f32 %v5103_v34, %v2669_v15  ;;  %3817 = vpow2.f32 %v2710_v26  ;;  %v5317_v39 = vadd.f32 1.0, %v3816_v6 }
 0x274   : > { %v2671_v13 = vadd.f32 %v2656_v32, %v2414_v44  ;;  %v2695_v58 = vsub.f32 0.0, %v5172_v50  ;;  %3819 = vpow2.f32 %v3124_v25 }
 0x275   : > { %3063 = vst.msk [vmem:[%s5242_s30 + $0x8] sm:$0xff] %vm3061_vm1, %v3049_v47  ;;  %3821 = vrcp.f32 %v5317_v39  ;;  %v3098_v22 = vand.u32 2147483647, %v5314_v43  ;;  %v2825_v25 = vand.u32 2147483647, %v5317_v39  ;;  %v2827_v7 = vand.u32 2147483648, %v5317_v39 }
 0x276   : > { %v5325_v47 = vadd.f32 %v5103_v34, %v2671_v13  ;;  %v2714_v14 = vmul.f32 1.442695, %v2695_v58  ;;  %3823 = vpow2.f32 %v2716_v17  ;;  %v2698_v34 = vsub.f32 0.0, %v5187_v57 }
 0x277   : > { %v3111_v28 = vsub.f32 0.0, %v3098_v22  ;;  %vm2821_vm5 = vweird.f32 %v5317_v39  ;;  %v3080_v22 = vmin.f32 %v5156_v12, 0.0  ;;  %vm2826_vm7 = vcmp.eq.f32.partialorder %v2825_v25, 8.507059e+37 }
 0x278   : > { %3825 = vpow2.f32 %v2714_v14 }
 0x279   : > { %v3818_v16 = vpop.eup %3817  ;;  %3827 = vpow2.f32 %v3128_v24  ;;  %v3134_v5 = vmul.f32 1.442695, %v3111_v28 }
 0x27a   : > { %v5331_v48 = vadd.f32 1.0, %v3818_v16  ;;  %v3820_v50 = vpop.eup %3819 }
 0x27b   : > { %v5333_v45 = vpop.eup %3821  ;;  %v3145_v29 = vadd.f32 1.0, %v3820_v50 }
 0x27c   : > { %3829 = vrcp.f32 %v5331_v48  ;;  %v2817_v9 = vmul.f32 %v5333_v45, %v5317_v39  ;;  %v3824_v60 = vpop.eup %3823  ;;  %vm2822_vm4 = vweird.f32 %v5333_v45  ;;  %v2940_v39 = vld [vmem:[%s5193_s22 + $0x20] sm:$0xff]  ;;  %vm2806_vm9 = vweird.f32 %v5331_v48 }
 0x27d   : > { %3831 = vlog2.f32 %v3145_v29  ;;  %vm5377_vm6 = vmor %vm2821_vm5, %vm2822_vm4 }
 0x27e   : > { %3211 = vadd.xlane.f32.xlu0 %v3210_v49  ;;  %v3100_v49 = vand.u32 2147483647, %v5325_v47  ;;  %v3826_v61 = vpop.eup %3825  ;;  %v2818_v27 = vsub.f32 1.0, %v2817_v9  ;;  %3833 = vpow2.f32 %v3132_v37 }
 0x27f   : > { %v3828_v52 = vpop.eup %3827  ;;  %v5351_v23 = vadd.f32 1.0, %v3826_v61 }
 0x280   : > { %v3003_v21 = vpop.permute.xlu0 %3002  ;;  %v3147_v1 = vadd.f32 1.0, %v3828_v52  ;;  %v2812_v52 = vand.u32 2147483648, %v5331_v48 }
 0x281   : > { %v3038_v55 = vadd.f32 %v3003_v21, %v2973_v35  ;;  %v2720_v35 = vmul.f32 1.442695, %v2698_v34  ;;  %v5347_v21 = vadd.f32 1.0, %v3824_v60  ;;  %v2828_v34 = vor.u32 1.1754944e-38, %v2827_v7 }
 0x282   : > { %v5349_v3 = vpop.eup %3829  ;;  %vm2836_vm0 = vweird.f32 %v5351_v23 }
 0x283   : > { %v3051_v8 = vmul.f32 %v3038_v55, %v2799_v42  ;;  %v3113_v55 = vsub.f32 0.0, %v3100_v49  ;;  %3835 = vpow2.f32 %v2720_v35  ;;  %v2941_v42 = vld [vmem:[%s5193_s22 + $0x28] sm:$0xff]  ;;  %v2802_v51 = vmul.f32 %v5349_v3, %v5331_v48  ;;  %v3832_v59 = vpop.eup %3831  ;;  %v3883_v35 = vld [vmem:[%s3976_s18 + $0x1b] sm:$0xff] }
 0x284   : > { %3837 = vpow2.f32 %v3134_v5  ;;  %v3834_v26 = vpop.eup %3833  ;;  %v2958_v30 = vadd.f32 %v5203_v38, %v2941_v42  ;;  %v3164_v17 = vmul.f32 0.6931472, %v3832_v59  ;;  %vm2807_vm8 = vweird.f32 %v5349_v3 }
 0x285   : > { %3065 = vst.msk [vmem:[%s5242_s30 + $0x18] sm:$0xff] %vm3061_vm1, %v3051_v8  ;;  %3839 = vrcp.f32 %v5347_v21  ;;  %v2819_v8 = vmul.f32 %v5333_v45, %v2818_v27  ;;  %v3138_v53 = vmul.f32 1.442695, %v3113_v55  ;;  %v2803_v44 = vsub.f32 1.0, %v2802_v51  ;;  %vm5405_vm10 = vmor %vm2806_vm9, %vm2807_vm8 }
 0x286   : > { %3841 = vrcp.f32 %v5351_v23  ;;  %v3149_v4 = vadd.f32 1.0, %v3834_v26  ;;  %v2975_v18 = vmul.f32 %v5213_v40, %v2958_v30  ;;  %v3184_v12 = vsub.f32 %v3080_v22, %v3164_v17 }
 0x287   : > { %3843 = vlog2.f32 %v3147_v1  ;;  %v2820_v32 = vadd.f32 %v5333_v45, %v2819_v8  ;;  %v2804_v50 = vmul.f32 %v5349_v3, %v2803_v44  ;;  %v2810_v42 = vand.u32 2147483647, %v5331_v48 }
 0x288   : > { %3012 = vrot.lane.b32.xlu2 %v5309_v62, %s3904_s17  ;;  %3845 = vpow2.f32 %v3138_v53  ;;  %v3082_v1 = vmin.f32 %v5161_v2, 0.0  ;;  %v3207_v51 = vsel %vm3061_vm1, %v3184_v12, 0.0  ;;  %v2943_v2 = vld [vmem:[%s5193_s22 + $0x38] sm:$0xff]  ;;  %v2813_v30 = vor.u32 1.1754944e-38, %v2812_v52  ;;  %v2945_v52 = vld [vmem:[%s5193_s22 + $0x48] sm:$0xff] }
 0x289   : > { %v3836_v46 = vpop.eup %3835  ;;  %v2824_v24 = vsel %vm5377_vm6, %v5333_v45, %v2820_v32  ;;  %3847 = vlog2.f32 %v3149_v4  ;;  %vm2811_vm11 = vcmp.eq.f32.partialorder %v2810_v42, 8.507059e+37  ;;  %v2960_v7 = vadd.f32 %v5203_v38, %v2943_v2 }
 0x28a   : > { %v3838_v6 = vpop.eup %3837  ;;  %v5371_v58 = vadd.f32 1.0, %v3836_v46  ;;  %v2829_v60 = vsel %vm2826_vm7, %v2828_v34, %v2824_v24  ;;  %v3084_v17 = vmin.f32 %v5187_v57, 0.0  ;;  %vm2851_vm12 = vweird.f32 %v5347_v21 }
 0x28b   : > { %v5369_v13 = vpop.eup %3839  ;;  %v3150_v54 = vadd.f32 1.0, %v3838_v6  ;;  %v3085_v34 = vmin.f32 %v5314_v43, 0.0  ;;  %v3087_v42 = vmin.f32 %v5325_v47, 0.0 }
 0x28c   : > { %3016 = vrot.lane.b32.xlu1 %v5314_v43, %s3904_s17  ;;  %v5375_v16 = vpop.eup %3841  ;;  %v2847_v29 = vmul.f32 %v5369_v13, %v5347_v21  ;;  %3849 = vrcp.f32 %v5371_v58  ;;  %vm2852_vm13 = vweird.f32 %v5369_v13  ;;  %vm2881_vm7 = vweird.f32 %v5371_v58 }
 0x28d   : > { %v3844_v11 = vpop.eup %3843  ;;  %v2832_v49 = vmul.f32 %v5375_v16, %v5351_v23  ;;  %3851 = vlog2.f32 %v3150_v54  ;;  %vm2837_vm14 = vweird.f32 %v5375_v16  ;;  %vm5438_vm15 = vmor %vm2851_vm12, %vm2852_vm13 }
 0x28e   : > { %v3846_v9 = vpop.eup %3845  ;;  %v2848_v27 = vsub.f32 1.0, %v2847_v29  ;;  %v2977_v29 = vmul.f32 %v5213_v40, %v2960_v7  ;;  %vm5449_vm2 = vmor %vm2836_vm0, %vm2837_vm14 }
 0x28f   : > { %v3152_v55 = vadd.f32 1.0, %v3846_v9  ;;  %v3848_v8 = vpop.eup %3847 }
 0x290   : > { %v2849_v46 = vmul.f32 %v5369_v13, %v2848_v27  ;;  %v3172_v32 = vmul.f32 0.6931472, %v3848_v8 }
 0x291   : > { %3853 = vlog2.f32 %v3152_v55 }
 0x292   : > { %3020 = vrot.lane.b32.xlu0 %v5325_v47, %s3904_s17  ;;  %v5410_v26 = vpop.eup %3849  ;;  %v2850_v22 = vadd.f32 %v5369_v13, %v2849_v46 }
 0x293   : > { %v2877_v54 = vmul.f32 %v5410_v26, %v5371_v58  ;;  %vm2882_vm6 = vweird.f32 %v5410_v26 }
 0x294   : > { %vm2883_vm8 = vmor %vm2881_vm7, %vm2882_vm6 }
 0x29b   : > { %v3194_v10 = vpop.xlane.xlu1 %3193 }
 0x29c   : > { %v3231_v33 = vmul.f32 %v3881_v41, %v3194_v10  ;;  %v2957_v10 = vadd.f32 %v5203_v38, %v2940_v39  ;;  %v2805_v41 = vadd.f32 %v5349_v3, %v2804_v50  ;;  %v2857_v50 = vand.u32 2147483648, %v5347_v21 }
 0x29d   : > { %v3188_v39 = vsub.f32 %v3084_v17, %v3172_v32 }
 0x29e   : > { %3245 = vst.msk [vmem:[%s5344_s15] sm:$0xff] %vm3244_vm3, %v3231_v33  ;;  %v3168_v33 = vmul.f32 0.6931472, %v3844_v11  ;;  %v2974_v59 = vmul.f32 %v5213_v40, %v2957_v10  ;;  %v2809_v48 = vsel %vm5405_vm10, %v5349_v3, %v2805_v41 }
 0x29f   : > { %v2814_v44 = vsel %vm2811_vm11, %v2813_v30, %v2809_v48 }
 0x2a2   : > { %v3197_v15 = vpop.xlane.xlu2 %3196 }
 0x2a3   : > { %v3232_v20 = vmul.f32 %v3882_v0, %v3197_v15  ;;  %v2833_v15 = vsub.f32 1.0, %v2832_v49  ;;  %v3186_v0 = vsub.f32 %v3082_v1, %v3168_v33  ;;  %v2878_v49 = vsub.f32 1.0, %v2877_v54 }
 0x2a4   : > { %v2697_v33 = vsub.f32 0.0, %v5309_v62 }
 0x2a5   : > { %3246 = vst.msk [vmem:[%s5344_s15 + $0x8] sm:$0xff] %vm3244_vm3, %v3232_v20  ;;  %v3852_v20 = vpop.eup %3851  ;;  %v2834_v4 = vmul.f32 %v5375_v16, %v2833_v15  ;;  %v3213_v3 = vsel %vm3061_vm1, %v3186_v0, 0.0  ;;  %v2879_v1 = vmul.f32 %v5410_v26, %v2878_v49 }
 0x2a6   : > { %v3174_v14 = vmul.f32 0.6931472, %v3852_v20  ;;  %v3854_v57 = vpop.eup %3853  ;;  %v2718_v2 = vmul.f32 1.442695, %v2697_v33 }
 0x2a7   : > { %v2835_v9 = vadd.f32 %v5375_v16, %v2834_v4  ;;  %v3178_v41 = vmul.f32 0.6931472, %v3854_v57  ;;  %v2880_v46 = vadd.f32 %v5410_v26, %v2879_v1  ;;  %v3884_v4 = vld [vmem:[%s5566_s3] ss:$0 sm:$0xff]  ;;  %v2701_v57 = vsub.f32 0.0, %v5325_v47 }
 0x2a8   : > { %v3189_v12 = vsub.f32 %v3085_v34, %v3174_v14  ;;  %3855 = vpow2.f32 %v2718_v2 }
 0x2a9   : > { %v3191_v48 = vsub.f32 %v3087_v42, %v3178_v41 }
 0x2aa   : > { %v3007_v28 = vpop.permute.xlu2 %3006  ;;  %v3222_v55 = vsel %vm3061_vm1, %v3189_v12, 0.0 }
 0x2ab   : > { %v3040_v37 = vadd.f32 %v3007_v28, %v2975_v18  ;;  %v3200_v45 = vpop.xlane.xlu0 %3199  ;;  %v2942_v18 = vld [vmem:[%s5193_s22 + $0x30] sm:$0xff]  ;;  %v2855_v28 = vand.u32 2147483647, %v5347_v21  ;;  %v2854_v21 = vsel %vm5438_vm15, %v5369_v13, %v2850_v22  ;;  %v3228_v32 = vsel %vm3061_vm1, %v3191_v48, 0.0 }
 0x2ac   : > { %v3233_v61 = vmul.f32 %v3883_v35, %v3200_v45  ;;  %v2959_v11 = vadd.f32 %v5203_v38, %v2942_v18  ;;  %v2842_v35 = vand.u32 2147483648, %v5351_v23  ;;  %v2699_v22 = vsub.f32 0.0, %v5314_v43 }
 0x2ad   : > { %v3053_v5 = vmul.f32 %v3040_v37, %v2829_v60  ;;  %v1899_v37 = vadd.f32 %v5277_v19, %v5095_v36  ;;  %v2840_v60 = vand.u32 2147483647, %v5351_v23  ;;  %v3219_v36 = vsel %vm3061_vm1, %v3188_v39, 0.0 }
 0x2ae   : > { %3247 = vst.msk [vmem:[%s5344_s15 + $0x10] sm:$0xff] %vm3244_vm3, %v3233_v61  ;;  %v2858_v61 = vor.u32 1.1754944e-38, %v2857_v50  ;;  %vm2856_vm4 = vcmp.eq.f32.partialorder %v2855_v28, 8.507059e+37  ;;  %v2839_v23 = vsel %vm5449_vm2, %v5375_v16, %v2835_v9  ;;  %v2843_v53 = vor.u32 1.1754944e-38, %v2842_v35  ;;  %v3856_v54 = vpop.eup %3855  ;;  %v2944_v35 = vld [vmem:[%s5193_s22 + $0x40] sm:$0xff] }
 0x2af   : > { %3067 = vst.msk [vmem:[%s5242_s30 + $0x28] sm:$0xff] %vm3061_vm1, %v3053_v5  ;;  %v2976_v5 = vmul.f32 %v5213_v40, %v2959_v11  ;;  %v2156_v8 = vadd.f32 %v5288_v63, %v1899_v37  ;;  %vm2841_vm5 = vcmp.eq.f32.partialorder %v2840_v60, 8.507059e+37  ;;  %v2962_v16 = vadd.f32 %v5203_v38, %v2945_v52 }
 0x2b0   : > { %v2859_v27 = vsel %vm2856_vm4, %v2858_v61, %v2854_v21  ;;  %v2844_v20 = vsel %vm2841_vm5, %v2843_v53, %v2839_v23  ;;  %v2722_v11 = vmul.f32 1.442695, %v2699_v22  ;;  %v2726_v37 = vmul.f32 1.442695, %v2701_v57 }
 0x2b1   : > { %3208 = vadd.xlane.f32.xlu2 %v3207_v51  ;;  %v2413_v0 = vadd.f32 %v5290_v31, %v2156_v8  ;;  %v2885_v31 = vand.u32 2147483647, %v5371_v58 }
 0x2b3   : > { %v3005_v6 = vpop.permute.xlu1 %3004  ;;  %v2670_v63 = vadd.f32 %v5297_v56, %v2413_v0  ;;  %vm2886_vm9 = vcmp.eq.f32.partialorder %v2885_v31, 8.507059e+37 }
 0x2b4   : > { %v3039_v25 = vadd.f32 %v3005_v6, %v2974_v59  ;;  %v2887_v6 = vand.u32 2147483648, %v5371_v58  ;;  %v3096_v58 = vand.u32 2147483647, %v5309_v62 }
 0x2b5   : > { %v5481_v18 = vadd.f32 %v3884_v4, %v2670_v63 }
 0x2b6   : > { %v3052_v24 = vmul.f32 %v3039_v25, %v2814_v44  ;;  %3214 = vadd.xlane.f32.xlu1 %v3213_v3  ;;  %v2979_v44 = vmul.f32 %v5213_v40, %v2962_v16  ;;  %v2884_v25 = vsel %vm2883_vm8, %v5410_v26, %v2880_v46  ;;  %v2888_v7 = vor.u32 1.1754944e-38, %v2887_v6 }
 0x2b7   : > { %v3109_v26 = vsub.f32 0.0, %v3096_v58  ;;  %v3099_v39 = vand.u32 2147483647, %v5481_v18  ;;  %v3083_v16 = vmin.f32 %v5309_v62, 0.0  ;;  %v2700_v57 = vsub.f32 0.0, %v5481_v18 }
 0x2b8   : > { %3066 = vst.msk [vmem:[%s5242_s30 + $0x20] sm:$0xff] %vm3061_vm1, %v3052_v24  ;;  %v2889_v17 = vsel %vm2886_vm9, %v2888_v7, %v2884_v25  ;;  %v2736_v24 = vadd.f32 1.0, %v3856_v54  ;;  %v3887_v7 = vld [vmem:[%s3976_s18 + $0x3b] sm:$0xff] }
 0x2b9   : > { %v3130_v50 = vmul.f32 1.442695, %v3109_v26  ;;  %v3112_v34 = vsub.f32 0.0, %v3099_v39 }
 0x2ba   : > { %3857 = vrcp.f32 %v2736_v24  ;;  %v2872_v42 = vand.u32 2147483648, %v2736_v24  ;;  %vm2866_vm11 = vweird.f32 %v2736_v24  ;;  %v2870_v1 = vand.u32 2147483647, %v2736_v24 }
 0x2bb   : > { %v3011_v10 = vpop.permute.xlu1 %3010  ;;  %3859 = vpow2.f32 %v3130_v50  ;;  %v2948_v50 = vld [vmem:[%s5193_s22 + $0x60] sm:$0xff] }
 0x2bc   : > { %v3042_v13 = vadd.f32 %v3011_v10, %v2977_v29  ;;  %3220 = vadd.xlane.f32.xlu0 %v3219_v36  ;;  %3861 = vpow2.f32 %v2722_v11  ;;  %v3136_v29 = vmul.f32 1.442695, %v3112_v34  ;;  %v3885_v36 = vld [vmem:[%s3976_s18 + $0x23] sm:$0xff]  ;;  %vm2871_vm13 = vcmp.eq.f32.partialorder %v2870_v1, 8.507059e+37  ;;  %v3888_v1 = vld [vmem:[%s3976_s18 + $0x33] sm:$0xff] }
 0x2be   : > { %v3055_v51 = vmul.f32 %v3042_v13, %v2859_v27  ;;  %v3009_v59 = vpop.permute.xlu0 %3008  ;;  %3223 = vadd.xlane.f32.xlu1 %v3222_v55  ;;  %3863 = vpow2.f32 %v3136_v29  ;;  %v3886_v27 = vld [vmem:[%s3976_s18 + $0x2b] sm:$0xff]  ;;  %v2965_v29 = vadd.f32 %v5203_v38, %v2948_v50 }
 0x2bf   : > { %v3041_v15 = vadd.f32 %v3009_v59, %v2976_v5  ;;  %3865 = vpow2.f32 %v2726_v37  ;;  %v2961_v5 = vadd.f32 %v5203_v38, %v2944_v35 }
 0x2c0   : > { %3069 = vst.msk [vmem:[%s5242_s30 + $0x38] sm:$0xff] %vm3061_vm1, %v3055_v51  ;;  %v3858_v28 = vpop.eup %3857  ;;  %v2982_v35 = vmul.f32 %v5213_v40, %v2965_v29 }
 0x2c1   : > { %v3054_v30 = vmul.f32 %v3041_v15, %v2844_v20  ;;  %v3860_v9 = vpop.eup %3859  ;;  %v2862_v45 = vmul.f32 %v3858_v28, %v2736_v24  ;;  %vm2867_vm10 = vweird.f32 %v3858_v28  ;;  %v2978_v8 = vmul.f32 %v5213_v40, %v2961_v5 }
 0x2c2   : > { %v3148_v12 = vadd.f32 1.0, %v3860_v9  ;;  %v3862_v43 = vpop.eup %3861  ;;  %vm2868_vm12 = vmor %vm2866_vm11, %vm2867_vm10  ;;  %v2873_v15 = vor.u32 1.1754944e-38, %v2872_v42 }
 0x2c3   : > { %3068 = vst.msk [vmem:[%s5242_s30 + $0x30] sm:$0xff] %vm3061_vm1, %v3054_v30  ;;  %v2863_v49 = vsub.f32 1.0, %v2862_v45  ;;  %v5491_v21 = vadd.f32 1.0, %v3862_v43  ;;  %v2724_v43 = vmul.f32 1.442695, %v2700_v57 }
 0x2c4   : > { %3229 = vadd.xlane.f32.xlu0 %v3228_v32  ;;  %3867 = vlog2.f32 %v3148_v12  ;;  %v3864_v60 = vpop.eup %3863 }
 0x2c5   : > { %v2864_v47 = vmul.f32 %v3858_v28, %v2863_v49  ;;  %v3866_v61 = vpop.eup %3865  ;;  %3869 = vrcp.f32 %v5491_v21  ;;  %v3151_v41 = vadd.f32 1.0, %v3864_v60  ;;  %v2902_v22 = vand.u32 2147483648, %v5491_v21 }
 0x2c6   : > { %v3015_v56 = vpop.permute.xlu0 %3014  ;;  %v5497_v13 = vadd.f32 1.0, %v3866_v61  ;;  %vm2896_vm15 = vweird.f32 %v5491_v21  ;;  %v2900_v39 = vand.u32 2147483647, %v5491_v21 }
 0x2c7   : > { %v3044_v3 = vadd.f32 %v3015_v56, %v2979_v44  ;;  %v2865_v52 = vadd.f32 %v3858_v28, %v2864_v47  ;;  %3871 = vlog2.f32 %v3151_v41  ;;  %v3086_v56 = vmin.f32 %v5481_v18, 0.0 }
 0x2c8   : > { %3873 = vrcp.f32 %v5497_v13  ;;  %v2903_v9 = vor.u32 1.1754944e-38, %v2902_v22  ;;  %vm2901_vm2 = vcmp.eq.f32.partialorder %v2900_v39, 8.507059e+37  ;;  %vm2926_vm5 = vweird.f32 %v5497_v13 }
 0x2c9   : > { %v3057_v14 = vmul.f32 %v3044_v3, %v2889_v17  ;;  %3018 = vrot.lane.b32.xlu2 %v5481_v18, %s3904_s17  ;;  %v2869_v59 = vsel %vm2868_vm12, %v3858_v28, %v2865_v52  ;;  %v2946_v3 = vld [vmem:[%s5193_s22 + $0x50] sm:$0xff]  ;;  %v2930_v18 = vand.u32 2147483647, %v5497_v13  ;;  %3875 = vpow2.f32 %v2724_v43 }
 0x2ca   : > { %v3868_v33 = vpop.eup %3867  ;;  %v2874_v2 = vsel %vm2871_vm13, %v2873_v15, %v2869_v59 }
 0x2cb   : > { %3071 = vst.msk [vmem:[%s5242_s30 + $0x48] sm:$0xff] %vm3061_vm1, %v3057_v14  ;;  %v3170_v51 = vmul.f32 0.6931472, %v3868_v33  ;;  %v3870_v53 = vpop.eup %3869  ;;  %v2963_v14 = vadd.f32 %v5203_v38, %v2946_v3  ;;  %vm2931_vm7 = vcmp.eq.f32.partialorder %v2930_v18, 8.507059e+37 }
 0x2cc   : > { %v2892_v30 = vmul.f32 %v3870_v53, %v5491_v21  ;;  %vm2897_vm14 = vweird.f32 %v3870_v53  ;;  %v2932_v21 = vand.u32 2147483648, %v5497_v13 }
 0x2cd   : > { %v3187_v20 = vsub.f32 %v3083_v16, %v3170_v51  ;;  %v3872_v46 = vpop.eup %3871  ;;  %v2980_v11 = vmul.f32 %v5213_v40, %v2963_v14  ;;  %vm2898_vm0 = vmor %vm2896_vm15, %vm2897_vm14 }
 0x2ce   : > { %v3874_v6 = vpop.eup %3873  ;;  %v3176_v44 = vmul.f32 0.6931472, %v3872_v46  ;;  %v2893_v25 = vsub.f32 1.0, %v2892_v30  ;;  %v2933_v61 = vor.u32 1.1754944e-38, %v2932_v21 }
 0x2cf   : > { %v3216_v31 = vsel %vm3061_vm1, %v3187_v20, 0.0  ;;  %v2922_v4 = vmul.f32 %v3874_v6, %v5497_v13  ;;  %vm2927_vm4 = vweird.f32 %v3874_v6  ;;  %v3876_v41 = vpop.eup %3875 }
 0x2d0   : > { %v3190_v58 = vsub.f32 %v3086_v56, %v3176_v44  ;;  %v2894_v17 = vmul.f32 %v3870_v53, %v2893_v25  ;;  %vm2928_vm6 = vmor %vm2926_vm5, %vm2927_vm4  ;;  %v2739_v33 = vadd.f32 1.0, %v3876_v41  ;;  %v3891_v25 = vld [vmem:[%s3976_s18 + $0x5b] sm:$0xff]  ;;  %v3892_v56 = vld [vmem:[%s3976_s18 + $0x6b] sm:$0xff] }
 0x2d1   : > { %v2923_v54 = vsub.f32 1.0, %v2922_v4 }
 0x2d2   : > { %v3225_v26 = vsel %vm3061_vm1, %v3190_v58, 0.0  ;;  %v2895_v24 = vadd.f32 %v3870_v53, %v2894_v17  ;;  %3877 = vrcp.f32 %v2739_v33  ;;  %v2917_v59 = vand.u32 2147483648, %v2739_v33  ;;  %v3893_v58 = vld [vmem:[%s3976_s18 + $0x4b] sm:$0xff] }
 0x2d3   : > { %v2924_v34 = vmul.f32 %v3874_v6, %v2923_v54  ;;  %vm2911_vm9 = vweird.f32 %v2739_v33  ;;  %v3894_v54 = vld [vmem:[%s3976_s18 + $0x63] sm:$0xff] }
 0x2d4   : > { %v2899_v28 = vsel %vm2898_vm0, %v3870_v53, %v2895_v24 }
 0x2d5   : > { %v2925_v12 = vadd.f32 %v3874_v6, %v2924_v34  ;;  %v2904_v49 = vsel %vm2901_vm2, %v2903_v9, %v2899_v28 }
 0x2d7   : > { %v2929_v47 = vsel %vm2928_vm6, %v3874_v6, %v2925_v12 }
 0x2d8   : > { %v3878_v13 = vpop.eup %3877 }
 0x2d9   : > { %vm2912_vm8 = vweird.f32 %v3878_v13 }
 0x2da   : > { %vm2913_vm10 = vmor %vm2911_vm9, %vm2912_vm8 }
 0x2e3   : > { %v3203_v10 = vpop.xlane.xlu2 %3202 }
 0x2e4   : > { %v3234_v19 = vmul.f32 %v3885_v36, %v3203_v10 }
 0x2e6   : > { %3248 = vst.msk [vmem:[%s5344_s15 + $0x18] sm:$0xff] %vm3244_vm3, %v3234_v19  ;;  %v3206_v23 = vpop.xlane.xlu1 %3205  ;;  %v2934_v19 = vsel %vm2931_vm7, %v2933_v61, %v2929_v47 }
 0x2e7   : > { %v3235_v55 = vmul.f32 %v3886_v27, %v3206_v23  ;;  %v2907_v23 = vmul.f32 %v3878_v13, %v2739_v33  ;;  %v2947_v27 = vld [vmem:[%s5193_s22 + $0x58] sm:$0xff] }
 0x2e8   : > { %v2964_v51 = vadd.f32 %v5203_v38, %v2947_v27  ;;  %v2918_v38 = vor.u32 1.1754944e-38, %v2917_v59 }
 0x2e9   : > { %3249 = vst.msk [vmem:[%s5344_s15 + $0x20] sm:$0xff] %vm3244_vm3, %v3235_v55  ;;  %v2908_v52 = vsub.f32 1.0, %v2907_v23 }
 0x2ea   : > { %v2981_v16 = vmul.f32 %v5213_v40, %v2964_v51  ;;  %v3890_v40 = vld [vmem:[%s3976_s18 + $0x53] sm:$0xff] }
 0x2eb   : > { %v3013_v48 = vpop.permute.xlu2 %3012  ;;  %v2909_v55 = vmul.f32 %v3878_v13, %v2908_v52 }
 0x2ec   : > { %v3043_v0 = vadd.f32 %v3013_v48, %v2978_v8  ;;  %v2915_v48 = vand.u32 2147483647, %v2739_v33 }
 0x2ed   : > { %v2910_v53 = vadd.f32 %v3878_v13, %v2909_v55 }
 0x2ee   : > { %v3056_v63 = vmul.f32 %v3043_v0, %v2874_v2  ;;  %v3889_v0 = vld [vmem:[%s3976_s18 + $0x43] sm:$0xff]  ;;  %vm2916_vm11 = vcmp.eq.f32.partialorder %v2915_v48, 8.507059e+37 }
 0x2ef   : > { %v2914_v20 = vsel %vm2913_vm10, %v3878_v13, %v2910_v53 }
 0x2f0   : > { %3070 = vst.msk [vmem:[%s5242_s30 + $0x40] sm:$0xff] %vm3061_vm1, %v3056_v63  ;;  %v2919_v63 = vsel %vm2916_vm11, %v2918_v38, %v2914_v20 }
 0x2f1   : > { %v3212_v32 = vpop.xlane.xlu0 %3211 }
 0x2f2   : > { %v3237_v62 = vmul.f32 %v3887_v7, %v3212_v32  ;;  %3217 = vadd.xlane.f32.xlu2 %v3216_v31 }
 0x2f4   : > { %3251 = vst.msk [vmem:[%s5344_s15 + $0x30] sm:$0xff] %vm3244_vm3, %v3237_v62 }
 0x2fa   : > { %3226 = vadd.xlane.f32.xlu2 %v3225_v26 }
 0x2fe   : > { %v3017_v37 = vpop.permute.xlu1 %3016 }
 0x2ff   : > { %v3045_v45 = vadd.f32 %v3017_v37, %v2980_v11 }
 0x301   : > { %v3058_v60 = vmul.f32 %v3045_v45, %v2904_v49 }
 0x303   : > { %3072 = vst.msk [vmem:[%s5242_s30 + $0x50] sm:$0xff] %vm3061_vm1, %v3058_v60 }
 0x304   : > { %v3021_v10 = vpop.permute.xlu0 %3020 }
 0x305   : > { %v3047_v36 = vadd.f32 %v3021_v10, %v2982_v35 }
 0x307   : > { %v3060_v5 = vmul.f32 %v3047_v36, %v2934_v19 }
 0x309   : > { %3074 = vst.msk [vmem:[%s5242_s30 + $0x60] sm:$0xff] %vm3061_vm1, %v3060_v5 }
 0x324   : > { %v3209_v42 = vpop.xlane.xlu2 %3208 }
 0x325   : > { %v3236_v8 = vmul.f32 %v3888_v1, %v3209_v42 }
 0x327   : > { %3250 = vst.msk [vmem:[%s5344_s15 + $0x28] sm:$0xff] %vm3244_vm3, %v3236_v8 }
 0x329   : > { %v3215_v15 = vpop.xlane.xlu1 %3214 }
 0x32a   : > { %v3238_v2 = vmul.f32 %v3889_v0, %v3215_v15 }
 0x32c   : > { %3252 = vst.msk [vmem:[%s5344_s15 + $0x38] sm:$0xff] %vm3244_vm3, %v3238_v2  ;;  %v3019_v30 = vpop.permute.xlu2 %3018 }
 0x32d   : > { %v3046_v46 = vadd.f32 %v3019_v30, %v2981_v16 }
 0x32f   : > { %v3059_v6 = vmul.f32 %v3046_v46, %v2919_v63  ;;  %v3221_v32 = vpop.xlane.xlu0 %3220 }
 0x330   : > { %v3240_v31 = vmul.f32 %v3890_v40, %v3221_v32 }
 0x331   : > { %3073 = vst.msk [vmem:[%s5242_s30 + $0x58] sm:$0xff] %vm3061_vm1, %v3059_v6  ;;  %v3224_v44 = vpop.xlane.xlu1 %3223 }
 0x332   : > { %3254 = vst.msk [vmem:[%s5344_s15 + $0x48] sm:$0xff] %vm3244_vm3, %v3240_v31  ;;  %v3241_v7 = vmul.f32 %v3891_v25, %v3224_v44 }
 0x334   : > { %3255 = vst.msk [vmem:[%s5344_s15 + $0x50] sm:$0xff] %vm3244_vm3, %v3241_v7 }
 0x337   : > { %v3230_v62 = vpop.xlane.xlu0 %3229 }
 0x338   : > { %v3243_v4 = vmul.f32 %v3892_v56, %v3230_v62 }
 0x33a   : > { %3257 = vst.msk [vmem:[%s5344_s15 + $0x60] sm:$0xff] %vm3244_vm3, %v3243_v4 }
 0x365   : > { %v3218_v3 = vpop.xlane.xlu2 %3217 }
 0x366   : > { %v3239_v17 = vmul.f32 %v3893_v58, %v3218_v3 }
 0x368   : > { %3253 = vst.msk [vmem:[%s5344_s15 + $0x40] sm:$0xff] %vm3244_vm3, %v3239_v17 }
 0x36d   : > { %v3227_v14 = vpop.xlane.xlu2 %3226 }
 0x36e   : > { %v3242_v26 = vmul.f32 %v3894_v54, %v3227_v14 }
 0x370   : > { %3256 = vst.msk [vmem:[%s5344_s15 + $0x58] sm:$0xff] %vm3244_vm3, %v3242_v26 }
 0x371 PF: > { %s21_s13 = sadd.s32 1, %s3901_s13  }
 0x372   : > { %p18_p4 = scmp.ge.s32.totalorder %s21_s13, 4  }
 0x374   :  { %20 = sbr.rel (!%p18_p4) target bundleno = 1 (0x1), region = 124 }

</bundles_post_ra>
